<compile_context>
chip_gen: v5e
topology: v5e:2x2
jax: 0.10.0
libtpu: 0.0.40
codegen_flags: <defaults>
</compile_context>

<pallas_src>
import functools

import jax
import jax.numpy as jnp
from jax import lax
from jax.experimental import pallas as pl
from jax.experimental.pallas import tpu as pltpu

LANE = 128  # TPU lane width; all GEMM N/K dims are padded to a multiple of this.


def _round_up(x, m):
    return (x + m - 1) // m * m


# ----------------------------- Pallas kernels ------------------------------

def _conv_relu_pool_kernel(p_ref, w_ref, b_ref, o_ref, *, block_rows):
    """Fused conv-as-GEMM + bias + ReLU + 2x2 max-pool for one batch sample.

    p_ref : (1, 4*block_rows, Kpad)  im2col patches; the four pool-window corners
                                     (dh, dw) are four contiguous, 8-row-aligned blocks.
    w_ref : (Kpad, 128)              weight matrix (zero-padded K and Cout).
    b_ref : (1, 128)                 bias (zero-padded).
    o_ref : (1, block_rows, 128)     pooled activations, lane-dense channel dim.
    """
    acc = jnp.dot(p_ref[0], w_ref[...], preferred_element_type=jnp.float32)
    acc = jnp.maximum(acc + b_ref[...], 0.0)
    bp = block_rows
    pooled = jnp.maximum(jnp.maximum(acc[0 * bp:1 * bp], acc[1 * bp:2 * bp]),
                         jnp.maximum(acc[2 * bp:3 * bp], acc[3 * bp:4 * bp]))
    o_ref[0] = pooled


def _mlp_kernel(x_ref, w1_ref, b1_ref, w2_ref, b2_ref, w3_ref, b3_ref, o_ref):
    """fc1 + ReLU + fc2 + ReLU + fc3 fused in one kernel (all operands in VMEM)."""
    h = jnp.dot(x_ref[...], w1_ref[...], preferred_element_type=jnp.float32)
    h = jnp.maximum(h + b1_ref[...], 0.0)
    h = jnp.dot(h, w2_ref[...], preferred_element_type=jnp.float32)
    h = jnp.maximum(h + b2_ref[...], 0.0)
    h = jnp.dot(h, w3_ref[...], preferred_element_type=jnp.float32)
    o_ref[...] = h + b3_ref[...]


# ----------------------------- Kernel wrappers ------------------------------

def conv_relu_pool(x_nhwc, wmat, bias, *, khw=5):
    """Conv2d(k=5, valid, stride 1) + ReLU + MaxPool2d(2,2) on NHWC input, one Pallas call.

    Returns (N, Ho//2, Wo//2, 128) with the true output channels in the leading lanes.
    """
    n, h, w, _ = x_nhwc.shape
    ho, wo = h - khw + 1, w - khw + 1
    hp, wp = ho // 2, wo // 2
    rows = hp * wp                       # pooled spatial positions
    rows_p = _round_up(rows, 8)          # sublane-aligned block height
    kpad = wmat.shape[0]

    # Single fused XLA gather for im2col (no slice/stack/transpose chain in HBM).
    patches = lax.conv_general_dilated_patches(
        x_nhwc, (khw, khw), (1, 1), "VALID",
        dimension_numbers=("NHWC", "HWIO", "NHWC"),
        precision=lax.Precision.HIGHEST)                       # (N, Ho, Wo, F)
    f = patches.shape[-1]
    # Reorder rows to (dh, dw, ph, pw) so the in-kernel 2x2 pool is a max over four
    # contiguous row blocks (no in-kernel reshapes or strided sublane access), and
    # pad rows/K once so every tile is (8,128)-aligned and lane-dense.
    patches = patches.reshape(n, hp, 2, wp, 2, f).transpose(0, 2, 4, 1, 3, 5)
    patches = patches.reshape(n, 4, rows, f)
    patches = jnp.pad(patches, ((0, 0), (0, 0), (0, rows_p - rows), (0, kpad - f)))
    patches = patches.reshape(n, 4 * rows_p, kpad)

    out = pl.pallas_call(
        functools.partial(_conv_relu_pool_kernel, block_rows=rows_p),
        out_shape=jax.ShapeDtypeStruct((n, rows_p, LANE), jnp.float32),
        grid_spec=pltpu.PrefetchScalarGridSpec(
            num_scalar_prefetch=0,
            grid=(n,),                                          # one sample per step
            in_specs=[
                pl.BlockSpec((1, 4 * rows_p, kpad), lambda i: (i, 0, 0)),
                pl.BlockSpec((kpad, LANE), lambda i: (0, 0)),
                pl.BlockSpec((1, LANE), lambda i: (0, 0)),
            ],
            out_specs=pl.BlockSpec((1, rows_p, LANE), lambda i: (i, 0, 0)),
        ),
        compiler_params=pltpu.CompilerParams(
            dimension_semantics=("parallel",)),                 # megacore sharding (v7x)
    )(patches, wmat, bias)
    return out[:, :rows, :].reshape(n, hp, wp, LANE)


def fused_mlp(act, prep):
    """fc1/fc2/fc3 (padded to 128 lanes) in a single Pallas call; act: (N, 3200)."""
    # Weights total < 2 MiB, so whole-array VMEM residency is fine for small batch.
    # For large batches one would add a parallel M grid over rows of `act`.
    n = act.shape[0]
    vspec = pl.BlockSpec(memory_space=pltpu.MemorySpace.VMEM)
    return pl.pallas_call(
        _mlp_kernel,
        out_shape=jax.ShapeDtypeStruct((n, LANE), jnp.float32),
        in_specs=[vspec] * 7,
        out_specs=vspec,
    )(act, prep["fc1_w"], prep["fc1_b"], prep["fc2_w"], prep["fc2_b"],
      prep["fc3_w"], prep["fc3_b"])


# ----------------------------- Model definition ----------------------------

def init_params(key):
    """Deterministic synthetic parameters matching TheModelClass's shapes (PyTorch layout)."""
    ks = jax.random.split(key, 10)

    def u(k, shape, fan_in):
        bound = 1.0 / jnp.sqrt(fan_in)
        return jax.random.uniform(k, shape, jnp.float32, -bound, bound)

    return {
        "conv1_w": u(ks[0], (6, 3, 5, 5), 3 * 5 * 5),
        "conv1_b": u(ks[1], (6,), 3 * 5 * 5),
        "conv2_w": u(ks[2], (16, 6, 5, 5), 6 * 5 * 5),
        "conv2_b": u(ks[3], (16,), 6 * 5 * 5),
        "fc1_w": u(ks[4], (120, 16 * 5 * 5), 16 * 5 * 5),
        "fc1_b": u(ks[5], (120,), 16 * 5 * 5),
        "fc2_w": u(ks[6], (84, 120), 120),
        "fc2_b": u(ks[7], (84,), 120),
        "fc3_w": u(ks[8], (10, 84), 84),
        "fc3_b": u(ks[9], (10,), 84),
    }


def prepare_params(params):
    """One-time repack of PyTorch-layout weights into lane-dense Pallas layouts."""
    prep = {}
    # Conv stages: the GEMM weight rows must follow conv_general_dilated_patches'
    # feature ordering.  Derive it by pushing the weights through the same transform
    # (full-filter VALID patches -> 1x1 spatial), so ordering is consistent by
    # construction.  Pad K and Cout to multiples of 128.
    for name in ("conv1", "conv2"):
        w = params[name + "_w"]                     # (Cout, Cin, 5, 5)  OIHW
        b = params[name + "_b"]
        cout, cin, kh, kw = w.shape
        f = cin * kh * kw
        kpad = _round_up(f, LANE)
        w_nhwc = jnp.transpose(w, (0, 2, 3, 1))     # Cout as batch, channels last
        wpat = lax.conv_general_dilated_patches(
            w_nhwc, (kh, kw), (1, 1), "VALID",
            dimension_numbers=("NHWC", "HWIO", "NHWC"),
            precision=lax.Precision.HIGHEST)        # (Cout, 1, 1, F)
        wmat = wpat.reshape(cout, f).T              # (F, Cout)
        prep[name + "_w"] = jnp.pad(wmat, ((0, kpad - f), (0, LANE - cout)))
        prep[name + "_b"] = jnp.pad(b, (0, LANE - cout)).reshape(1, LANE)

    # fc1: absorb the (h, w, c) -> (c, h, w) flatten permutation of x.view(-1, 400)
    # into the weight matrix; pad K: 400 -> 25*128 = 3200 and N: 120 -> 128.
    w1 = params["fc1_w"].reshape(120, 16, 25)       # [o, c, hw]
    w1 = jnp.transpose(w1, (2, 1, 0))               # [hw, c, o]
    w1 = jnp.pad(w1, ((0, 0), (0, LANE - 16), (0, LANE - 120)))
    prep["fc1_w"] = w1.reshape(25 * LANE, LANE)     # row index = hw*128 + c
    prep["fc1_b"] = jnp.pad(params["fc1_b"], (0, LANE - 120)).reshape(1, LANE)

    prep["fc2_w"] = jnp.pad(params["fc2_w"].T, ((0, LANE - 120), (0, LANE - 84)))
    prep["fc2_b"] = jnp.pad(params["fc2_b"], (0, LANE - 84)).reshape(1, LANE)
    prep["fc3_w"] = jnp.pad(params["fc3_w"].T, ((0, LANE - 84), (0, LANE - 10)))
    prep["fc3_b"] = jnp.pad(params["fc3_b"], (0, LANE - 10)).reshape(1, LANE)
    return prep


def forward(prep, x):
    """Forward pass of TheModelClass. x: (N, 3, 32, 32) float32 (NCHW, like PyTorch)."""
    n = x.shape[0]
    x = jnp.transpose(x, (0, 2, 3, 1))                                   # NHWC
    h = conv_relu_pool(x, prep["conv1_w"], prep["conv1_b"])              # (N,14,14,128)
    h = conv_relu_pool(h[..., :6], prep["conv2_w"], prep["conv2_b"])     # (N, 5, 5,128)
    act = h.reshape(n, -1)              # (N, 3200); (h, w, c)-order, matched by fc1_w
    logits = fused_mlp(act, prep)                                        # (N, 128)
    return logits[:, :10]


# ----------------------------- Pure-JAX reference --------------------------

def forward_ref(params, x):
    def conv(x, w, b):
        y = lax.conv_general_dilated(x, w, (1, 1), "VALID",
                                     dimension_numbers=("NCHW", "OIHW", "NCHW"))
        return jnp.maximum(y + b[None, :, None, None], 0.0)

    def pool(x):
        return lax.reduce_window(x, -jnp.inf, lax.max,
                                 (1, 1, 2, 2), (1, 1, 2, 2), "VALID")

    x = pool(conv(x, params["conv1_w"], params["conv1_b"]))
    x = pool(conv(x, params["conv2_w"], params["conv2_b"]))
    x = x.reshape(-1, 16 * 5 * 5)
    x = jnp.maximum(x @ params["fc1_w"].T + params["fc1_b"], 0.0)
    x = jnp.maximum(x @ params["fc2_w"].T + params["fc2_b"], 0.0)
    return x @ params["fc3_w"].T + params["fc3_b"]


# ----------------------------- Main -----------------------------------------

if __name__ == "__main__":
    key = jax.random.PRNGKey(0)
    k_param, k_x = jax.random.split(key)
    params = init_params(k_param)
    prep = prepare_params(params)
    # Input spatial size must be 32x32 / 3 channels so the 16*5*5 flatten holds.
    x = jax.random.normal(k_x, (2, 3, 32, 32), dtype=jnp.float32)

    fwd = jax.jit(forward)
    out = jax.block_until_ready(fwd(prep, x))
    ref = jax.block_until_ready(forward_ref(params, x))

    assert out.shape == (2, 10), out.shape
    assert jnp.allclose(out, ref, rtol=1e-4, atol=1e-4), "mismatch vs JAX reference"
    print("KERNEL_OK")
</pallas_src>

<mosaic_0001>
module attributes {stable_mosaic.version = 11 : i64} {
  func.func @_conv_relu_pool_kernel(%arg0: i32, %arg1: memref<1x800x128xf32, #tpu.memory_space<vmem>>, %arg2: memref<128x128xf32, #tpu.memory_space<vmem>>, %arg3: memref<1x128xf32, #tpu.memory_space<vmem>>, %arg4: memref<1x200x128xf32, #tpu.memory_space<vmem>>) attributes {dimension_semantics = [#tpu.dimension_semantics<parallel>], iteration_bounds = array<i64: 2>, scalar_prefetch = 0 : i64, scratch_operands = 0 : i64, tpu.core_type = #tpu.core_type<tc>, window_params = [{transform_indices = @transform_0, window_bounds = array<i64: 1, 800, 128>}, {pipeline_mode = #tpu.pipeline_mode<synchronous>, transform_indices = @transform_1, window_bounds = array<i64: 128, 128>}, {pipeline_mode = #tpu.pipeline_mode<synchronous>, transform_indices = @transform_2, window_bounds = array<i64: 1, 128>}, {transform_indices = @transform_3, window_bounds = array<i64: 1, 200, 128>}]} {
    %c0 = arith.constant 0 : index
    %c0_0 = arith.constant 0 : index
    %c0_1 = arith.constant 0 : index
    %0 = vector.load %arg1[%c0, %c0_0, %c0_1] : memref<1x800x128xf32, #tpu.memory_space<vmem>>, vector<1x800x128xf32>
    %1 = vector.shape_cast %0 : vector<1x800x128xf32> to vector<800x128xf32>
    %c0_2 = arith.constant 0 : index
    %c0_3 = arith.constant 0 : index
    %2 = vector.load %arg2[%c0_2, %c0_3] : memref<128x128xf32, #tpu.memory_space<vmem>>, vector<128x128xf32>
    %cst = arith.constant dense<0.000000e+00> : vector<800x128xf32>
    %3 = tpu.matmul %1, %2, %cst {dimension_numbers = #tpu.dot_dimension_numbers<[1], [0], [0], [1], [0, 0, 1, 1], [], []>} : vector<800x128xf32>, vector<128x128xf32>, vector<800x128xf32> -> vector<800x128xf32>
    %c0_4 = arith.constant 0 : index
    %c0_5 = arith.constant 0 : index
    %4 = vector.load %arg3[%c0_4, %c0_5] : memref<1x128xf32, #tpu.memory_space<vmem>>, vector<1x128xf32>
    %5 = vector.broadcast %4 : vector<1x128xf32> to vector<800x128xf32>
    %6 = arith.addf %3, %5 : vector<800x128xf32>
    %cst_6 = arith.constant 0.000000e+00 : f32
    %7 = vector.broadcast %cst_6 : f32 to vector<800x128xf32>
    %8 = arith.maximumf %6, %7 : vector<800x128xf32>
    %9 = vector.extract_strided_slice %8 {offsets = [0, 0], sizes = [200, 128], strides = [1, 1]} : vector<800x128xf32> to vector<200x128xf32>
    %10 = vector.extract_strided_slice %8 {offsets = [200, 0], sizes = [200, 128], strides = [1, 1]} : vector<800x128xf32> to vector<200x128xf32>
    %11 = arith.maximumf %9, %10 : vector<200x128xf32>
    %12 = vector.extract_strided_slice %8 {offsets = [400, 0], sizes = [200, 128], strides = [1, 1]} : vector<800x128xf32> to vector<200x128xf32>
    %13 = vector.extract_strided_slice %8 {offsets = [600, 0], sizes = [200, 128], strides = [1, 1]} : vector<800x128xf32> to vector<200x128xf32>
    %14 = arith.maximumf %12, %13 : vector<200x128xf32>
    %15 = arith.maximumf %11, %14 : vector<200x128xf32>
    %c0_7 = arith.constant 0 : index
    %c0_8 = arith.constant 0 : index
    %c0_9 = arith.constant 0 : index
    %16 = vector.load %arg4[%c0_7, %c0_8, %c0_9] : memref<1x200x128xf32, #tpu.memory_space<vmem>>, vector<1x200x128xf32>
    %17 = vector.shape_cast %16 : vector<1x200x128xf32> to vector<200x128xf32>
    %18 = vector.shape_cast %15 : vector<200x128xf32> to vector<1x200x128xf32>
    tpu.vector_store %arg4[%c0_7, %c0_8, %c0_9], %18 {strides = array<i32>} : memref<1x200x128xf32, #tpu.memory_space<vmem>>, vector<1x200x128xf32>,
    return
  }
  func.func @transform_0(%arg0: i32) -> (i32, i32, i32) {
    %c0_i32 = arith.constant 0 : i32
    %c0_i32_0 = arith.constant 0 : i32
    %c0_i32_1 = arith.constant 0 : i32
    return %arg0, %c0_i32, %c0_i32_0 : i32, i32, i32
  }
  func.func @transform_1(%arg0: i32) -> (i32, i32) {
    %c0_i32 = arith.constant 0 : i32
    %c0_i32_0 = arith.constant 0 : i32
    %c0_i32_1 = arith.constant 0 : i32
    return %c0_i32, %c0_i32_0 : i32, i32
  }
  func.func @transform_2(%arg0: i32) -> (i32, i32) {
    %c0_i32 = arith.constant 0 : i32
    %c0_i32_0 = arith.constant 0 : i32
    %c0_i32_1 = arith.constant 0 : i32
    return %c0_i32, %c0_i32_0 : i32, i32
  }
  func.func @transform_3(%arg0: i32) -> (i32, i32, i32) {
    %c0_i32 = arith.constant 0 : i32
    %c0_i32_0 = arith.constant 0 : i32
    %c0_i32_1 = arith.constant 0 : i32
    return %arg0, %c0_i32, %c0_i32_0 : i32, i32, i32
  }
}

module attributes {stable_mosaic.version = 11 : i64} {
  func.func @_conv_relu_pool_kernel(%arg0: i32, %arg1: memref<1x128x256xf32, #tpu.memory_space<vmem>>, %arg2: memref<256x128xf32, #tpu.memory_space<vmem>>, %arg3: memref<1x128xf32, #tpu.memory_space<vmem>>, %arg4: memref<1x32x128xf32, #tpu.memory_space<vmem>>) attributes {dimension_semantics = [#tpu.dimension_semantics<parallel>], iteration_bounds = array<i64: 2>, scalar_prefetch = 0 : i64, scratch_operands = 0 : i64, tpu.core_type = #tpu.core_type<tc>, window_params = [{transform_indices = @transform_0, window_bounds = array<i64: 1, 128, 256>}, {pipeline_mode = #tpu.pipeline_mode<synchronous>, transform_indices = @transform_1, window_bounds = array<i64: 256, 128>}, {pipeline_mode = #tpu.pipeline_mode<synchronous>, transform_indices = @transform_2, window_bounds = array<i64: 1, 128>}, {transform_indices = @transform_3, window_bounds = array<i64: 1, 32, 128>}]} {
    %c0 = arith.constant 0 : index
    %c0_0 = arith.constant 0 : index
    %c0_1 = arith.constant 0 : index
    %0 = vector.load %arg1[%c0, %c0_0, %c0_1] : memref<1x128x256xf32, #tpu.memory_space<vmem>>, vector<1x128x256xf32>
    %1 = vector.shape_cast %0 : vector<1x128x256xf32> to vector<128x256xf32>
    %c0_2 = arith.constant 0 : index
    %c0_3 = arith.constant 0 : index
    %2 = vector.load %arg2[%c0_2, %c0_3] : memref<256x128xf32, #tpu.memory_space<vmem>>, vector<256x128xf32>
    %cst = arith.constant dense<0.000000e+00> : vector<128x128xf32>
    %3 = tpu.matmul %1, %2, %cst {dimension_numbers = #tpu.dot_dimension_numbers<[1], [0], [0], [1], [0, 0, 1, 1], [], []>} : vector<128x256xf32>, vector<256x128xf32>, vector<128x128xf32> -> vector<128x128xf32>
    %c0_4 = arith.constant 0 : index
    %c0_5 = arith.constant 0 : index
    %4 = vector.load %arg3[%c0_4, %c0_5] : memref<1x128xf32, #tpu.memory_space<vmem>>, vector<1x128xf32>
    %5 = vector.broadcast %4 : vector<1x128xf32> to vector<128x128xf32>
    %6 = arith.addf %3, %5 : vector<128x128xf32>
    %cst_6 = arith.constant 0.000000e+00 : f32
    %7 = vector.broadcast %cst_6 : f32 to vector<128x128xf32>
    %8 = arith.maximumf %6, %7 : vector<128x128xf32>
    %9 = vector.extract_strided_slice %8 {offsets = [0, 0], sizes = [32, 128], strides = [1, 1]} : vector<128x128xf32> to vector<32x128xf32>
    %10 = vector.extract_strided_slice %8 {offsets = [32, 0], sizes = [32, 128], strides = [1, 1]} : vector<128x128xf32> to vector<32x128xf32>
    %11 = arith.maximumf %9, %10 : vector<32x128xf32>
    %12 = vector.extract_strided_slice %8 {offsets = [64, 0], sizes = [32, 128], strides = [1, 1]} : vector<128x128xf32> to vector<32x128xf32>
    %13 = vector.extract_strided_slice %8 {offsets = [96, 0], sizes = [32, 128], strides = [1, 1]} : vector<128x128xf32> to vector<32x128xf32>
    %14 = arith.maximumf %12, %13 : vector<32x128xf32>
    %15 = arith.maximumf %11, %14 : vector<32x128xf32>
    %c0_7 = arith.constant 0 : index
    %c0_8 = arith.constant 0 : index
    %c0_9 = arith.constant 0 : index
    %16 = vector.load %arg4[%c0_7, %c0_8, %c0_9] : memref<1x32x128xf32, #tpu.memory_space<vmem>>, vector<1x32x128xf32>
    %17 = vector.shape_cast %16 : vector<1x32x128xf32> to vector<32x128xf32>
    %18 = vector.shape_cast %15 : vector<32x128xf32> to vector<1x32x128xf32>
    tpu.vector_store %arg4[%c0_7, %c0_8, %c0_9], %18 {strides = array<i32>} : memref<1x32x128xf32, #tpu.memory_space<vmem>>, vector<1x32x128xf32>,
    return
  }
  func.func @transform_0(%arg0: i32) -> (i32, i32, i32) {
    %c0_i32 = arith.constant 0 : i32
    %c0_i32_0 = arith.constant 0 : i32
    %c0_i32_1 = arith.constant 0 : i32
    return %arg0, %c0_i32, %c0_i32_0 : i32, i32, i32
  }
  func.func @transform_1(%arg0: i32) -> (i32, i32) {
    %c0_i32 = arith.constant 0 : i32
    %c0_i32_0 = arith.constant 0 : i32
    %c0_i32_1 = arith.constant 0 : i32
    return %c0_i32, %c0_i32_0 : i32, i32
  }
  func.func @transform_2(%arg0: i32) -> (i32, i32) {
    %c0_i32 = arith.constant 0 : i32
    %c0_i32_0 = arith.constant 0 : i32
    %c0_i32_1 = arith.constant 0 : i32
    return %c0_i32, %c0_i32_0 : i32, i32
  }
  func.func @transform_3(%arg0: i32) -> (i32, i32, i32) {
    %c0_i32 = arith.constant 0 : i32
    %c0_i32_0 = arith.constant 0 : i32
    %c0_i32_1 = arith.constant 0 : i32
    return %arg0, %c0_i32, %c0_i32_0 : i32, i32, i32
  }
}

module attributes {stable_mosaic.version = 11 : i64} {
  func.func @_mlp_kernel(%arg0: memref<2x3200xf32, #tpu.memory_space<vmem>>, %arg1: memref<3200x128xf32, #tpu.memory_space<vmem>>, %arg2: memref<1x128xf32, #tpu.memory_space<vmem>>, %arg3: memref<128x128xf32, #tpu.memory_space<vmem>>, %arg4: memref<1x128xf32, #tpu.memory_space<vmem>>, %arg5: memref<128x128xf32, #tpu.memory_space<vmem>>, %arg6: memref<1x128xf32, #tpu.memory_space<vmem>>, %arg7: memref<2x128xf32, #tpu.memory_space<vmem>>) attributes {dimension_semantics = [], scalar_prefetch = 0 : i64, scratch_operands = 0 : i64, tpu.core_type = #tpu.core_type<tc>} {
    %c0 = arith.constant 0 : index
    %c0_0 = arith.constant 0 : index
    %0 = vector.load %arg0[%c0, %c0_0] : memref<2x3200xf32, #tpu.memory_space<vmem>>, vector<2x3200xf32>
    %c0_1 = arith.constant 0 : index
    %c0_2 = arith.constant 0 : index
    %1 = vector.load %arg1[%c0_1, %c0_2] : memref<3200x128xf32, #tpu.memory_space<vmem>>, vector<3200x128xf32>
    %cst = arith.constant dense<0.000000e+00> : vector<2x128xf32>
    %2 = tpu.matmul %0, %1, %cst {dimension_numbers = #tpu.dot_dimension_numbers<[1], [0], [0], [1], [0, 0, 1, 1], [], []>} : vector<2x3200xf32>, vector<3200x128xf32>, vector<2x128xf32> -> vector<2x128xf32>
    %c0_3 = arith.constant 0 : index
    %c0_4 = arith.constant 0 : index
    %3 = vector.load %arg2[%c0_3, %c0_4] : memref<1x128xf32, #tpu.memory_space<vmem>>, vector<1x128xf32>
    %4 = vector.broadcast %3 : vector<1x128xf32> to vector<2x128xf32>
    %5 = arith.addf %2, %4 : vector<2x128xf32>
    %cst_5 = arith.constant 0.000000e+00 : f32
    %6 = vector.broadcast %cst_5 : f32 to vector<2x128xf32>
    %7 = arith.maximumf %5, %6 : vector<2x128xf32>
    %c0_6 = arith.constant 0 : index
    %c0_7 = arith.constant 0 : index
    %8 = vector.load %arg3[%c0_6, %c0_7] : memref<128x128xf32, #tpu.memory_space<vmem>>, vector<128x128xf32>
    %cst_8 = arith.constant dense<0.000000e+00> : vector<2x128xf32>
    %9 = tpu.matmul %7, %8, %cst_8 {dimension_numbers = #tpu.dot_dimension_numbers<[1], [0], [0], [1], [0, 0, 1, 1], [], []>} : vector<2x128xf32>, vector<128x128xf32>, vector<2x128xf32> -> vector<2x128xf32>
    %c0_9 = arith.constant 0 : index
    %c0_10 = arith.constant 0 : index
    %10 = vector.load %arg4[%c0_9, %c0_10] : memref<1x128xf32, #tpu.memory_space<vmem>>, vector<1x128xf32>
    %11 = vector.broadcast %10 : vector<1x128xf32> to vector<2x128xf32>
    %12 = arith.addf %9, %11 : vector<2x128xf32>
    %cst_11 = arith.constant 0.000000e+00 : f32
    %13 = vector.broadcast %cst_11 : f32 to vector<2x128xf32>
    %14 = arith.maximumf %12, %13 : vector<2x128xf32>
    %c0_12 = arith.constant 0 : index
    %c0_13 = arith.constant 0 : index
    %15 = vector.load %arg5[%c0_12, %c0_13] : memref<128x128xf32, #tpu.memory_space<vmem>>, vector<128x128xf32>
    %cst_14 = arith.constant dense<0.000000e+00> : vector<2x128xf32>
    %16 = tpu.matmul %14, %15, %cst_14 {dimension_numbers = #tpu.dot_dimension_numbers<[1], [0], [0], [1], [0, 0, 1, 1], [], []>} : vector<2x128xf32>, vector<128x128xf32>, vector<2x128xf32> -> vector<2x128xf32>
    %c0_15 = arith.constant 0 : index
    %c0_16 = arith.constant 0 : index
    %17 = vector.load %arg6[%c0_15, %c0_16] : memref<1x128xf32, #tpu.memory_space<vmem>>, vector<1x128xf32>
    %18 = vector.broadcast %17 : vector<1x128xf32> to vector<2x128xf32>
    %19 = arith.addf %16, %18 : vector<2x128xf32>
    %c0_17 = arith.constant 0 : index
    %c0_18 = arith.constant 0 : index
    %20 = vector.load %arg7[%c0_17, %c0_18] : memref<2x128xf32, #tpu.memory_space<vmem>>, vector<2x128xf32>
    tpu.vector_store %arg7[%c0_17, %c0_18], %19 {strides = array<i32>} : memref<2x128xf32, #tpu.memory_space<vmem>>, vector<2x128xf32>,
    return
  }
}

</mosaic_0001>

<bundles_post_ra>
// kernel: forward.4
= control target key start
LH: loop header
LB: loop body
LE: loop exit
PB: predicated region body
PF: predicated region fallthrough
CT: control target
= control target key end

     0   :  { %s538_s12 = smov 0   ;;  %s732_s0 = inlined_call_operand.vmem [shape: f32[2,128,256], index: 0, kind: input, shape index: {}]   ;;  %s733_s1 = inlined_call_operand.vmem [shape: f32[256,128], index: 1, kind: input, shape index: {}]   ;;  %s734_s2 = inlined_call_operand.vmem [shape: f32[1,128], index: 2, kind: input, shape index: {}]   ;;  %s735_s3 = inlined_call_operand.vmem [shape: f32[2,32,128], index: 3, kind: output, shape index: {}]  }
   0x1 LB: > { %s456_s13 = sadd.s32 4294967295, %s516_s12   ;;  %p460_p0 = scmp.ge.s32.totalorder %s516_s12, 1  ;;  %s516_s12 = sphi %s538_s12, %s13_s12  }
   0x2   : > { %p137_p1 = scmp.lt.s32.totalorder %s516_s12, 3 }
   0x4   : > { %p138_p2 = pnand %p460_p0, %p137_p1 }
   0x5   : > { %p161_p3 = scmp.lt.s32.totalorder (!%p138_p2), %s456_s13, 1 }
   0x6   : > { %141 = sbr.rel (%p138_p2) target bundleno = 242 (0xf2), region = 32 }
   0xb   : > { %v218_v0 = vld [vmem:[%s733_s1 + $0x78] sm:$0xff]  ;;  %v217_v1 = vld [vmem:[%s733_s1 + $0x70] sm:$0xff]  ;;  %v216_v4 = vld [vmem:[%s733_s1 + $0x68] sm:$0xff]  ;;  %s737_s13 = smov (!%p161_p3, %s456_s13), 1 }
   0xc   : > { %v234_v2 = vld [vmem:[%s733_s1 + $0xf8] sm:$0xff]  ;;  %239 = vmatpush.msra.mxu0 %v218_v0  ;;  %469 = vmatpush.msra.mxu2 %v218_v0  ;;  %v233_v3 = vld [vmem:[%s733_s1 + $0xf0] sm:$0xff]  ;;  %v232_v5 = vld [vmem:[%s733_s1 + $0xe8] sm:$0xff]  ;;  %s467_s16 = sshll.u32 %s737_s13, 8  ;;  %s468_s7 = sshll.u32 %s737_s13, 5 }
   0xd   : > { %304 = vmatpush.msra.mxu1 %v234_v2  ;;  %485 = vmatpush.msra.mxu3 %v234_v2  ;;  %v215_v6 = vld [vmem:[%s733_s1 + $0x60] sm:$0xff]  ;;  %v214_v8 = vld [vmem:[%s733_s1 + $0x58] sm:$0xff]  ;;  %v213_v10 = vld [vmem:[%s733_s1 + $0x50] sm:$0xff]  ;;  %s643_s25 = scalar_lea.vmem %s732_s0, %s467_s16  ;;  %s710_s10 = scalar_lea.vmem %s735_s3, %s468_s7 }
   0xe   : > { %240 = vmatpush.msra.mxu0 %v217_v1  ;;  %470 = vmatpush.msra.mxu2 %v217_v1  ;;  %v231_v7 = vld [vmem:[%s733_s1 + $0xe0] sm:$0xff]  ;;  %v230_v9 = vld [vmem:[%s733_s1 + $0xd8] sm:$0xff]  ;;  %v229_v11 = vld [vmem:[%s733_s1 + $0xd0] sm:$0xff] }
   0xf   : > { %305 = vmatpush.msra.mxu1 %v233_v3  ;;  %486 = vmatpush.msra.mxu3 %v233_v3  ;;  %v212_v12 = vld [vmem:[%s733_s1 + $0x48] sm:$0xff]  ;;  %v211_v14 = vld [vmem:[%s733_s1 + $0x40] sm:$0xff]  ;;  %v210_v16 = vld [vmem:[%s733_s1 + $0x38] sm:$0xff] }
  0x10   : > { %241 = vmatpush.msra.mxu0 %v216_v4  ;;  %471 = vmatpush.msra.mxu2 %v216_v4  ;;  %v228_v13 = vld [vmem:[%s733_s1 + $0xc8] sm:$0xff]  ;;  %v227_v15 = vld [vmem:[%s733_s1 + $0xc0] sm:$0xff]  ;;  %v226_v17 = vld [vmem:[%s733_s1 + $0xb8] sm:$0xff] }
  0x11   : > { %306 = vmatpush.msra.mxu1 %v232_v5  ;;  %487 = vmatpush.msra.mxu3 %v232_v5  ;;  %v209_v18 = vld [vmem:[%s733_s1 + $0x30] sm:$0xff]  ;;  %v208_v20 = vld [vmem:[%s733_s1 + $0x28] sm:$0xff]  ;;  %v207_v22 = vld [vmem:[%s733_s1 + $0x20] sm:$0xff] }
  0x12   : > { %242 = vmatpush.msra.mxu0 %v215_v6  ;;  %472 = vmatpush.msra.mxu2 %v215_v6  ;;  %v225_v19 = vld [vmem:[%s733_s1 + $0xb0] sm:$0xff]  ;;  %v224_v21 = vld [vmem:[%s733_s1 + $0xa8] sm:$0xff]  ;;  %v223_v23 = vld [vmem:[%s733_s1 + $0xa0] sm:$0xff] }
  0x13   : > { %307 = vmatpush.msra.mxu1 %v231_v7  ;;  %488 = vmatpush.msra.mxu3 %v231_v7  ;;  %v206_v24 = vld [vmem:[%s733_s1 + $0x18] sm:$0xff]  ;;  %v205_v26 = vld [vmem:[%s733_s1 + $0x10] sm:$0xff]  ;;  %v204_v28 = vld [vmem:[%s733_s1 + $0x8] sm:$0xff] }
  0x14   : > { %243 = vmatpush.msra.mxu0 %v214_v8  ;;  %473 = vmatpush.msra.mxu2 %v214_v8  ;;  %v222_v25 = vld [vmem:[%s733_s1 + $0x98] sm:$0xff]  ;;  %v221_v27 = vld [vmem:[%s733_s1 + $0x90] sm:$0xff]  ;;  %v220_v29 = vld [vmem:[%s733_s1 + $0x88] sm:$0xff] }
  0x15   : > { %308 = vmatpush.msra.mxu1 %v230_v9  ;;  %489 = vmatpush.msra.mxu3 %v230_v9  ;;  %v203_v30 = vld [vmem:[%s733_s1] sm:$0xff]  ;;  %v172_v34 = vld [vmem:[%s643_s25 + $0x8] sm:$0xff]  ;;  %v173_v36 = vld [vmem:[%s643_s25 + $0x10] sm:$0xff] }
  0x16   : > { %244 = vmatpush.msra.mxu0 %v213_v10  ;;  %474 = vmatpush.msra.mxu2 %v213_v10  ;;  %v171_v31 = vld [vmem:[%s643_s25] sm:$0xff]  ;;  %v188_v35 = vld [vmem:[%s643_s25 + $0x88] sm:$0xff]  ;;  %v189_v37 = vld [vmem:[%s643_s25 + $0x90] sm:$0xff] }
  0x17   : > { %309 = vmatpush.msra.mxu1 %v229_v11  ;;  %490 = vmatpush.msra.mxu3 %v229_v11  ;;  %v187_v32 = vld [vmem:[%s643_s25 + $0x80] sm:$0xff]  ;;  %v174_v38 = vld [vmem:[%s643_s25 + $0x18] sm:$0xff]  ;;  %v176_v42 = vld [vmem:[%s643_s25 + $0x28] sm:$0xff] }
  0x18   : > { %245 = vmatpush.msra.mxu0 %v212_v12  ;;  %475 = vmatpush.msra.mxu2 %v212_v12  ;;  %v219_v33 = vld [vmem:[%s733_s1 + $0x80] sm:$0xff]  ;;  %v190_v39 = vld [vmem:[%s643_s25 + $0x98] sm:$0xff]  ;;  %v192_v43 = vld [vmem:[%s643_s25 + $0xa8] sm:$0xff] }
  0x19   : > { %310 = vmatpush.msra.mxu1 %v228_v13  ;;  %491 = vmatpush.msra.mxu3 %v228_v13  ;;  %v175_v40 = vld [vmem:[%s643_s25 + $0x20] sm:$0xff]  ;;  %v177_v44 = vld [vmem:[%s643_s25 + $0x30] sm:$0xff]  ;;  %v178_v46 = vld [vmem:[%s643_s25 + $0x38] sm:$0xff] }
  0x1a   : > { %246 = vmatpush.msra.mxu0 %v211_v14  ;;  %476 = vmatpush.msra.mxu2 %v211_v14  ;;  %v191_v41 = vld [vmem:[%s643_s25 + $0xa0] sm:$0xff]  ;;  %v193_v45 = vld [vmem:[%s643_s25 + $0xb0] sm:$0xff]  ;;  %v194_v47 = vld [vmem:[%s643_s25 + $0xb8] sm:$0xff] }
  0x1b   : > { %311 = vmatpush.msra.mxu1 %v227_v15  ;;  %492 = vmatpush.msra.mxu3 %v227_v15  ;;  %v179_v48 = vld [vmem:[%s643_s25 + $0x40] sm:$0xff]  ;;  %v180_v50 = vld [vmem:[%s643_s25 + $0x48] sm:$0xff]  ;;  %v181_v52 = vld [vmem:[%s643_s25 + $0x50] sm:$0xff] }
  0x1c   : > { %247 = vmatpush.msra.mxu0 %v210_v16  ;;  %477 = vmatpush.msra.mxu2 %v210_v16  ;;  %v195_v49 = vld [vmem:[%s643_s25 + $0xc0] sm:$0xff]  ;;  %v196_v51 = vld [vmem:[%s643_s25 + $0xc8] sm:$0xff]  ;;  %v197_v53 = vld [vmem:[%s643_s25 + $0xd0] sm:$0xff] }
  0x1d   : > { %312 = vmatpush.msra.mxu1 %v226_v17  ;;  %493 = vmatpush.msra.mxu3 %v226_v17  ;;  %v182_v54 = vld [vmem:[%s643_s25 + $0x58] sm:$0xff]  ;;  %v183_v56 = vld [vmem:[%s643_s25 + $0x60] sm:$0xff]  ;;  %v184_v58 = vld [vmem:[%s643_s25 + $0x68] sm:$0xff] }
  0x1e   : > { %248 = vmatpush.msra.mxu0 %v209_v18  ;;  %478 = vmatpush.msra.mxu2 %v209_v18  ;;  %v198_v55 = vld [vmem:[%s643_s25 + $0xd8] sm:$0xff]  ;;  %v199_v57 = vld [vmem:[%s643_s25 + $0xe0] sm:$0xff]  ;;  %v200_v59 = vld [vmem:[%s643_s25 + $0xe8] sm:$0xff] }
  0x1f   : > { %313 = vmatpush.msra.mxu1 %v225_v19  ;;  %494 = vmatpush.msra.mxu3 %v225_v19  ;;  %v185_v60 = vld [vmem:[%s643_s25 + $0x70] sm:$0xff]  ;;  %v186_v62 = vld [vmem:[%s643_s25 + $0x78] sm:$0xff]  ;;  %v693_v14 = vld [vmem:[%s734_s2] ss:$0 sm:$0xff] }
  0x20   : > { %249 = vmatpush.msra.mxu0 %v208_v20  ;;  %479 = vmatpush.msra.mxu2 %v208_v20  ;;  %v201_v61 = vld [vmem:[%s643_s25 + $0xf0] sm:$0xff]  ;;  %v202_v63 = vld [vmem:[%s643_s25 + $0xf8] sm:$0xff] }
  0x21   : > { %314 = vmatpush.msra.mxu1 %v224_v21  ;;  %495 = vmatpush.msra.mxu3 %v224_v21 }
  0x22   : > { %250 = vmatpush.msra.mxu0 %v207_v22  ;;  %480 = vmatpush.msra.mxu2 %v207_v22 }
  0x23   : > { %315 = vmatpush.msra.mxu1 %v223_v23  ;;  %496 = vmatpush.msra.mxu3 %v223_v23 }
  0x24   : > { %251 = vmatpush.msra.mxu0 %v206_v24  ;;  %481 = vmatpush.msra.mxu2 %v206_v24 }
  0x25   : > { %316 = vmatpush.msra.mxu1 %v222_v25  ;;  %497 = vmatpush.msra.mxu3 %v222_v25 }
  0x26   : > { %252 = vmatpush.msra.mxu0 %v205_v26  ;;  %482 = vmatpush.msra.mxu2 %v205_v26 }
  0x27   : > { %317 = vmatpush.msra.mxu1 %v221_v27  ;;  %498 = vmatpush.msra.mxu3 %v221_v27 }
  0x28   : > { %253 = vmatpush.msra.mxu0 %v204_v28  ;;  %483 = vmatpush.msra.mxu2 %v204_v28 }
  0x29   : > { %318 = vmatpush.msra.mxu1 %v220_v29  ;;  %499 = vmatpush.msra.mxu3 %v220_v29 }
  0x2a   : > { %254 = vmatpush.msra.mxu0 %v203_v30  ;;  %484 = vmatpush.msra.mxu2 %v203_v30 }
  0x2b   : > { %255 = vmatmul.f32.vlgmr.msra.gmra.mxu0 %v171_v31  ;;  %279 = vmatmul.f32.vlgmr.msra.gmra.mxu2 %v187_v32 }
  0x2c   : > { %319 = vmatpush.msra.mxu1 %v219_v33  ;;  %500 = vmatpush.msra.mxu3 %v219_v33 }
  0x2d   : > { %320 = vmatmul.f32.vlgmr.msra.gmra.mxu1 %v172_v34  ;;  %344 = vmatmul.f32.vlgmr.msra.gmra.mxu3 %v188_v35 }
  0x33   : > { %258 = vmatmul.f32.gmra.mxu0 %v173_v36  ;;  %282 = vmatmul.f32.gmra.mxu2 %v189_v37 }
  0x35   : > { %323 = vmatmul.f32.gmra.mxu1 %v174_v38  ;;  %347 = vmatmul.f32.gmra.mxu3 %v190_v39 }
  0x3b   : > { %261 = vmatmul.f32.gmra.mxu0 %v175_v40  ;;  %285 = vmatmul.f32.gmra.mxu2 %v191_v41 }
  0x3d   : > { %326 = vmatmul.f32.gmra.mxu1 %v176_v42  ;;  %350 = vmatmul.f32.gmra.mxu3 %v192_v43 }
  0x43   : > { %264 = vmatmul.f32.gmra.mxu0 %v177_v44  ;;  %288 = vmatmul.f32.gmra.mxu2 %v193_v45 }
  0x45   : > { %329 = vmatmul.f32.gmra.mxu1 %v178_v46  ;;  %353 = vmatmul.f32.gmra.mxu3 %v194_v47 }
  0x4b   : > { %267 = vmatmul.f32.gmra.mxu0 %v179_v48  ;;  %291 = vmatmul.f32.gmra.mxu2 %v195_v49 }
  0x4d   : > { %332 = vmatmul.f32.gmra.mxu1 %v180_v50  ;;  %356 = vmatmul.f32.gmra.mxu3 %v196_v51 }
  0x53   : > { %270 = vmatmul.f32.gmra.mxu0 %v181_v52  ;;  %294 = vmatmul.f32.gmra.mxu2 %v197_v53 }
  0x55   : > { %335 = vmatmul.f32.gmra.mxu1 %v182_v54  ;;  %359 = vmatmul.f32.gmra.mxu3 %v198_v55 }
  0x5b   : > { %273 = vmatmul.f32.gmra.mxu0 %v183_v56  ;;  %297 = vmatmul.f32.gmra.mxu2 %v199_v57 }
  0x5d   : > { %338 = vmatmul.f32.gmra.mxu1 %v184_v58  ;;  %362 = vmatmul.f32.gmra.mxu3 %v200_v59 }
  0x63   : > { %276 = vmatmul.f32.gmra.mxu0 %v185_v60  ;;  %300 = vmatmul.f32.gmra.mxu2 %v201_v61 }
  0x65   : > { %341 = vmatmul.f32.gmra.mxu1 %v186_v62  ;;  %365 = vmatmul.f32.gmra.mxu3 %v202_v63 }
  0xa8   : > { %v256_v0 = vpop.f32.mrf.mxu0 }
  0xa9   : > { %v257_v19 = vadd.f32 %v693_v14, %v256_v0 }
  0xaa   : > { %v321_v1 = vpop.f32.mrf.mxu1 }
  0xab   : > { %v322_v23 = vadd.f32 %v321_v1, %v257_v19 }
  0xad   : > { %v369_v32 = vmax.f32 %v322_v23, 0.0 }
  0xae   : > { %v280_v2 = vpop.f32.mrf.mxu2 }
  0xaf   : > { %v281_v21 = vadd.f32 %v693_v14, %v280_v2 }
  0xb0   : > { %v259_v3 = vpop.f32.mrf.mxu0  ;;  %v345_v4 = vpop.f32.mrf.mxu3 }
  0xb1   : > { %v346_v25 = vadd.f32 %v345_v4, %v281_v21  ;;  %v260_v34 = vadd.f32 %v693_v14, %v259_v3 }
  0xb2   : > { %v324_v5 = vpop.f32.mrf.mxu1 }
  0xb3   : > { %v377_v35 = vmax.f32 %v346_v25, 0.0  ;;  %v325_v42 = vadd.f32 %v324_v5, %v260_v34 }
  0xb5   : > { %v370_v53 = vmax.f32 %v325_v42, 0.0 }
  0xb6   : > { %v283_v6 = vpop.f32.mrf.mxu2 }
  0xb7   : > { %v284_v36 = vadd.f32 %v693_v14, %v283_v6 }
  0xb8   : > { %v262_v7 = vpop.f32.mrf.mxu0  ;;  %v348_v8 = vpop.f32.mrf.mxu3 }
  0xb9   : > { %v349_v43 = vadd.f32 %v348_v8, %v284_v36  ;;  %v263_v51 = vadd.f32 %v693_v14, %v262_v7 }
  0xba   : > { %v327_v9 = vpop.f32.mrf.mxu1 }
  0xbb   : > { %v378_v54 = vmax.f32 %v349_v43, 0.0  ;;  %v328_v60 = vadd.f32 %v327_v9, %v263_v51 }
  0xbd   : > { %v371_v6 = vmax.f32 %v328_v60, 0.0 }
  0xbe   : > { %v286_v10 = vpop.f32.mrf.mxu2 }
  0xbf   : > { %v287_v55 = vadd.f32 %v693_v14, %v286_v10 }
  0xc0   : > { %v686_v11 = vpop.f32.mrf.mxu0  ;;  %v351_v12 = vpop.f32.mrf.mxu3 }
  0xc1   : > { %v352_v62 = vadd.f32 %v351_v12, %v287_v55  ;;  %v266_v8 = vadd.f32 %v693_v14, %v686_v11 }
  0xc2   : > { %v688_v13 = vpop.f32.mrf.mxu1 }
  0xc3   : > { %v379_v10 = vmax.f32 %v352_v62, 0.0  ;;  %v331_v21 = vadd.f32 %v688_v13, %v266_v8 }
  0xc6   : > { %v695_v15 = vpop.f32.mrf.mxu2 }
  0xc7   : > { %v290_v9 = vadd.f32 %v693_v14, %v695_v15 }
  0xc8   : > { %v268_v16 = vpop.f32.mrf.mxu0  ;;  %v697_v17 = vpop.f32.mrf.mxu3 }
  0xc9   : > { %v269_v18 = vadd.f32 %v693_v14, %v268_v16 }
  0xca   : > { %v333_v20 = vpop.f32.mrf.mxu1 }
  0xcb   : > { %v334_v22 = vadd.f32 %v333_v20, %v269_v18 }
  0xcd   : > { %v373_v29 = vmax.f32 %v334_v22, 0.0  ;;  %v355_v22 = vadd.f32 %v697_v17, %v290_v9 }
  0xce   : > { %v292_v24 = vpop.f32.mrf.mxu2 }
  0xcf   : > { %v293_v26 = vadd.f32 %v693_v14, %v292_v24  ;;  %v385_v38 = vmax.f32 %v369_v32, %v373_v29 }
  0xd0   : > { %v271_v27 = vpop.f32.mrf.mxu0  ;;  %v357_v28 = vpop.f32.mrf.mxu3 }
  0xd1   : > { %v272_v30 = vadd.f32 %v693_v14, %v271_v27  ;;  %v358_v31 = vadd.f32 %v357_v28, %v293_v26  ;;  %v372_v27 = vmax.f32 %v331_v21, 0.0  ;;  %v380_v28 = vmax.f32 %v355_v22, 0.0 }
  0xd2   : > { %v336_v33 = vpop.f32.mrf.mxu1 }
  0xd3   : > { %v381_v37 = vmax.f32 %v358_v31, 0.0  ;;  %v337_v40 = vadd.f32 %v336_v33, %v272_v30 }
  0xd5   : > { %v389_v39 = vmax.f32 %v377_v35, %v381_v37  ;;  %v374_v48 = vmax.f32 %v337_v40, 0.0 }
  0xd6   : > { %v295_v41 = vpop.f32.mrf.mxu2 }
  0xd7   : > { %v393_v44 = vmax.f32 %v385_v38, %v389_v39  ;;  %v296_v45 = vadd.f32 %v693_v14, %v295_v41  ;;  %v386_v57 = vmax.f32 %v370_v53, %v374_v48 }
  0xd8   : > { %v274_v46 = vpop.f32.mrf.mxu0  ;;  %v360_v47 = vpop.f32.mrf.mxu3 }
  0xd9   : > { %397 = vst [vmem:[%s710_s10] sm:$0xff] %v393_v44  ;;  %v275_v49 = vadd.f32 %v693_v14, %v274_v46  ;;  %v361_v50 = vadd.f32 %v360_v47, %v296_v45 }
  0xda   : > { %v339_v52 = vpop.f32.mrf.mxu1 }
  0xdb   : > { %v382_v56 = vmax.f32 %v361_v50, 0.0  ;;  %v340_v59 = vadd.f32 %v339_v52, %v275_v49 }
  0xdd   : > { %v390_v58 = vmax.f32 %v378_v54, %v382_v56  ;;  %v375_v3 = vmax.f32 %v340_v59, 0.0 }
  0xde   : > { %v298_v61 = vpop.f32.mrf.mxu2 }
  0xdf   : > { %v394_v63 = vmax.f32 %v386_v57, %v390_v58  ;;  %v299_v0 = vadd.f32 %v693_v14, %v298_v61  ;;  %v387_v16 = vmax.f32 %v371_v6, %v375_v3 }
  0xe0   : > { %v277_v1 = vpop.f32.mrf.mxu0  ;;  %v363_v2 = vpop.f32.mrf.mxu3 }
  0xe1   : > { %398 = vst [vmem:[%s710_s10 + $0x8] sm:$0xff] %v394_v63  ;;  %v278_v4 = vadd.f32 %v693_v14, %v277_v1  ;;  %v364_v5 = vadd.f32 %v363_v2, %v299_v0 }
  0xe2   : > { %v342_v7 = vpop.f32.mrf.mxu1 }
  0xe3   : > { %v383_v12 = vmax.f32 %v364_v5, 0.0  ;;  %v343_v19 = vadd.f32 %v342_v7, %v278_v4 }
  0xe5   : > { %v391_v18 = vmax.f32 %v379_v10, %v383_v12  ;;  %v376_v11 = vmax.f32 %v343_v19, 0.0 }
  0xe6   : > { %v301_v20 = vpop.f32.mrf.mxu2 }
  0xe7   : > { %v395_v23 = vmax.f32 %v387_v16, %v391_v18  ;;  %v302_v24 = vadd.f32 %v693_v14, %v301_v20  ;;  %v388_v29 = vmax.f32 %v372_v27, %v376_v11 }
  0xe8   : > { %v366_v25 = vpop.f32.mrf.mxu3 }
  0xe9   : > { %399 = vst [vmem:[%s710_s10 + $0x10] sm:$0xff] %v395_v23  ;;  %v367_v26 = vadd.f32 %v366_v25, %v302_v24 }
  0xeb   : > { %v384_v15 = vmax.f32 %v367_v26, 0.0 }
  0xed   : > { %v392_v30 = vmax.f32 %v380_v28, %v384_v15 }
  0xef   : > { %v396_v31 = vmax.f32 %v388_v29, %v392_v30 }
  0xf1   : > { %400 = vst [vmem:[%s710_s10 + $0x18] sm:$0xff] %v396_v31 }
  0xf2 PF: > { %s13_s12 = sadd.s32 1, %s516_s12  }
  0xf3   : > { %p10_p4 = scmp.ge.s32.totalorder %s13_s12, 4  }
  0xf5   :  { %12 = sbr.rel (!%p10_p4) target bundleno = 1 (0x1), region = 62 }

// kernel: forward.3
= control target key start
LH: loop header
LB: loop body
LE: loop exit
PB: predicated region body
PF: predicated region fallthrough
CT: control target
= control target key end

     0   :  { %s959_s12 = smov 0   ;;  %s1266_s0 = inlined_call_operand.vmem [shape: f32[2,800,128], index: 0, kind: input, shape index: {}]   ;;  %s1267_s1 = inlined_call_operand.vmem [shape: f32[128,128], index: 1, kind: input, shape index: {}]   ;;  %s1268_s2 = inlined_call_operand.vmem [shape: f32[1,128], index: 2, kind: input, shape index: {}]   ;;  %s1269_s3 = inlined_call_operand.vmem [shape: f32[2,200,128], index: 3, kind: output, shape index: {}]  }
   0x1 LB: > { %s863_s13 = sadd.s32 4294967295, %s937_s12   ;;  %p867_p0 = scmp.ge.s32.totalorder %s937_s12, 1  ;;  %s937_s12 = sphi %s959_s12, %s13_s12  }
   0x2   : > { %p137_p1 = scmp.lt.s32.totalorder %s937_s12, 3 }
   0x4   : > { %p138_p2 = pnand %p867_p0, %p137_p1 }
   0x5   : > { %p161_p3 = scmp.lt.s32.totalorder (!%p138_p2), %s863_s13, 1 }
   0x6   : > { %141 = sbr.rel (%p138_p2) target bundleno = 376 (0x178), region = 32 }
   0xb   : > { %v286_v0 = vld [vmem:[%s1267_s1 + $0x78] sm:$0xff]  ;;  %v285_v1 = vld [vmem:[%s1267_s1 + $0x70] sm:$0xff]  ;;  %v284_v2 = vld [vmem:[%s1267_s1 + $0x68] sm:$0xff]  ;;  %s1271_s13 = smov (!%p161_p3, %s863_s13), 1 }
   0xc   : > { %873 = vmatpush.msra.mxu2 %v286_v0  ;;  %874 = vmatpush.msra.mxu3 %v286_v0  ;;  %v283_v3 = vld [vmem:[%s1267_s1 + $0x60] sm:$0xff]  ;;  %v282_v4 = vld [vmem:[%s1267_s1 + $0x58] sm:$0xff]  ;;  %v281_v5 = vld [vmem:[%s1267_s1 + $0x50] sm:$0xff]  ;;  %s920_s15 = smul.u32 800, %s1271_s13 }
   0xd   : > { %291 = vmatpush.msra.mxu0 %v286_v0  ;;  %872 = vmatpush.msra.mxu1 %v286_v0  ;;  %v280_v6 = vld [vmem:[%s1267_s1 + $0x48] sm:$0xff]  ;;  %v279_v7 = vld [vmem:[%s1267_s1 + $0x40] sm:$0xff]  ;;  %v278_v8 = vld [vmem:[%s1267_s1 + $0x38] sm:$0xff]  ;;  %s921_s27 = smul.u32 200, %s1271_s13 }
   0xe   : > { %876 = vmatpush.msra.mxu2 %v285_v1  ;;  %877 = vmatpush.msra.mxu3 %v285_v1  ;;  %v277_v9 = vld [vmem:[%s1267_s1 + $0x30] sm:$0xff]  ;;  %v276_v10 = vld [vmem:[%s1267_s1 + $0x28] sm:$0xff]  ;;  %v275_v11 = vld [vmem:[%s1267_s1 + $0x20] sm:$0xff]  ;;  %s1022_s22 = scalar_lea.vmem %s1266_s0, %s920_s15 }
   0xf   : > { %292 = vmatpush.msra.mxu0 %v285_v1  ;;  %875 = vmatpush.msra.mxu1 %v285_v1  ;;  %v274_v12 = vld [vmem:[%s1267_s1 + $0x18] sm:$0xff]  ;;  %v273_v13 = vld [vmem:[%s1267_s1 + $0x10] sm:$0xff]  ;;  %v272_v14 = vld [vmem:[%s1267_s1 + $0x8] sm:$0xff]  ;;  %s1114_s29 = scalar_lea.vmem %s1269_s3, %s921_s27 }
  0x10   : > { %879 = vmatpush.msra.mxu2 %v284_v2  ;;  %880 = vmatpush.msra.mxu3 %v284_v2  ;;  %v271_v15 = vld [vmem:[%s1267_s1] sm:$0xff]  ;;  %v221_v16 = vld [vmem:[%s1022_s22 + $0x190] sm:$0xff]  ;;  %v246_v17 = vld [vmem:[%s1022_s22 + $0x258] sm:$0xff] }
  0x11   : > { %293 = vmatpush.msra.mxu0 %v284_v2  ;;  %878 = vmatpush.msra.mxu1 %v284_v2  ;;  %v171_v18 = vld [vmem:[%s1022_s22] sm:$0xff]  ;;  %v196_v19 = vld [vmem:[%s1022_s22 + $0xc8] sm:$0xff]  ;;  %v222_v20 = vld [vmem:[%s1022_s22 + $0x198] sm:$0xff] }
  0x12   : > { %882 = vmatpush.msra.mxu2 %v283_v3  ;;  %883 = vmatpush.msra.mxu3 %v283_v3  ;;  %v247_v21 = vld [vmem:[%s1022_s22 + $0x260] sm:$0xff]  ;;  %v172_v22 = vld [vmem:[%s1022_s22 + $0x8] sm:$0xff]  ;;  %v197_v23 = vld [vmem:[%s1022_s22 + $0xd0] sm:$0xff] }
  0x13   : > { %294 = vmatpush.msra.mxu0 %v283_v3  ;;  %881 = vmatpush.msra.mxu1 %v283_v3  ;;  %v223_v24 = vld [vmem:[%s1022_s22 + $0x1a0] sm:$0xff]  ;;  %v248_v25 = vld [vmem:[%s1022_s22 + $0x268] sm:$0xff]  ;;  %v173_v26 = vld [vmem:[%s1022_s22 + $0x10] sm:$0xff] }
  0x14   : > { %885 = vmatpush.msra.mxu2 %v282_v4  ;;  %886 = vmatpush.msra.mxu3 %v282_v4  ;;  %v198_v27 = vld [vmem:[%s1022_s22 + $0xd8] sm:$0xff]  ;;  %v224_v28 = vld [vmem:[%s1022_s22 + $0x1a8] sm:$0xff]  ;;  %v249_v29 = vld [vmem:[%s1022_s22 + $0x270] sm:$0xff] }
  0x15   : > { %295 = vmatpush.msra.mxu0 %v282_v4  ;;  %884 = vmatpush.msra.mxu1 %v282_v4  ;;  %v174_v30 = vld [vmem:[%s1022_s22 + $0x18] sm:$0xff]  ;;  %v199_v31 = vld [vmem:[%s1022_s22 + $0xe0] sm:$0xff]  ;;  %v225_v32 = vld [vmem:[%s1022_s22 + $0x1b0] sm:$0xff] }
  0x16   : > { %888 = vmatpush.msra.mxu2 %v281_v5  ;;  %889 = vmatpush.msra.mxu3 %v281_v5  ;;  %v250_v33 = vld [vmem:[%s1022_s22 + $0x278] sm:$0xff]  ;;  %v175_v34 = vld [vmem:[%s1022_s22 + $0x20] sm:$0xff]  ;;  %v200_v35 = vld [vmem:[%s1022_s22 + $0xe8] sm:$0xff] }
  0x17   : > { %296 = vmatpush.msra.mxu0 %v281_v5  ;;  %887 = vmatpush.msra.mxu1 %v281_v5  ;;  %v226_v36 = vld [vmem:[%s1022_s22 + $0x1b8] sm:$0xff]  ;;  %v251_v37 = vld [vmem:[%s1022_s22 + $0x280] sm:$0xff]  ;;  %v176_v38 = vld [vmem:[%s1022_s22 + $0x28] sm:$0xff] }
  0x18   : > { %891 = vmatpush.msra.mxu2 %v280_v6  ;;  %892 = vmatpush.msra.mxu3 %v280_v6  ;;  %v201_v39 = vld [vmem:[%s1022_s22 + $0xf0] sm:$0xff]  ;;  %v227_v40 = vld [vmem:[%s1022_s22 + $0x1c0] sm:$0xff]  ;;  %v252_v41 = vld [vmem:[%s1022_s22 + $0x288] sm:$0xff] }
  0x19   : > { %297 = vmatpush.msra.mxu0 %v280_v6  ;;  %890 = vmatpush.msra.mxu1 %v280_v6  ;;  %v177_v42 = vld [vmem:[%s1022_s22 + $0x30] sm:$0xff]  ;;  %v202_v43 = vld [vmem:[%s1022_s22 + $0xf8] sm:$0xff]  ;;  %v228_v44 = vld [vmem:[%s1022_s22 + $0x1c8] sm:$0xff] }
  0x1a   : > { %894 = vmatpush.msra.mxu2 %v279_v7  ;;  %895 = vmatpush.msra.mxu3 %v279_v7  ;;  %v253_v45 = vld [vmem:[%s1022_s22 + $0x290] sm:$0xff]  ;;  %v178_v46 = vld [vmem:[%s1022_s22 + $0x38] sm:$0xff]  ;;  %v203_v47 = vld [vmem:[%s1022_s22 + $0x100] sm:$0xff] }
  0x1b   : > { %298 = vmatpush.msra.mxu0 %v279_v7  ;;  %893 = vmatpush.msra.mxu1 %v279_v7  ;;  %v229_v48 = vld [vmem:[%s1022_s22 + $0x1d0] sm:$0xff]  ;;  %v254_v49 = vld [vmem:[%s1022_s22 + $0x298] sm:$0xff]  ;;  %v179_v50 = vld [vmem:[%s1022_s22 + $0x40] sm:$0xff] }
  0x1c   : > { %897 = vmatpush.msra.mxu2 %v278_v8  ;;  %898 = vmatpush.msra.mxu3 %v278_v8  ;;  %v204_v51 = vld [vmem:[%s1022_s22 + $0x108] sm:$0xff]  ;;  %v230_v52 = vld [vmem:[%s1022_s22 + $0x1d8] sm:$0xff]  ;;  %v255_v53 = vld [vmem:[%s1022_s22 + $0x2a0] sm:$0xff] }
  0x1d   : > { %299 = vmatpush.msra.mxu0 %v278_v8  ;;  %896 = vmatpush.msra.mxu1 %v278_v8  ;;  %v180_v54 = vld [vmem:[%s1022_s22 + $0x48] sm:$0xff]  ;;  %v205_v55 = vld [vmem:[%s1022_s22 + $0x110] sm:$0xff]  ;;  %v231_v56 = vld [vmem:[%s1022_s22 + $0x1e0] sm:$0xff] }
  0x1e   : > { %900 = vmatpush.msra.mxu2 %v277_v9  ;;  %901 = vmatpush.msra.mxu3 %v277_v9  ;;  %v256_v57 = vld [vmem:[%s1022_s22 + $0x2a8] sm:$0xff]  ;;  %v181_v58 = vld [vmem:[%s1022_s22 + $0x50] sm:$0xff]  ;;  %v206_v59 = vld [vmem:[%s1022_s22 + $0x118] sm:$0xff] }
  0x1f   : > { %300 = vmatpush.msra.mxu0 %v277_v9  ;;  %899 = vmatpush.msra.mxu1 %v277_v9  ;;  %v232_v60 = vld [vmem:[%s1022_s22 + $0x1e8] sm:$0xff]  ;;  %v257_v61 = vld [vmem:[%s1022_s22 + $0x2b0] sm:$0xff]  ;;  %v182_v62 = vld [vmem:[%s1022_s22 + $0x58] sm:$0xff] }
  0x20   : > { %903 = vmatpush.msra.mxu2 %v276_v10  ;;  %904 = vmatpush.msra.mxu3 %v276_v10  ;;  %v207_v63 = vld [vmem:[%s1022_s22 + $0x120] sm:$0xff]  ;;  %v233_v0 = vld [vmem:[%s1022_s22 + $0x1f0] sm:$0xff]  ;;  %v258_v1 = vld [vmem:[%s1022_s22 + $0x2b8] sm:$0xff] }
  0x21   : > { %301 = vmatpush.msra.mxu0 %v276_v10  ;;  %902 = vmatpush.msra.mxu1 %v276_v10  ;;  %v183_v2 = vld [vmem:[%s1022_s22 + $0x60] sm:$0xff]  ;;  %v208_v3 = vld [vmem:[%s1022_s22 + $0x128] sm:$0xff]  ;;  %v234_v4 = vld [vmem:[%s1022_s22 + $0x1f8] sm:$0xff] }
  0x22   : > { %906 = vmatpush.msra.mxu2 %v275_v11  ;;  %907 = vmatpush.msra.mxu3 %v275_v11  ;;  %v259_v5 = vld [vmem:[%s1022_s22 + $0x2c0] sm:$0xff]  ;;  %v184_v6 = vld [vmem:[%s1022_s22 + $0x68] sm:$0xff]  ;;  %v209_v7 = vld [vmem:[%s1022_s22 + $0x130] sm:$0xff] }
  0x23   : > { %302 = vmatpush.msra.mxu0 %v275_v11  ;;  %905 = vmatpush.msra.mxu1 %v275_v11  ;;  %v235_v8 = vld [vmem:[%s1022_s22 + $0x200] sm:$0xff]  ;;  %v260_v9 = vld [vmem:[%s1022_s22 + $0x2c8] sm:$0xff]  ;;  %v185_v10 = vld [vmem:[%s1022_s22 + $0x70] sm:$0xff] }
  0x24   : > { %909 = vmatpush.msra.mxu2 %v274_v12  ;;  %910 = vmatpush.msra.mxu3 %v274_v12  ;;  %v210_v11 = vld [vmem:[%s1022_s22 + $0x138] sm:$0xff] }
  0x25   : > { %303 = vmatpush.msra.mxu0 %v274_v12  ;;  %908 = vmatpush.msra.mxu1 %v274_v12  ;;  %v236_v12 = vld [vmem:[%s1022_s22 + $0x208] sm:$0xff] }
  0x26   : > { %912 = vmatpush.msra.mxu2 %v273_v13  ;;  %913 = vmatpush.msra.mxu3 %v273_v13 }
  0x27   : > { %304 = vmatpush.msra.mxu0 %v273_v13  ;;  %911 = vmatpush.msra.mxu1 %v273_v13  ;;  %v261_v13 = vld [vmem:[%s1022_s22 + $0x2d0] sm:$0xff] }
  0x28   : > { %915 = vmatpush.msra.mxu2 %v272_v14  ;;  %916 = vmatpush.msra.mxu3 %v272_v14 }
  0x29   : > { %305 = vmatpush.msra.mxu0 %v272_v14  ;;  %914 = vmatpush.msra.mxu1 %v272_v14  ;;  %v186_v14 = vld [vmem:[%s1022_s22 + $0x78] sm:$0xff] }
  0x2a   : > { %918 = vmatpush.msra.mxu2 %v271_v15  ;;  %919 = vmatpush.msra.mxu3 %v271_v15 }
  0x2b   : > { %457 = vmatmul.f32.vlgmr.msra.gmra.mxu2 %v221_v16  ;;  %532 = vmatmul.f32.vlgmr.msra.gmra.mxu3 %v246_v17  ;;  %v1094_v16 = vld [vmem:[%s1268_s2] ss:$0 sm:$0xff]  ;;  %v237_v17 = vld [vmem:[%s1022_s22 + $0x210] sm:$0xff] }
  0x2c   : > { %306 = vmatpush.msra.mxu0 %v271_v15  ;;  %917 = vmatpush.msra.mxu1 %v271_v15  ;;  %v211_v15 = vld [vmem:[%s1022_s22 + $0x140] sm:$0xff] }
  0x2d   : > { %307 = vmatmul.f32.vlgmr.msra.gmra.mxu0 %v171_v18  ;;  %382 = vmatmul.f32.vlgmr.msra.gmra.mxu1 %v196_v19  ;;  %v262_v18 = vld [vmem:[%s1022_s22 + $0x2d8] sm:$0xff] }
  0x33   : > { %460 = vmatmul.f32.gmra.mxu2 %v222_v20  ;;  %535 = vmatmul.f32.gmra.mxu3 %v247_v21  ;;  %v187_v21 = vld [vmem:[%s1022_s22 + $0x80] sm:$0xff] }
  0x35   : > { %310 = vmatmul.f32.gmra.mxu0 %v172_v22  ;;  %385 = vmatmul.f32.gmra.mxu1 %v197_v23  ;;  %v212_v22 = vld [vmem:[%s1022_s22 + $0x148] sm:$0xff] }
  0x3b   : > { %463 = vmatmul.f32.gmra.mxu2 %v223_v24  ;;  %538 = vmatmul.f32.gmra.mxu3 %v248_v25 }
  0x3d   : > { %313 = vmatmul.f32.gmra.mxu0 %v173_v26  ;;  %388 = vmatmul.f32.gmra.mxu1 %v198_v27 }
  0x43   : > { %466 = vmatmul.f32.gmra.mxu2 %v224_v28  ;;  %541 = vmatmul.f32.gmra.mxu3 %v249_v29 }
  0x45   : > { %316 = vmatmul.f32.gmra.mxu0 %v174_v30  ;;  %391 = vmatmul.f32.gmra.mxu1 %v199_v31  ;;  %v238_v31 = vld [vmem:[%s1022_s22 + $0x218] sm:$0xff] }
  0x4b   : > { %469 = vmatmul.f32.gmra.mxu2 %v225_v32  ;;  %544 = vmatmul.f32.gmra.mxu3 %v250_v33  ;;  %v263_v32 = vld [vmem:[%s1022_s22 + $0x2e0] sm:$0xff] }
  0x4d   : > { %319 = vmatmul.f32.gmra.mxu0 %v175_v34  ;;  %394 = vmatmul.f32.gmra.mxu1 %v200_v35 }
  0x53   : > { %472 = vmatmul.f32.gmra.mxu2 %v226_v36  ;;  %547 = vmatmul.f32.gmra.mxu3 %v251_v37 }
  0x55   : > { %322 = vmatmul.f32.gmra.mxu0 %v176_v38  ;;  %397 = vmatmul.f32.gmra.mxu1 %v201_v39  ;;  %v188_v38 = vld [vmem:[%s1022_s22 + $0x88] sm:$0xff]  ;;  %v213_v39 = vld [vmem:[%s1022_s22 + $0x150] sm:$0xff] }
  0x5b   : > { %475 = vmatmul.f32.gmra.mxu2 %v227_v40  ;;  %550 = vmatmul.f32.gmra.mxu3 %v252_v41 }
  0x5d   : > { %325 = vmatmul.f32.gmra.mxu0 %v177_v42  ;;  %400 = vmatmul.f32.gmra.mxu1 %v202_v43 }
  0x63   : > { %478 = vmatmul.f32.gmra.mxu2 %v228_v44  ;;  %553 = vmatmul.f32.gmra.mxu3 %v253_v45 }
  0x65   : > { %328 = vmatmul.f32.gmra.mxu0 %v178_v46  ;;  %403 = vmatmul.f32.gmra.mxu1 %v203_v47 }
  0x6b   : > { %481 = vmatmul.f32.gmra.mxu2 %v229_v48  ;;  %556 = vmatmul.f32.gmra.mxu3 %v254_v49 }
  0x6d   : > { %331 = vmatmul.f32.gmra.mxu0 %v179_v50  ;;  %406 = vmatmul.f32.gmra.mxu1 %v204_v51  ;;  %v239_v50 = vld [vmem:[%s1022_s22 + $0x220] sm:$0xff]  ;;  %v264_v51 = vld [vmem:[%s1022_s22 + $0x2e8] sm:$0xff] }
  0x73   : > { %484 = vmatmul.f32.gmra.mxu2 %v230_v52  ;;  %559 = vmatmul.f32.gmra.mxu3 %v255_v53 }
  0x75   : > { %334 = vmatmul.f32.gmra.mxu0 %v180_v54  ;;  %409 = vmatmul.f32.gmra.mxu1 %v205_v55 }
  0x7b   : > { %487 = vmatmul.f32.gmra.mxu2 %v231_v56  ;;  %562 = vmatmul.f32.gmra.mxu3 %v256_v57  ;;  %v189_v57 = vld [vmem:[%s1022_s22 + $0x90] sm:$0xff] }
  0x7d   : > { %337 = vmatmul.f32.gmra.mxu0 %v181_v58  ;;  %412 = vmatmul.f32.gmra.mxu1 %v206_v59  ;;  %v214_v58 = vld [vmem:[%s1022_s22 + $0x158] sm:$0xff] }
  0x83   : > { %490 = vmatmul.f32.gmra.mxu2 %v232_v60  ;;  %565 = vmatmul.f32.gmra.mxu3 %v257_v61 }
  0x85   : > { %340 = vmatmul.f32.gmra.mxu0 %v182_v62  ;;  %415 = vmatmul.f32.gmra.mxu1 %v207_v63 }
  0x8b   : > { %493 = vmatmul.f32.gmra.mxu2 %v233_v0  ;;  %568 = vmatmul.f32.gmra.mxu3 %v258_v1 }
  0x8d   : > { %343 = vmatmul.f32.gmra.mxu0 %v183_v2  ;;  %418 = vmatmul.f32.gmra.mxu1 %v208_v3 }
  0x93   : > { %496 = vmatmul.f32.gmra.mxu2 %v234_v4  ;;  %571 = vmatmul.f32.gmra.mxu3 %v259_v5  ;;  %v240_v5 = vld [vmem:[%s1022_s22 + $0x228] sm:$0xff] }
  0x95   : > { %346 = vmatmul.f32.gmra.mxu0 %v184_v6  ;;  %421 = vmatmul.f32.gmra.mxu1 %v209_v7  ;;  %v265_v6 = vld [vmem:[%s1022_s22 + $0x2f0] sm:$0xff] }
  0x9b   : > { %499 = vmatmul.f32.gmra.mxu2 %v235_v8  ;;  %574 = vmatmul.f32.gmra.mxu3 %v260_v9 }
  0x9d   : > { %349 = vmatmul.f32.gmra.mxu0 %v185_v10  ;;  %424 = vmatmul.f32.gmra.mxu1 %v210_v11 }
  0xa3   : > { %502 = vmatmul.f32.gmra.mxu2 %v236_v12  ;;  %577 = vmatmul.f32.gmra.mxu3 %v261_v13  ;;  %v190_v12 = vld [vmem:[%s1022_s22 + $0x98] sm:$0xff]  ;;  %v215_v13 = vld [vmem:[%s1022_s22 + $0x160] sm:$0xff] }
  0xa5   : > { %352 = vmatmul.f32.gmra.mxu0 %v186_v14  ;;  %427 = vmatmul.f32.gmra.mxu1 %v211_v15 }
  0xaa   : > { %v308_v19 = vpop.f32.mrf.mxu0  ;;  %v383_v20 = vpop.f32.mrf.mxu1 }
  0xab   : > { %505 = vmatmul.f32.gmra.mxu2 %v237_v17  ;;  %580 = vmatmul.f32.gmra.mxu3 %v262_v18  ;;  %v309_v23 = vadd.f32 %v1094_v16, %v308_v19  ;;  %v384_v24 = vadd.f32 %v1094_v16, %v383_v20 }
  0xad   : > { %v608_v25 = vmax.f32 %v309_v23, 0.0  ;;  %v633_v26 = vmax.f32 %v384_v24, 0.0  ;;  %355 = vmatmul.f32.gmra.mxu0 %v187_v21  ;;  %430 = vmatmul.f32.gmra.mxu1 %v212_v22 }
  0xae   : > { %v458_v27 = vpop.f32.mrf.mxu2  ;;  %v533_v28 = vpop.f32.mrf.mxu3 }
  0xaf   : > { %v459_v29 = vadd.f32 %v1094_v16, %v458_v27  ;;  %v534_v30 = vadd.f32 %v1094_v16, %v533_v28  ;;  %v708_v33 = vmax.f32 %v608_v25, %v633_v26  ;;  %v241_v25 = vld [vmem:[%s1022_s22 + $0x230] sm:$0xff]  ;;  %v266_v26 = vld [vmem:[%s1022_s22 + $0x2f8] sm:$0xff] }
  0xb1   : > { %v658_v34 = vmax.f32 %v459_v29, 0.0  ;;  %v683_v35 = vmax.f32 %v534_v30, 0.0 }
  0xb2   : > { %v311_v36 = vpop.f32.mrf.mxu0  ;;  %v386_v37 = vpop.f32.mrf.mxu1 }
  0xb3   : > { %v733_v40 = vmax.f32 %v658_v34, %v683_v35  ;;  %508 = vmatmul.f32.gmra.mxu2 %v238_v31  ;;  %583 = vmatmul.f32.gmra.mxu3 %v263_v32  ;;  %v312_v41 = vadd.f32 %v1094_v16, %v311_v36  ;;  %v387_v42 = vadd.f32 %v1094_v16, %v386_v37  ;;  %v191_v32 = vld [vmem:[%s1022_s22 + $0xa0] sm:$0xff] }
  0xb5   : > { %v758_v43 = vmax.f32 %v708_v33, %v733_v40  ;;  %v609_v44 = vmax.f32 %v312_v41, 0.0  ;;  %v634_v45 = vmax.f32 %v387_v42, 0.0  ;;  %358 = vmatmul.f32.gmra.mxu0 %v188_v38  ;;  %433 = vmatmul.f32.gmra.mxu1 %v213_v39  ;;  %v216_v33 = vld [vmem:[%s1022_s22 + $0x168] sm:$0xff] }
  0xb6   : > { %v461_v46 = vpop.f32.mrf.mxu2  ;;  %v536_v47 = vpop.f32.mrf.mxu3 }
  0xb7   : > { %783 = vst [vmem:[%s1114_s29] sm:$0xff] %v758_v43  ;;  %v462_v48 = vadd.f32 %v1094_v16, %v461_v46  ;;  %v537_v49 = vadd.f32 %v1094_v16, %v536_v47  ;;  %v709_v52 = vmax.f32 %v609_v44, %v634_v45  ;;  %v242_v44 = vld [vmem:[%s1022_s22 + $0x238] sm:$0xff]  ;;  %v267_v45 = vld [vmem:[%s1022_s22 + $0x300] sm:$0xff] }
  0xb9   : > { %v659_v53 = vmax.f32 %v462_v48, 0.0  ;;  %v684_v54 = vmax.f32 %v537_v49, 0.0 }
  0xba   : > { %v314_v55 = vpop.f32.mrf.mxu0  ;;  %v389_v56 = vpop.f32.mrf.mxu1 }
  0xbb   : > { %v734_v59 = vmax.f32 %v659_v53, %v684_v54  ;;  %511 = vmatmul.f32.gmra.mxu2 %v239_v50  ;;  %586 = vmatmul.f32.gmra.mxu3 %v264_v51  ;;  %v315_v60 = vadd.f32 %v1094_v16, %v314_v55  ;;  %v390_v61 = vadd.f32 %v1094_v16, %v389_v56  ;;  %v192_v51 = vld [vmem:[%s1022_s22 + $0xa8] sm:$0xff] }
  0xbd   : > { %v759_v62 = vmax.f32 %v709_v52, %v734_v59  ;;  %v610_v63 = vmax.f32 %v315_v60, 0.0  ;;  %v635_v0 = vmax.f32 %v390_v61, 0.0  ;;  %361 = vmatmul.f32.gmra.mxu0 %v189_v57  ;;  %436 = vmatmul.f32.gmra.mxu1 %v214_v58  ;;  %v217_v52 = vld [vmem:[%s1022_s22 + $0x170] sm:$0xff] }
  0xbe   : > { %v464_v1 = vpop.f32.mrf.mxu2  ;;  %v539_v2 = vpop.f32.mrf.mxu3 }
  0xbf   : > { %784 = vst [vmem:[%s1114_s29 + $0x8] sm:$0xff] %v759_v62  ;;  %v465_v3 = vadd.f32 %v1094_v16, %v464_v1  ;;  %v540_v4 = vadd.f32 %v1094_v16, %v539_v2  ;;  %v710_v7 = vmax.f32 %v610_v63, %v635_v0  ;;  %v243_v63 = vld [vmem:[%s1022_s22 + $0x240] sm:$0xff]  ;;  %v268_v0 = vld [vmem:[%s1022_s22 + $0x308] sm:$0xff] }
  0xc1   : > { %v660_v8 = vmax.f32 %v465_v3, 0.0  ;;  %v685_v9 = vmax.f32 %v540_v4, 0.0 }
  0xc2   : > { %v317_v10 = vpop.f32.mrf.mxu0  ;;  %v392_v11 = vpop.f32.mrf.mxu1 }
  0xc3   : > { %v735_v14 = vmax.f32 %v660_v8, %v685_v9  ;;  %514 = vmatmul.f32.gmra.mxu2 %v240_v5  ;;  %589 = vmatmul.f32.gmra.mxu3 %v265_v6  ;;  %v318_v15 = vadd.f32 %v1094_v16, %v317_v10  ;;  %v393_v17 = vadd.f32 %v1094_v16, %v392_v11  ;;  %v193_v6 = vld [vmem:[%s1022_s22 + $0xb0] sm:$0xff] }
  0xc5   : > { %v760_v18 = vmax.f32 %v710_v7, %v735_v14  ;;  %v611_v19 = vmax.f32 %v318_v15, 0.0  ;;  %v636_v20 = vmax.f32 %v393_v17, 0.0  ;;  %364 = vmatmul.f32.gmra.mxu0 %v190_v12  ;;  %439 = vmatmul.f32.gmra.mxu1 %v215_v13  ;;  %v218_v7 = vld [vmem:[%s1022_s22 + $0x178] sm:$0xff] }
  0xc6   : > { %v467_v21 = vpop.f32.mrf.mxu2  ;;  %v542_v22 = vpop.f32.mrf.mxu3 }
  0xc7   : > { %785 = vst [vmem:[%s1114_s29 + $0x10] sm:$0xff] %v760_v18  ;;  %v468_v23 = vadd.f32 %v1094_v16, %v467_v21  ;;  %v543_v24 = vadd.f32 %v1094_v16, %v542_v22  ;;  %v711_v27 = vmax.f32 %v611_v19, %v636_v20  ;;  %v244_v19 = vld [vmem:[%s1022_s22 + $0x248] sm:$0xff]  ;;  %v269_v20 = vld [vmem:[%s1022_s22 + $0x310] sm:$0xff] }
  0xc9   : > { %v661_v28 = vmax.f32 %v468_v23, 0.0  ;;  %v686_v29 = vmax.f32 %v543_v24, 0.0 }
  0xca   : > { %v320_v30 = vpop.f32.mrf.mxu0  ;;  %v395_v31 = vpop.f32.mrf.mxu1 }
  0xcb   : > { %v736_v34 = vmax.f32 %v661_v28, %v686_v29  ;;  %517 = vmatmul.f32.gmra.mxu2 %v241_v25  ;;  %592 = vmatmul.f32.gmra.mxu3 %v266_v26  ;;  %v321_v35 = vadd.f32 %v1094_v16, %v320_v30  ;;  %v396_v36 = vadd.f32 %v1094_v16, %v395_v31  ;;  %v194_v26 = vld [vmem:[%s1022_s22 + $0xb8] sm:$0xff] }
  0xcd   : > { %v761_v37 = vmax.f32 %v711_v27, %v736_v34  ;;  %v612_v38 = vmax.f32 %v321_v35, 0.0  ;;  %v637_v39 = vmax.f32 %v396_v36, 0.0  ;;  %367 = vmatmul.f32.gmra.mxu0 %v191_v32  ;;  %442 = vmatmul.f32.gmra.mxu1 %v216_v33  ;;  %v219_v27 = vld [vmem:[%s1022_s22 + $0x180] sm:$0xff] }
  0xce   : > { %v470_v40 = vpop.f32.mrf.mxu2  ;;  %v545_v41 = vpop.f32.mrf.mxu3 }
  0xcf   : > { %786 = vst [vmem:[%s1114_s29 + $0x18] sm:$0xff] %v761_v37  ;;  %v471_v42 = vadd.f32 %v1094_v16, %v470_v40  ;;  %v546_v43 = vadd.f32 %v1094_v16, %v545_v41  ;;  %v712_v46 = vmax.f32 %v612_v38, %v637_v39  ;;  %v245_v38 = vld [vmem:[%s1022_s22 + $0x250] sm:$0xff]  ;;  %v270_v39 = vld [vmem:[%s1022_s22 + $0x318] sm:$0xff] }
  0xd1   : > { %v662_v47 = vmax.f32 %v471_v42, 0.0  ;;  %v687_v48 = vmax.f32 %v546_v43, 0.0 }
  0xd2   : > { %v323_v49 = vpop.f32.mrf.mxu0  ;;  %v398_v50 = vpop.f32.mrf.mxu1 }
  0xd3   : > { %v737_v53 = vmax.f32 %v662_v47, %v687_v48  ;;  %520 = vmatmul.f32.gmra.mxu2 %v242_v44  ;;  %595 = vmatmul.f32.gmra.mxu3 %v267_v45  ;;  %v324_v54 = vadd.f32 %v1094_v16, %v323_v49  ;;  %v399_v55 = vadd.f32 %v1094_v16, %v398_v50  ;;  %v195_v45 = vld [vmem:[%s1022_s22 + $0xc0] sm:$0xff] }
  0xd5   : > { %v762_v56 = vmax.f32 %v712_v46, %v737_v53  ;;  %v613_v57 = vmax.f32 %v324_v54, 0.0  ;;  %v638_v58 = vmax.f32 %v399_v55, 0.0  ;;  %370 = vmatmul.f32.gmra.mxu0 %v192_v51  ;;  %445 = vmatmul.f32.gmra.mxu1 %v217_v52  ;;  %v220_v46 = vld [vmem:[%s1022_s22 + $0x188] sm:$0xff] }
  0xd6   : > { %v473_v59 = vpop.f32.mrf.mxu2  ;;  %v548_v60 = vpop.f32.mrf.mxu3 }
  0xd7   : > { %787 = vst [vmem:[%s1114_s29 + $0x20] sm:$0xff] %v762_v56  ;;  %v474_v61 = vadd.f32 %v1094_v16, %v473_v59  ;;  %v549_v62 = vadd.f32 %v1094_v16, %v548_v60  ;;  %v713_v1 = vmax.f32 %v613_v57, %v638_v58 }
  0xd9   : > { %v663_v2 = vmax.f32 %v474_v61, 0.0  ;;  %v688_v3 = vmax.f32 %v549_v62, 0.0 }
  0xda   : > { %v326_v4 = vpop.f32.mrf.mxu0  ;;  %v401_v5 = vpop.f32.mrf.mxu1 }
  0xdb   : > { %v738_v8 = vmax.f32 %v663_v2, %v688_v3  ;;  %523 = vmatmul.f32.gmra.mxu2 %v243_v63  ;;  %598 = vmatmul.f32.gmra.mxu3 %v268_v0  ;;  %v327_v9 = vadd.f32 %v1094_v16, %v326_v4  ;;  %v402_v10 = vadd.f32 %v1094_v16, %v401_v5 }
  0xdd   : > { %v763_v11 = vmax.f32 %v713_v1, %v738_v8  ;;  %v614_v12 = vmax.f32 %v327_v9, 0.0  ;;  %v639_v13 = vmax.f32 %v402_v10, 0.0  ;;  %373 = vmatmul.f32.gmra.mxu0 %v193_v6  ;;  %448 = vmatmul.f32.gmra.mxu1 %v218_v7 }
  0xde   : > { %v476_v14 = vpop.f32.mrf.mxu2  ;;  %v551_v15 = vpop.f32.mrf.mxu3 }
  0xdf   : > { %788 = vst [vmem:[%s1114_s29 + $0x28] sm:$0xff] %v763_v11  ;;  %v477_v17 = vadd.f32 %v1094_v16, %v476_v14  ;;  %v552_v18 = vadd.f32 %v1094_v16, %v551_v15  ;;  %v714_v21 = vmax.f32 %v614_v12, %v639_v13 }
  0xe1   : > { %v664_v22 = vmax.f32 %v477_v17, 0.0  ;;  %v689_v23 = vmax.f32 %v552_v18, 0.0 }
  0xe2   : > { %v329_v24 = vpop.f32.mrf.mxu0  ;;  %v404_v25 = vpop.f32.mrf.mxu1 }
  0xe3   : > { %v739_v28 = vmax.f32 %v664_v22, %v689_v23  ;;  %526 = vmatmul.f32.gmra.mxu2 %v244_v19  ;;  %601 = vmatmul.f32.gmra.mxu3 %v269_v20  ;;  %v330_v29 = vadd.f32 %v1094_v16, %v329_v24  ;;  %v405_v30 = vadd.f32 %v1094_v16, %v404_v25 }
  0xe5   : > { %v764_v31 = vmax.f32 %v714_v21, %v739_v28  ;;  %v615_v32 = vmax.f32 %v330_v29, 0.0  ;;  %v640_v33 = vmax.f32 %v405_v30, 0.0  ;;  %376 = vmatmul.f32.gmra.mxu0 %v194_v26  ;;  %451 = vmatmul.f32.gmra.mxu1 %v219_v27 }
  0xe6   : > { %v479_v34 = vpop.f32.mrf.mxu2  ;;  %v554_v35 = vpop.f32.mrf.mxu3 }
  0xe7   : > { %789 = vst [vmem:[%s1114_s29 + $0x30] sm:$0xff] %v764_v31  ;;  %v480_v36 = vadd.f32 %v1094_v16, %v479_v34  ;;  %v555_v37 = vadd.f32 %v1094_v16, %v554_v35  ;;  %v715_v40 = vmax.f32 %v615_v32, %v640_v33 }
  0xe9   : > { %v665_v41 = vmax.f32 %v480_v36, 0.0  ;;  %v690_v42 = vmax.f32 %v555_v37, 0.0 }
  0xea   : > { %v332_v43 = vpop.f32.mrf.mxu0  ;;  %v407_v44 = vpop.f32.mrf.mxu1 }
  0xeb   : > { %v740_v47 = vmax.f32 %v665_v41, %v690_v42  ;;  %529 = vmatmul.f32.gmra.mxu2 %v245_v38  ;;  %604 = vmatmul.f32.gmra.mxu3 %v270_v39  ;;  %v333_v48 = vadd.f32 %v1094_v16, %v332_v43  ;;  %v408_v49 = vadd.f32 %v1094_v16, %v407_v44 }
  0xed   : > { %v765_v50 = vmax.f32 %v715_v40, %v740_v47  ;;  %v616_v51 = vmax.f32 %v333_v48, 0.0  ;;  %v641_v52 = vmax.f32 %v408_v49, 0.0  ;;  %379 = vmatmul.f32.gmra.mxu0 %v195_v45  ;;  %454 = vmatmul.f32.gmra.mxu1 %v220_v46 }
  0xee   : > { %v482_v53 = vpop.f32.mrf.mxu2  ;;  %v557_v54 = vpop.f32.mrf.mxu3 }
  0xef   : > { %790 = vst [vmem:[%s1114_s29 + $0x38] sm:$0xff] %v765_v50  ;;  %v483_v55 = vadd.f32 %v1094_v16, %v482_v53  ;;  %v558_v56 = vadd.f32 %v1094_v16, %v557_v54  ;;  %v716_v57 = vmax.f32 %v616_v51, %v641_v52 }
  0xf1   : > { %v666_v58 = vmax.f32 %v483_v55, 0.0  ;;  %v691_v59 = vmax.f32 %v558_v56, 0.0 }
  0xf2   : > { %v335_v60 = vpop.f32.mrf.mxu0  ;;  %v410_v61 = vpop.f32.mrf.mxu1 }
  0xf3   : > { %v741_v62 = vmax.f32 %v666_v58, %v691_v59  ;;  %v336_v63 = vadd.f32 %v1094_v16, %v335_v60  ;;  %v411_v0 = vadd.f32 %v1094_v16, %v410_v61 }
  0xf5   : > { %v766_v1 = vmax.f32 %v716_v57, %v741_v62  ;;  %v617_v2 = vmax.f32 %v336_v63, 0.0  ;;  %v642_v3 = vmax.f32 %v411_v0, 0.0 }
  0xf6   : > { %v485_v4 = vpop.f32.mrf.mxu2  ;;  %v560_v5 = vpop.f32.mrf.mxu3 }
  0xf7   : > { %791 = vst [vmem:[%s1114_s29 + $0x40] sm:$0xff] %v766_v1  ;;  %v486_v6 = vadd.f32 %v1094_v16, %v485_v4  ;;  %v561_v7 = vadd.f32 %v1094_v16, %v560_v5  ;;  %v717_v8 = vmax.f32 %v617_v2, %v642_v3 }
  0xf9   : > { %v667_v9 = vmax.f32 %v486_v6, 0.0  ;;  %v692_v10 = vmax.f32 %v561_v7, 0.0 }
  0xfa   : > { %v338_v11 = vpop.f32.mrf.mxu0  ;;  %v413_v12 = vpop.f32.mrf.mxu1 }
  0xfb   : > { %v742_v13 = vmax.f32 %v667_v9, %v692_v10  ;;  %v339_v14 = vadd.f32 %v1094_v16, %v338_v11  ;;  %v414_v15 = vadd.f32 %v1094_v16, %v413_v12 }
  0xfd   : > { %v767_v17 = vmax.f32 %v717_v8, %v742_v13  ;;  %v618_v18 = vmax.f32 %v339_v14, 0.0  ;;  %v643_v19 = vmax.f32 %v414_v15, 0.0 }
  0xfe   : > { %v488_v20 = vpop.f32.mrf.mxu2  ;;  %v563_v21 = vpop.f32.mrf.mxu3 }
  0xff   : > { %792 = vst [vmem:[%s1114_s29 + $0x48] sm:$0xff] %v767_v17  ;;  %v489_v22 = vadd.f32 %v1094_v16, %v488_v20  ;;  %v564_v23 = vadd.f32 %v1094_v16, %v563_v21  ;;  %v718_v24 = vmax.f32 %v618_v18, %v643_v19 }
 0x101   : > { %v668_v25 = vmax.f32 %v489_v22, 0.0  ;;  %v693_v26 = vmax.f32 %v564_v23, 0.0 }
 0x102   : > { %v341_v27 = vpop.f32.mrf.mxu0  ;;  %v416_v28 = vpop.f32.mrf.mxu1 }
 0x103   : > { %v743_v29 = vmax.f32 %v668_v25, %v693_v26  ;;  %v342_v30 = vadd.f32 %v1094_v16, %v341_v27  ;;  %v417_v31 = vadd.f32 %v1094_v16, %v416_v28 }
 0x105   : > { %v768_v32 = vmax.f32 %v718_v24, %v743_v29  ;;  %v619_v33 = vmax.f32 %v342_v30, 0.0  ;;  %v644_v34 = vmax.f32 %v417_v31, 0.0 }
 0x106   : > { %v491_v35 = vpop.f32.mrf.mxu2  ;;  %v566_v36 = vpop.f32.mrf.mxu3 }
 0x107   : > { %793 = vst [vmem:[%s1114_s29 + $0x50] sm:$0xff] %v768_v32  ;;  %v492_v37 = vadd.f32 %v1094_v16, %v491_v35  ;;  %v567_v38 = vadd.f32 %v1094_v16, %v566_v36  ;;  %v719_v39 = vmax.f32 %v619_v33, %v644_v34 }
 0x109   : > { %v669_v40 = vmax.f32 %v492_v37, 0.0  ;;  %v694_v41 = vmax.f32 %v567_v38, 0.0 }
 0x10a   : > { %v344_v42 = vpop.f32.mrf.mxu0  ;;  %v419_v43 = vpop.f32.mrf.mxu1 }
 0x10b   : > { %v744_v44 = vmax.f32 %v669_v40, %v694_v41  ;;  %v345_v45 = vadd.f32 %v1094_v16, %v344_v42  ;;  %v420_v46 = vadd.f32 %v1094_v16, %v419_v43 }
 0x10d   : > { %v769_v47 = vmax.f32 %v719_v39, %v744_v44  ;;  %v620_v48 = vmax.f32 %v345_v45, 0.0  ;;  %v645_v49 = vmax.f32 %v420_v46, 0.0 }
 0x10e   : > { %v494_v50 = vpop.f32.mrf.mxu2  ;;  %v569_v51 = vpop.f32.mrf.mxu3 }
 0x10f   : > { %794 = vst [vmem:[%s1114_s29 + $0x58] sm:$0xff] %v769_v47  ;;  %v495_v52 = vadd.f32 %v1094_v16, %v494_v50  ;;  %v570_v53 = vadd.f32 %v1094_v16, %v569_v51  ;;  %v720_v54 = vmax.f32 %v620_v48, %v645_v49 }
 0x111   : > { %v670_v55 = vmax.f32 %v495_v52, 0.0  ;;  %v695_v56 = vmax.f32 %v570_v53, 0.0 }
 0x112   : > { %v347_v57 = vpop.f32.mrf.mxu0  ;;  %v422_v58 = vpop.f32.mrf.mxu1 }
 0x113   : > { %v745_v59 = vmax.f32 %v670_v55, %v695_v56  ;;  %v348_v60 = vadd.f32 %v1094_v16, %v347_v57  ;;  %v423_v61 = vadd.f32 %v1094_v16, %v422_v58 }
 0x115   : > { %v770_v62 = vmax.f32 %v720_v54, %v745_v59  ;;  %v621_v63 = vmax.f32 %v348_v60, 0.0  ;;  %v646_v0 = vmax.f32 %v423_v61, 0.0 }
 0x116   : > { %v497_v1 = vpop.f32.mrf.mxu2  ;;  %v572_v2 = vpop.f32.mrf.mxu3 }
 0x117   : > { %795 = vst [vmem:[%s1114_s29 + $0x60] sm:$0xff] %v770_v62  ;;  %v498_v3 = vadd.f32 %v1094_v16, %v497_v1  ;;  %v573_v4 = vadd.f32 %v1094_v16, %v572_v2  ;;  %v721_v5 = vmax.f32 %v621_v63, %v646_v0 }
 0x119   : > { %v671_v6 = vmax.f32 %v498_v3, 0.0  ;;  %v696_v7 = vmax.f32 %v573_v4, 0.0 }
 0x11a   : > { %v350_v8 = vpop.f32.mrf.mxu0  ;;  %v425_v9 = vpop.f32.mrf.mxu1 }
 0x11b   : > { %v746_v10 = vmax.f32 %v671_v6, %v696_v7  ;;  %v351_v11 = vadd.f32 %v1094_v16, %v350_v8  ;;  %v426_v12 = vadd.f32 %v1094_v16, %v425_v9 }
 0x11d   : > { %v771_v13 = vmax.f32 %v721_v5, %v746_v10  ;;  %v622_v14 = vmax.f32 %v351_v11, 0.0  ;;  %v647_v15 = vmax.f32 %v426_v12, 0.0 }
 0x11e   : > { %v500_v17 = vpop.f32.mrf.mxu2  ;;  %v575_v18 = vpop.f32.mrf.mxu3 }
 0x11f   : > { %796 = vst [vmem:[%s1114_s29 + $0x68] sm:$0xff] %v771_v13  ;;  %v501_v19 = vadd.f32 %v1094_v16, %v500_v17  ;;  %v576_v20 = vadd.f32 %v1094_v16, %v575_v18  ;;  %v722_v21 = vmax.f32 %v622_v14, %v647_v15 }
 0x121   : > { %v672_v22 = vmax.f32 %v501_v19, 0.0  ;;  %v697_v23 = vmax.f32 %v576_v20, 0.0 }
 0x122   : > { %v353_v24 = vpop.f32.mrf.mxu0  ;;  %v428_v25 = vpop.f32.mrf.mxu1 }
 0x123   : > { %v747_v26 = vmax.f32 %v672_v22, %v697_v23  ;;  %v354_v27 = vadd.f32 %v1094_v16, %v353_v24  ;;  %v429_v28 = vadd.f32 %v1094_v16, %v428_v25 }
 0x125   : > { %v772_v29 = vmax.f32 %v722_v21, %v747_v26  ;;  %v623_v30 = vmax.f32 %v354_v27, 0.0  ;;  %v648_v31 = vmax.f32 %v429_v28, 0.0 }
 0x126   : > { %v503_v32 = vpop.f32.mrf.mxu2  ;;  %v578_v33 = vpop.f32.mrf.mxu3 }
 0x127   : > { %797 = vst [vmem:[%s1114_s29 + $0x70] sm:$0xff] %v772_v29  ;;  %v504_v34 = vadd.f32 %v1094_v16, %v503_v32  ;;  %v579_v35 = vadd.f32 %v1094_v16, %v578_v33  ;;  %v723_v36 = vmax.f32 %v623_v30, %v648_v31 }
 0x129   : > { %v673_v37 = vmax.f32 %v504_v34, 0.0  ;;  %v698_v38 = vmax.f32 %v579_v35, 0.0 }
 0x12a   : > { %v356_v39 = vpop.f32.mrf.mxu0  ;;  %v431_v40 = vpop.f32.mrf.mxu1 }
 0x12b   : > { %v748_v41 = vmax.f32 %v673_v37, %v698_v38  ;;  %v357_v42 = vadd.f32 %v1094_v16, %v356_v39  ;;  %v432_v43 = vadd.f32 %v1094_v16, %v431_v40 }
 0x12d   : > { %v773_v44 = vmax.f32 %v723_v36, %v748_v41  ;;  %v624_v45 = vmax.f32 %v357_v42, 0.0  ;;  %v649_v46 = vmax.f32 %v432_v43, 0.0 }
 0x12e   : > { %v506_v47 = vpop.f32.mrf.mxu2  ;;  %v581_v48 = vpop.f32.mrf.mxu3 }
 0x12f   : > { %798 = vst [vmem:[%s1114_s29 + $0x78] sm:$0xff] %v773_v44  ;;  %v507_v49 = vadd.f32 %v1094_v16, %v506_v47  ;;  %v582_v50 = vadd.f32 %v1094_v16, %v581_v48  ;;  %v724_v51 = vmax.f32 %v624_v45, %v649_v46 }
 0x131   : > { %v674_v52 = vmax.f32 %v507_v49, 0.0  ;;  %v699_v53 = vmax.f32 %v582_v50, 0.0 }
 0x132   : > { %v359_v54 = vpop.f32.mrf.mxu0  ;;  %v434_v55 = vpop.f32.mrf.mxu1 }
 0x133   : > { %v749_v56 = vmax.f32 %v674_v52, %v699_v53  ;;  %v360_v57 = vadd.f32 %v1094_v16, %v359_v54  ;;  %v435_v58 = vadd.f32 %v1094_v16, %v434_v55 }
 0x135   : > { %v774_v59 = vmax.f32 %v724_v51, %v749_v56  ;;  %v625_v60 = vmax.f32 %v360_v57, 0.0  ;;  %v650_v61 = vmax.f32 %v435_v58, 0.0 }
 0x136   : > { %v509_v62 = vpop.f32.mrf.mxu2  ;;  %v584_v63 = vpop.f32.mrf.mxu3 }
 0x137   : > { %799 = vst [vmem:[%s1114_s29 + $0x80] sm:$0xff] %v774_v59  ;;  %v510_v0 = vadd.f32 %v1094_v16, %v509_v62  ;;  %v585_v1 = vadd.f32 %v1094_v16, %v584_v63  ;;  %v725_v2 = vmax.f32 %v625_v60, %v650_v61 }
 0x139   : > { %v675_v3 = vmax.f32 %v510_v0, 0.0  ;;  %v700_v4 = vmax.f32 %v585_v1, 0.0 }
 0x13a   : > { %v362_v5 = vpop.f32.mrf.mxu0  ;;  %v437_v6 = vpop.f32.mrf.mxu1 }
 0x13b   : > { %v750_v7 = vmax.f32 %v675_v3, %v700_v4  ;;  %v363_v8 = vadd.f32 %v1094_v16, %v362_v5  ;;  %v438_v9 = vadd.f32 %v1094_v16, %v437_v6 }
 0x13d   : > { %v775_v10 = vmax.f32 %v725_v2, %v750_v7  ;;  %v626_v11 = vmax.f32 %v363_v8, 0.0  ;;  %v651_v12 = vmax.f32 %v438_v9, 0.0 }
 0x13e   : > { %v512_v13 = vpop.f32.mrf.mxu2  ;;  %v587_v14 = vpop.f32.mrf.mxu3 }
 0x13f   : > { %800 = vst [vmem:[%s1114_s29 + $0x88] sm:$0xff] %v775_v10  ;;  %v513_v15 = vadd.f32 %v1094_v16, %v512_v13  ;;  %v588_v17 = vadd.f32 %v1094_v16, %v587_v14  ;;  %v726_v18 = vmax.f32 %v626_v11, %v651_v12 }
 0x141   : > { %v676_v19 = vmax.f32 %v513_v15, 0.0  ;;  %v701_v20 = vmax.f32 %v588_v17, 0.0 }
 0x142   : > { %v365_v21 = vpop.f32.mrf.mxu0  ;;  %v440_v22 = vpop.f32.mrf.mxu1 }
 0x143   : > { %v751_v23 = vmax.f32 %v676_v19, %v701_v20  ;;  %v366_v24 = vadd.f32 %v1094_v16, %v365_v21  ;;  %v441_v25 = vadd.f32 %v1094_v16, %v440_v22 }
 0x145   : > { %v776_v26 = vmax.f32 %v726_v18, %v751_v23  ;;  %v627_v27 = vmax.f32 %v366_v24, 0.0  ;;  %v652_v28 = vmax.f32 %v441_v25, 0.0 }
 0x146   : > { %v515_v29 = vpop.f32.mrf.mxu2  ;;  %v590_v30 = vpop.f32.mrf.mxu3 }
 0x147   : > { %801 = vst [vmem:[%s1114_s29 + $0x90] sm:$0xff] %v776_v26  ;;  %v516_v31 = vadd.f32 %v1094_v16, %v515_v29  ;;  %v591_v32 = vadd.f32 %v1094_v16, %v590_v30  ;;  %v727_v33 = vmax.f32 %v627_v27, %v652_v28 }
 0x149   : > { %v677_v34 = vmax.f32 %v516_v31, 0.0  ;;  %v702_v35 = vmax.f32 %v591_v32, 0.0 }
 0x14a   : > { %v368_v36 = vpop.f32.mrf.mxu0  ;;  %v443_v37 = vpop.f32.mrf.mxu1 }
 0x14b   : > { %v752_v38 = vmax.f32 %v677_v34, %v702_v35  ;;  %v369_v39 = vadd.f32 %v1094_v16, %v368_v36  ;;  %v444_v40 = vadd.f32 %v1094_v16, %v443_v37 }
 0x14d   : > { %v777_v41 = vmax.f32 %v727_v33, %v752_v38  ;;  %v628_v42 = vmax.f32 %v369_v39, 0.0  ;;  %v653_v43 = vmax.f32 %v444_v40, 0.0 }
 0x14e   : > { %v518_v44 = vpop.f32.mrf.mxu2  ;;  %v593_v45 = vpop.f32.mrf.mxu3 }
 0x14f   : > { %802 = vst [vmem:[%s1114_s29 + $0x98] sm:$0xff] %v777_v41  ;;  %v519_v46 = vadd.f32 %v1094_v16, %v518_v44  ;;  %v594_v47 = vadd.f32 %v1094_v16, %v593_v45  ;;  %v728_v48 = vmax.f32 %v628_v42, %v653_v43 }
 0x151   : > { %v678_v49 = vmax.f32 %v519_v46, 0.0  ;;  %v703_v50 = vmax.f32 %v594_v47, 0.0 }
 0x152   : > { %v371_v51 = vpop.f32.mrf.mxu0  ;;  %v446_v52 = vpop.f32.mrf.mxu1 }
 0x153   : > { %v753_v53 = vmax.f32 %v678_v49, %v703_v50  ;;  %v372_v54 = vadd.f32 %v1094_v16, %v371_v51  ;;  %v447_v55 = vadd.f32 %v1094_v16, %v446_v52 }
 0x155   : > { %v778_v56 = vmax.f32 %v728_v48, %v753_v53  ;;  %v629_v57 = vmax.f32 %v372_v54, 0.0  ;;  %v654_v58 = vmax.f32 %v447_v55, 0.0 }
 0x156   : > { %v521_v59 = vpop.f32.mrf.mxu2  ;;  %v596_v60 = vpop.f32.mrf.mxu3 }
 0x157   : > { %803 = vst [vmem:[%s1114_s29 + $0xa0] sm:$0xff] %v778_v56  ;;  %v522_v61 = vadd.f32 %v1094_v16, %v521_v59  ;;  %v597_v62 = vadd.f32 %v1094_v16, %v596_v60  ;;  %v729_v63 = vmax.f32 %v629_v57, %v654_v58 }
 0x159   : > { %v679_v0 = vmax.f32 %v522_v61, 0.0  ;;  %v704_v1 = vmax.f32 %v597_v62, 0.0 }
 0x15a   : > { %v374_v2 = vpop.f32.mrf.mxu0  ;;  %v449_v3 = vpop.f32.mrf.mxu1 }
 0x15b   : > { %v754_v4 = vmax.f32 %v679_v0, %v704_v1  ;;  %v375_v5 = vadd.f32 %v1094_v16, %v374_v2  ;;  %v450_v6 = vadd.f32 %v1094_v16, %v449_v3 }
 0x15d   : > { %v779_v7 = vmax.f32 %v729_v63, %v754_v4  ;;  %v630_v8 = vmax.f32 %v375_v5, 0.0  ;;  %v655_v9 = vmax.f32 %v450_v6, 0.0 }
 0x15e   : > { %v524_v10 = vpop.f32.mrf.mxu2  ;;  %v599_v11 = vpop.f32.mrf.mxu3 }
 0x15f   : > { %804 = vst [vmem:[%s1114_s29 + $0xa8] sm:$0xff] %v779_v7  ;;  %v525_v12 = vadd.f32 %v1094_v16, %v524_v10  ;;  %v600_v13 = vadd.f32 %v1094_v16, %v599_v11  ;;  %v730_v14 = vmax.f32 %v630_v8, %v655_v9 }
 0x161   : > { %v680_v15 = vmax.f32 %v525_v12, 0.0  ;;  %v705_v17 = vmax.f32 %v600_v13, 0.0 }
 0x162   : > { %v377_v18 = vpop.f32.mrf.mxu0  ;;  %v452_v19 = vpop.f32.mrf.mxu1 }
 0x163   : > { %v755_v20 = vmax.f32 %v680_v15, %v705_v17  ;;  %v378_v21 = vadd.f32 %v1094_v16, %v377_v18  ;;  %v453_v22 = vadd.f32 %v1094_v16, %v452_v19 }
 0x165   : > { %v780_v23 = vmax.f32 %v730_v14, %v755_v20  ;;  %v631_v24 = vmax.f32 %v378_v21, 0.0  ;;  %v656_v25 = vmax.f32 %v453_v22, 0.0 }
 0x166   : > { %v527_v26 = vpop.f32.mrf.mxu2  ;;  %v602_v27 = vpop.f32.mrf.mxu3 }
 0x167   : > { %805 = vst [vmem:[%s1114_s29 + $0xb0] sm:$0xff] %v780_v23  ;;  %v528_v28 = vadd.f32 %v1094_v16, %v527_v26  ;;  %v603_v29 = vadd.f32 %v1094_v16, %v602_v27  ;;  %v731_v30 = vmax.f32 %v631_v24, %v656_v25 }
 0x169   : > { %v681_v31 = vmax.f32 %v528_v28, 0.0  ;;  %v706_v32 = vmax.f32 %v603_v29, 0.0 }
 0x16a   : > { %v380_v33 = vpop.f32.mrf.mxu0  ;;  %v455_v34 = vpop.f32.mrf.mxu1 }
 0x16b   : > { %v756_v35 = vmax.f32 %v681_v31, %v706_v32  ;;  %v381_v36 = vadd.f32 %v1094_v16, %v380_v33  ;;  %v456_v37 = vadd.f32 %v1094_v16, %v455_v34 }
 0x16d   : > { %v781_v38 = vmax.f32 %v731_v30, %v756_v35  ;;  %v632_v39 = vmax.f32 %v381_v36, 0.0  ;;  %v657_v40 = vmax.f32 %v456_v37, 0.0 }
 0x16e   : > { %v530_v41 = vpop.f32.mrf.mxu2  ;;  %v605_v42 = vpop.f32.mrf.mxu3 }
 0x16f   : > { %806 = vst [vmem:[%s1114_s29 + $0xb8] sm:$0xff] %v781_v38  ;;  %v531_v43 = vadd.f32 %v1094_v16, %v530_v41  ;;  %v606_v44 = vadd.f32 %v1094_v16, %v605_v42  ;;  %v732_v45 = vmax.f32 %v632_v39, %v657_v40 }
 0x171   : > { %v682_v46 = vmax.f32 %v531_v43, 0.0  ;;  %v707_v47 = vmax.f32 %v606_v44, 0.0 }
 0x173   : > { %v757_v48 = vmax.f32 %v682_v46, %v707_v47 }
 0x175   : > { %v782_v49 = vmax.f32 %v732_v45, %v757_v48 }
 0x177   : > { %807 = vst [vmem:[%s1114_s29 + $0xc0] sm:$0xff] %v782_v49 }
 0x178 PF: > { %s13_s12 = sadd.s32 1, %s937_s12  }
 0x179   : > { %p10_p4 = scmp.ge.s32.totalorder %s13_s12, 4  }
 0x17b   :  { %12 = sbr.rel (!%p10_p4) target bundleno = 1 (0x1), region = 62 }

// kernel: forward.5
= control target key start
LH: loop header
LB: loop body
LE: loop exit
PB: predicated region body
PF: predicated region fallthrough
CT: control target
= control target key end

     0   :  { %s2547_s0 = inlined_call_operand.vmem [shape: f32[2,3200], index: 0, kind: input, shape index: {}]   ;;  %s2548_s1 = inlined_call_operand.vmem [shape: f32[3200,128], index: 1, kind: input, shape index: {}]   ;;  %s2549_s2 = inlined_call_operand.vmem [shape: f32[1,128], index: 2, kind: input, shape index: {}]   ;;  %s2550_s3 = inlined_call_operand.vmem [shape: f32[128,128], index: 3, kind: input, shape index: {}]   ;;  %s2551_s4 = inlined_call_operand.vmem [shape: f32[1,128], index: 4, kind: input, shape index: {}]   ;;  %s2552_s5 = inlined_call_operand.vmem [shape: f32[128,128], index: 5, kind: input, shape index: {}]   ;;  %s2553_s6 = inlined_call_operand.vmem [shape: f32[1,128], index: 6, kind: input, shape index: {}]   ;;  %s2554_s7 = inlined_call_operand.hbm [shape: f32[2,128], index: 7, kind: output, shape index: {}]  }
   0x1   :  { %v49_v0 = vld [vmem:[%s2548_s1 + $0x78] sm:$0xff]  ;;  %v48_v2 = vld [vmem:[%s2548_s1 + $0x70] sm:$0xff]  ;;  %v47_v6 = vld [vmem:[%s2548_s1 + $0x68] sm:$0xff] }
   0x2   :  { %v81_v1 = vld [vmem:[%s2548_s1 + $0x178] sm:$0xff]  ;;  %503 = vmatpush.msra.mxu0 %v49_v0  ;;  %v80_v4 = vld [vmem:[%s2548_s1 + $0x170] sm:$0xff]  ;;  %v79_v8 = vld [vmem:[%s2548_s1 + $0x168] sm:$0xff] }
   0x3   :  { %543 = vmatpush.msra.mxu2 %v81_v1  ;;  %v65_v3 = vld [vmem:[%s2548_s1 + $0xf8] sm:$0xff]  ;;  %v64_v7 = vld [vmem:[%s2548_s1 + $0xf0] sm:$0xff]  ;;  %v63_v10 = vld [vmem:[%s2548_s1 + $0xe8] sm:$0xff] }
   0x4   :  { %v97_v5 = vld [vmem:[%s2548_s1 + $0x1f8] sm:$0xff]  ;;  %523 = vmatpush.msra.mxu1 %v65_v3  ;;  %504 = vmatpush.msra.mxu0 %v48_v2  ;;  %v96_v9 = vld [vmem:[%s2548_s1 + $0x1f0] sm:$0xff]  ;;  %v46_v11 = vld [vmem:[%s2548_s1 + $0x60] sm:$0xff] }
   0x5   :  { %563 = vmatpush.msra.mxu3 %v97_v5  ;;  %544 = vmatpush.msra.mxu2 %v80_v4  ;;  %v78_v12 = vld [vmem:[%s2548_s1 + $0x160] sm:$0xff]  ;;  %v95_v13 = vld [vmem:[%s2548_s1 + $0x1e8] sm:$0xff]  ;;  %v45_v16 = vld [vmem:[%s2548_s1 + $0x58] sm:$0xff] }
   0x6   :  { %524 = vmatpush.msra.mxu1 %v64_v7  ;;  %505 = vmatpush.msra.mxu0 %v47_v6  ;;  %v62_v14 = vld [vmem:[%s2548_s1 + $0xe0] sm:$0xff]  ;;  %v77_v17 = vld [vmem:[%s2548_s1 + $0x158] sm:$0xff]  ;;  %v44_v20 = vld [vmem:[%s2548_s1 + $0x50] sm:$0xff] }
   0x7   :  { %564 = vmatpush.msra.mxu3 %v96_v9  ;;  %545 = vmatpush.msra.mxu2 %v79_v8  ;;  %v94_v15 = vld [vmem:[%s2548_s1 + $0x1e0] sm:$0xff]  ;;  %v61_v18 = vld [vmem:[%s2548_s1 + $0xd8] sm:$0xff]  ;;  %v76_v21 = vld [vmem:[%s2548_s1 + $0x150] sm:$0xff] }
   0x8   :  { %525 = vmatpush.msra.mxu1 %v63_v10  ;;  %506 = vmatpush.msra.mxu0 %v46_v11  ;;  %v93_v19 = vld [vmem:[%s2548_s1 + $0x1d8] sm:$0xff]  ;;  %v60_v22 = vld [vmem:[%s2548_s1 + $0xd0] sm:$0xff]  ;;  %v43_v24 = vld [vmem:[%s2548_s1 + $0x48] sm:$0xff] }
   0x9   :  { %565 = vmatpush.msra.mxu3 %v95_v13  ;;  %546 = vmatpush.msra.mxu2 %v78_v12  ;;  %v92_v23 = vld [vmem:[%s2548_s1 + $0x1d0] sm:$0xff]  ;;  %v75_v25 = vld [vmem:[%s2548_s1 + $0x148] sm:$0xff]  ;;  %v42_v28 = vld [vmem:[%s2548_s1 + $0x40] sm:$0xff] }
   0xa   :  { %526 = vmatpush.msra.mxu1 %v62_v14  ;;  %507 = vmatpush.msra.mxu0 %v45_v16  ;;  %v59_v26 = vld [vmem:[%s2548_s1 + $0xc8] sm:$0xff]  ;;  %v74_v29 = vld [vmem:[%s2548_s1 + $0x140] sm:$0xff]  ;;  %v41_v32 = vld [vmem:[%s2548_s1 + $0x38] sm:$0xff] }
   0xb   :  { %566 = vmatpush.msra.mxu3 %v94_v15  ;;  %547 = vmatpush.msra.mxu2 %v77_v17  ;;  %v91_v27 = vld [vmem:[%s2548_s1 + $0x1c8] sm:$0xff]  ;;  %v58_v30 = vld [vmem:[%s2548_s1 + $0xc0] sm:$0xff]  ;;  %v73_v33 = vld [vmem:[%s2548_s1 + $0x138] sm:$0xff] }
   0xc   :  { %527 = vmatpush.msra.mxu1 %v61_v18  ;;  %508 = vmatpush.msra.mxu0 %v44_v20  ;;  %v90_v31 = vld [vmem:[%s2548_s1 + $0x1c0] sm:$0xff]  ;;  %v57_v34 = vld [vmem:[%s2548_s1 + $0xb8] sm:$0xff]  ;;  %v40_v36 = vld [vmem:[%s2548_s1 + $0x30] sm:$0xff] }
   0xd   :  { %567 = vmatpush.msra.mxu3 %v93_v19  ;;  %548 = vmatpush.msra.mxu2 %v76_v21  ;;  %v89_v35 = vld [vmem:[%s2548_s1 + $0x1b8] sm:$0xff]  ;;  %v72_v37 = vld [vmem:[%s2548_s1 + $0x130] sm:$0xff]  ;;  %v39_v40 = vld [vmem:[%s2548_s1 + $0x28] sm:$0xff] }
   0xe   :  { %528 = vmatpush.msra.mxu1 %v60_v22  ;;  %509 = vmatpush.msra.mxu0 %v43_v24  ;;  %v56_v38 = vld [vmem:[%s2548_s1 + $0xb0] sm:$0xff]  ;;  %v71_v41 = vld [vmem:[%s2548_s1 + $0x128] sm:$0xff]  ;;  %v38_v44 = vld [vmem:[%s2548_s1 + $0x20] sm:$0xff] }
   0xf   :  { %568 = vmatpush.msra.mxu3 %v92_v23  ;;  %549 = vmatpush.msra.mxu2 %v75_v25  ;;  %v88_v39 = vld [vmem:[%s2548_s1 + $0x1b0] sm:$0xff]  ;;  %v55_v42 = vld [vmem:[%s2548_s1 + $0xa8] sm:$0xff]  ;;  %v70_v45 = vld [vmem:[%s2548_s1 + $0x120] sm:$0xff] }
  0x10   :  { %529 = vmatpush.msra.mxu1 %v59_v26  ;;  %510 = vmatpush.msra.mxu0 %v42_v28  ;;  %v87_v43 = vld [vmem:[%s2548_s1 + $0x1a8] sm:$0xff]  ;;  %v54_v46 = vld [vmem:[%s2548_s1 + $0xa0] sm:$0xff]  ;;  %v37_v48 = vld [vmem:[%s2548_s1 + $0x18] sm:$0xff] }
  0x11   :  { %569 = vmatpush.msra.mxu3 %v91_v27  ;;  %550 = vmatpush.msra.mxu2 %v74_v29  ;;  %v86_v47 = vld [vmem:[%s2548_s1 + $0x1a0] sm:$0xff]  ;;  %v69_v49 = vld [vmem:[%s2548_s1 + $0x118] sm:$0xff]  ;;  %v36_v52 = vld [vmem:[%s2548_s1 + $0x10] sm:$0xff] }
  0x12   :  { %530 = vmatpush.msra.mxu1 %v58_v30  ;;  %511 = vmatpush.msra.mxu0 %v41_v32  ;;  %v53_v50 = vld [vmem:[%s2548_s1 + $0x98] sm:$0xff]  ;;  %v68_v53 = vld [vmem:[%s2548_s1 + $0x110] sm:$0xff]  ;;  %v35_v56 = vld [vmem:[%s2548_s1 + $0x8] sm:$0xff] }
  0x13   :  { %570 = vmatpush.msra.mxu3 %v90_v31  ;;  %551 = vmatpush.msra.mxu2 %v73_v33  ;;  %v85_v51 = vld [vmem:[%s2548_s1 + $0x198] sm:$0xff]  ;;  %v52_v54 = vld [vmem:[%s2548_s1 + $0x90] sm:$0xff]  ;;  %v67_v57 = vld [vmem:[%s2548_s1 + $0x108] sm:$0xff] }
  0x14   :  { %531 = vmatpush.msra.mxu1 %v57_v34  ;;  %512 = vmatpush.msra.mxu0 %v40_v36  ;;  %v84_v55 = vld [vmem:[%s2548_s1 + $0x190] sm:$0xff]  ;;  %v51_v58 = vld [vmem:[%s2548_s1 + $0x88] sm:$0xff]  ;;  %v34_v60 = vld [vmem:[%s2548_s1] sm:$0xff] }
  0x15   :  { %571 = vmatpush.msra.mxu3 %v89_v35  ;;  %552 = vmatpush.msra.mxu2 %v72_v37  ;;  %v83_v59 = vld [vmem:[%s2548_s1 + $0x188] sm:$0xff]  ;;  %v66_v61 = vld [vmem:[%s2548_s1 + $0x100] sm:$0xff]  ;;  %v113_v62 = vld [vmem:[%s2548_s1 + $0x278] sm:$0xff] }
  0x16   :  { %532 = vmatpush.msra.mxu1 %v56_v38  ;;  %513 = vmatpush.msra.mxu0 %v39_v40  ;;  %v145_v63 = vld [vmem:[%s2548_s1 + $0x378] sm:$0xff]  ;;  %v50_v0 = vld [vmem:[%s2548_s1 + $0x80] sm:$0xff]  ;;  %v112_v2 = vld [vmem:[%s2548_s1 + $0x270] sm:$0xff] }
  0x17   :  { %572 = vmatpush.msra.mxu3 %v88_v39  ;;  %553 = vmatpush.msra.mxu2 %v71_v41  ;;  %v82_v1 = vld [vmem:[%s2548_s1 + $0x180] sm:$0xff]  ;;  %v129_v3 = vld [vmem:[%s2548_s1 + $0x2f8] sm:$0xff]  ;;  %v144_v4 = vld [vmem:[%s2548_s1 + $0x370] sm:$0xff] }
  0x18   :  { %533 = vmatpush.msra.mxu1 %v55_v42  ;;  %514 = vmatpush.msra.mxu0 %v38_v44  ;;  %v161_v5 = vld [vmem:[%s2548_s1 + $0x3f8] sm:$0xff]  ;;  %v111_v6 = vld [vmem:[%s2548_s1 + $0x268] sm:$0xff]  ;;  %v128_v7 = vld [vmem:[%s2548_s1 + $0x2f0] sm:$0xff] }
  0x19   :  { %573 = vmatpush.msra.mxu3 %v87_v43  ;;  %554 = vmatpush.msra.mxu2 %v70_v45  ;;  %v143_v8 = vld [vmem:[%s2548_s1 + $0x368] sm:$0xff]  ;;  %v160_v9 = vld [vmem:[%s2548_s1 + $0x3f0] sm:$0xff]  ;;  %v110_v10 = vld [vmem:[%s2548_s1 + $0x260] sm:$0xff] }
  0x1a   :  { %534 = vmatpush.msra.mxu1 %v54_v46  ;;  %515 = vmatpush.msra.mxu0 %v37_v48  ;;  %v127_v11 = vld [vmem:[%s2548_s1 + $0x2e8] sm:$0xff]  ;;  %v142_v12 = vld [vmem:[%s2548_s1 + $0x360] sm:$0xff]  ;;  %v109_v14 = vld [vmem:[%s2548_s1 + $0x258] sm:$0xff] }
  0x1b   :  { %574 = vmatpush.msra.mxu3 %v86_v47  ;;  %555 = vmatpush.msra.mxu2 %v69_v49  ;;  %v159_v13 = vld [vmem:[%s2548_s1 + $0x3e8] sm:$0xff]  ;;  %v126_v15 = vld [vmem:[%s2548_s1 + $0x2e0] sm:$0xff]  ;;  %v141_v16 = vld [vmem:[%s2548_s1 + $0x358] sm:$0xff] }
  0x1c   :  { %535 = vmatpush.msra.mxu1 %v53_v50  ;;  %516 = vmatpush.msra.mxu0 %v36_v52  ;;  %v158_v17 = vld [vmem:[%s2548_s1 + $0x3e0] sm:$0xff]  ;;  %v108_v18 = vld [vmem:[%s2548_s1 + $0x250] sm:$0xff]  ;;  %v125_v19 = vld [vmem:[%s2548_s1 + $0x2d8] sm:$0xff] }
  0x1d   :  { %575 = vmatpush.msra.mxu3 %v85_v51  ;;  %556 = vmatpush.msra.mxu2 %v68_v53  ;;  %v140_v20 = vld [vmem:[%s2548_s1 + $0x350] sm:$0xff]  ;;  %v157_v21 = vld [vmem:[%s2548_s1 + $0x3d8] sm:$0xff]  ;;  %v27_v22 = vld [vmem:[%s2547_s0] sm:$0xff] }
  0x1e   :  { %536 = vmatpush.msra.mxu1 %v52_v54  ;;  %517 = vmatpush.msra.mxu0 %v35_v56  ;;  %v107_v23 = vld [vmem:[%s2548_s1 + $0x248] sm:$0xff]  ;;  %v124_v24 = vld [vmem:[%s2548_s1 + $0x2d0] sm:$0xff]  ;;  %445 = vst [vmem:[#allocation1] ss:$4 sm:$0xff] %v27_v22  ;;  %v106_v27 = vld [vmem:[%s2548_s1 + $0x240] sm:$0xff] }
  0x1f   :  { %576 = vmatpush.msra.mxu3 %v84_v55  ;;  %557 = vmatpush.msra.mxu2 %v67_v57  ;;  %v139_v25 = vld [vmem:[%s2548_s1 + $0x348] sm:$0xff]  ;;  %v156_v26 = vld [vmem:[%s2548_s1 + $0x3d0] sm:$0xff]  ;;  %v138_v29 = vld [vmem:[%s2548_s1 + $0x340] sm:$0xff] }
  0x20   :  { %537 = vmatpush.msra.mxu1 %v51_v58  ;;  %518 = vmatpush.msra.mxu0 %v34_v60  ;;  %v123_v28 = vld [vmem:[%s2548_s1 + $0x2c8] sm:$0xff]  ;;  %v105_v31 = vld [vmem:[%s2548_s1 + $0x238] sm:$0xff]  ;;  %v122_v32 = vld [vmem:[%s2548_s1 + $0x2c0] sm:$0xff] }
  0x21   :  { %577 = vmatpush.msra.mxu3 %v83_v59  ;;  %558 = vmatpush.msra.mxu2 %v66_v61  ;;  %v155_v30 = vld [vmem:[%s2548_s1 + $0x3c8] sm:$0xff]  ;;  %v137_v33 = vld [vmem:[%s2548_s1 + $0x338] sm:$0xff]  ;;  %v154_v34 = vld [vmem:[%s2548_s1 + $0x3c0] sm:$0xff] }
  0x22   :  { %583 = vmatpush.msrb.mxu0 %v113_v62  ;;  %538 = vmatpush.msra.mxu1 %v50_v0  ;;  %v104_v35 = vld [vmem:[%s2548_s1 + $0x230] sm:$0xff]  ;;  %v121_v36 = vld [vmem:[%s2548_s1 + $0x2b8] sm:$0xff]  ;;  %v28_v39 = vld [vmem:[%s2547_s0 + $0x8] sm:$0xff] }
  0x23   :  { %623 = vmatpush.msrb.mxu2 %v145_v63  ;;  %578 = vmatpush.msra.mxu3 %v82_v1  ;;  %v136_v37 = vld [vmem:[%s2548_s1 + $0x330] sm:$0xff]  ;;  %v153_v38 = vld [vmem:[%s2548_s1 + $0x3b8] sm:$0xff]  ;;  %v103_v40 = vld [vmem:[%s2548_s1 + $0x228] sm:$0xff]  ;;  %447 = vst [vmem:[#allocation1 + $0x20] ss:$4 sm:$0xff] %v28_v39 }
  0x24   :  { %584 = vmatpush.msrb.mxu0 %v112_v2  ;;  %603 = vmatpush.msrb.mxu1 %v129_v3  ;;  %v120_v41 = vld [vmem:[%s2548_s1 + $0x2b0] sm:$0xff]  ;;  %v135_v43 = vld [vmem:[%s2548_s1 + $0x328] sm:$0xff]  ;;  %v102_v49 = vld [vmem:[%s2548_s1 + $0x220] sm:$0xff] }
  0x25   :  { %624 = vmatpush.msrb.mxu2 %v144_v4  ;;  %643 = vmatpush.msrb.mxu3 %v161_v5  ;;  %v29_v42 = vld [vmem:[%s2547_s0 + $0x10] sm:$0xff]  ;;  %v1497_v45 = vld.sshfl [vmem:[#allocation1] sm:$0xff pattern:$0x73625140]  ;;  %v119_v50 = vld [vmem:[%s2548_s1 + $0x2a8] sm:$0xff] }
  0x26   :  { %585 = vmatpush.msrb.mxu0 %v111_v6  ;;  %604 = vmatpush.msrb.mxu1 %v128_v7  ;;  %v450_v44 = vld.sshfl [vmem:[#allocation1 + $0x10] sm:$0xff pattern:$0x73625140]  ;;  %v1499_v46 = vld.sshfl [vmem:[#allocation1 + $0x18] sm:$0xff pattern:$0x73625140] }
  0x27   :  { %625 = vmatpush.msrb.mxu2 %v143_v8  ;;  %644 = vmatpush.msrb.mxu3 %v160_v9  ;;  %v1501_v47 = vld.sshfl [vmem:[#allocation1 + $0x8] sm:$0xff pattern:$0x73625140]  ;;  %v152_v48 = vld [vmem:[%s2548_s1 + $0x3b0] sm:$0xff]  ;;  %v134_v51 = vld [vmem:[%s2548_s1 + $0x320] sm:$0xff] }
  0x28   :  { %586 = vmatpush.msrb.mxu0 %v110_v10  ;;  %605 = vmatpush.msrb.mxu1 %v127_v11  ;;  %456 = vst [vmem:[#allocation1] ss:$4 sm:$0xff] %v29_v42  ;;  %v151_v52 = vld [vmem:[%s2548_s1 + $0x3a8] sm:$0xff]  ;;  %v101_v53 = vld [vmem:[%s2548_s1 + $0x218] sm:$0xff]  ;;  %v118_v54 = vld [vmem:[%s2548_s1 + $0x2a0] sm:$0xff] }
  0x29   :  { %626 = vmatpush.msrb.mxu2 %v142_v12  ;;  %645 = vmatpush.msrb.mxu3 %v159_v13  ;;  %v133_v55 = vld [vmem:[%s2548_s1 + $0x318] sm:$0xff]  ;;  %v150_v56 = vld [vmem:[%s2548_s1 + $0x3a0] sm:$0xff]  ;;  %v100_v57 = vld [vmem:[%s2548_s1 + $0x210] sm:$0xff] }
  0x2a   :  { %587 = vmatpush.msrb.mxu0 %v109_v14  ;;  %606 = vmatpush.msrb.mxu1 %v126_v15  ;;  %v117_v58 = vld [vmem:[%s2548_s1 + $0x298] sm:$0xff]  ;;  %v1539_v60 = vld.sshfl [vmem:[#allocation1 + $0x30] sm:$0xff pattern:$0x73625140]  ;;  %v99_v2 = vld [vmem:[%s2548_s1 + $0x208] sm:$0xff] }
  0x2b   :  { %627 = vmatpush.msrb.mxu2 %v141_v16  ;;  %646 = vmatpush.msrb.mxu3 %v158_v17  ;;  %v30_v59 = vld [vmem:[%s2547_s0 + $0x18] sm:$0xff]  ;;  %v1541_v61 = vld.sshfl [vmem:[#allocation1 + $0x20] sm:$0xff pattern:$0x73625140]  ;;  %v132_v0 = vld [vmem:[%s2548_s1 + $0x310] sm:$0xff] }
  0x2c   :  { %588 = vmatpush.msrb.mxu0 %v108_v18  ;;  %607 = vmatpush.msrb.mxu1 %v125_v19  ;;  %v1543_v62 = vld.sshfl [vmem:[#allocation1 + $0x38] sm:$0xff pattern:$0x73625140]  ;;  %v1545_v63 = vld.sshfl [vmem:[#allocation1 + $0x28] sm:$0xff pattern:$0x73625140] }
  0x2d   :  { %628 = vmatpush.msrb.mxu2 %v140_v20  ;;  %647 = vmatpush.msrb.mxu3 %v157_v21  ;;  %v149_v1 = vld [vmem:[%s2548_s1 + $0x398] sm:$0xff]  ;;  %457 = vst [vmem:[#allocation1 + $0x20] ss:$4 sm:$0xff] %v30_v59  ;;  %v116_v3 = vld [vmem:[%s2548_s1 + $0x290] sm:$0xff]  ;;  %v131_v4 = vld [vmem:[%s2548_s1 + $0x308] sm:$0xff] }
  0x2e   :  { %589 = vmatpush.msrb.mxu0 %v107_v23  ;;  %608 = vmatpush.msrb.mxu1 %v124_v24  ;;  %v148_v5 = vld [vmem:[%s2548_s1 + $0x390] sm:$0xff]  ;;  %v98_v6 = vld [vmem:[%s2548_s1 + $0x200] sm:$0xff]  ;;  %v115_v7 = vld [vmem:[%s2548_s1 + $0x288] sm:$0xff] }
  0x2f   :  { %629 = vmatpush.msrb.mxu2 %v139_v25  ;;  %648 = vmatpush.msrb.mxu3 %v156_v26  ;;  %v130_v8 = vld [vmem:[%s2548_s1 + $0x300] sm:$0xff]  ;;  %v147_v9 = vld [vmem:[%s2548_s1 + $0x388] sm:$0xff]  ;;  %v177_v10 = vld [vmem:[%s2548_s1 + $0x478] sm:$0xff] }
  0x30   :  { %590 = vmatpush.msrb.mxu0 %v106_v27  ;;  %609 = vmatpush.msrb.mxu1 %v123_v28  ;;  %v209_v11 = vld [vmem:[%s2548_s1 + $0x578] sm:$0xff]  ;;  %v114_v12 = vld [vmem:[%s2548_s1 + $0x280] sm:$0xff]  ;;  %v176_v14 = vld [vmem:[%s2548_s1 + $0x470] sm:$0xff] }
  0x31   :  { %630 = vmatpush.msrb.mxu2 %v138_v29  ;;  %649 = vmatpush.msrb.mxu3 %v155_v30  ;;  %v146_v13 = vld [vmem:[%s2548_s1 + $0x380] sm:$0xff]  ;;  %v193_v15 = vld [vmem:[%s2548_s1 + $0x4f8] sm:$0xff]  ;;  %v208_v16 = vld [vmem:[%s2548_s1 + $0x570] sm:$0xff] }
  0x32   :  { %591 = vmatpush.msrb.mxu0 %v105_v31  ;;  %610 = vmatpush.msrb.mxu1 %v122_v32  ;;  %v225_v17 = vld [vmem:[%s2548_s1 + $0x5f8] sm:$0xff]  ;;  %v175_v18 = vld [vmem:[%s2548_s1 + $0x468] sm:$0xff]  ;;  %v192_v19 = vld [vmem:[%s2548_s1 + $0x4f0] sm:$0xff] }
  0x33   :  { %631 = vmatpush.msrb.mxu2 %v137_v33  ;;  %650 = vmatpush.msrb.mxu3 %v154_v34  ;;  %v207_v20 = vld [vmem:[%s2548_s1 + $0x568] sm:$0xff]  ;;  %v224_v21 = vld [vmem:[%s2548_s1 + $0x5f0] sm:$0xff]  ;;  %v174_v22 = vld [vmem:[%s2548_s1 + $0x460] sm:$0xff] }
  0x34   :  { %592 = vmatpush.msrb.mxu0 %v104_v35  ;;  %611 = vmatpush.msrb.mxu1 %v121_v36  ;;  %v191_v23 = vld [vmem:[%s2548_s1 + $0x4e8] sm:$0xff]  ;;  %v206_v24 = vld [vmem:[%s2548_s1 + $0x560] sm:$0xff]  ;;  %v1627_v26 = vld.sshfl [vmem:[#allocation1 + $0x10] sm:$0xff pattern:$0x73625140] }
  0x35   :  { %632 = vmatpush.msrb.mxu2 %v136_v37  ;;  %651 = vmatpush.msrb.mxu3 %v153_v38  ;;  %v1625_v25 = vld.sshfl [vmem:[#allocation1] sm:$0xff pattern:$0x73625140]  ;;  %v1629_v27 = vld.sshfl [vmem:[#allocation1 + $0x8] sm:$0xff pattern:$0x73625140] }
  0x36   :  { %593 = vmatpush.msrb.mxu0 %v103_v40  ;;  %612 = vmatpush.msrb.mxu1 %v120_v41  ;;  %v223_v28 = vld [vmem:[%s2548_s1 + $0x5e8] sm:$0xff]  ;;  %v31_v29 = vld [vmem:[%s2547_s0 + $0x20] sm:$0xff]  ;;  %v1637_v30 = vld.sshfl [vmem:[#allocation1 + $0x18] sm:$0xff pattern:$0x73625140] }
  0x37   :  { %633 = vmatpush.msrb.mxu2 %v135_v43  ;;  %652 = vmatpush.msrb.mxu3 %v152_v48  ;;  %v173_v31 = vld [vmem:[%s2548_s1 + $0x458] sm:$0xff]  ;;  %v190_v32 = vld [vmem:[%s2548_s1 + $0x4e0] sm:$0xff]  ;;  %466 = vst [vmem:[#allocation1] ss:$4 sm:$0xff] %v31_v29  ;;  %v172_v35 = vld [vmem:[%s2548_s1 + $0x450] sm:$0xff] }
  0x38   :  { %594 = vmatpush.msrb.mxu0 %v102_v49  ;;  %613 = vmatpush.msrb.mxu1 %v119_v50  ;;  %v205_v33 = vld [vmem:[%s2548_s1 + $0x558] sm:$0xff]  ;;  %v222_v34 = vld [vmem:[%s2548_s1 + $0x5e0] sm:$0xff] }
  0x39   :  { %634 = vmatpush.msrb.mxu2 %v134_v51  ;;  %653 = vmatpush.msrb.mxu3 %v151_v52  ;;  %v189_v36 = vld [vmem:[%s2548_s1 + $0x4d8] sm:$0xff] }
  0x3a   :  { %595 = vmatpush.msrb.mxu0 %v101_v53  ;;  %614 = vmatpush.msrb.mxu1 %v118_v54 }
  0x3b   :  { %635 = vmatpush.msrb.mxu2 %v133_v55  ;;  %654 = vmatpush.msrb.mxu3 %v150_v56 }
  0x3c   :  { %596 = vmatpush.msrb.mxu0 %v100_v57  ;;  %615 = vmatpush.msrb.mxu1 %v117_v58 }
  0x3d   :  { %636 = vmatpush.msrb.mxu2 %v132_v0  ;;  %655 = vmatpush.msrb.mxu3 %v149_v1 }
  0x3e   :  { %597 = vmatpush.msrb.mxu0 %v99_v2  ;;  %616 = vmatpush.msrb.mxu1 %v116_v3 }
  0x3f   :  { %637 = vmatpush.msrb.mxu2 %v131_v4  ;;  %656 = vmatpush.msrb.mxu3 %v148_v5 }
  0x40   :  { %559 = vmatmul.f32.vlgmr.msra.gmra.mxu2 %v450_v44  ;;  %598 = vmatpush.msrb.mxu0 %v98_v6 }
  0x41   :  { %617 = vmatpush.msrb.mxu1 %v115_v7  ;;  %638 = vmatpush.msrb.mxu2 %v130_v8 }
  0x42   :  { %657 = vmatpush.msrb.mxu3 %v147_v9  ;;  %519 = vmatmul.f32.vlgmr.msra.gmra.mxu0 %v1497_v45 }
  0x43   :  { %579 = vmatmul.f32.vlgmr.msra.gmra.mxu3 %v1499_v46  ;;  %663 = vmatpush.msra.mxu0 %v177_v10 }
  0x44   :  { %703 = vmatpush.msra.mxu2 %v209_v11  ;;  %618 = vmatpush.msrb.mxu1 %v114_v12 }
  0x45   :  { %658 = vmatpush.msrb.mxu3 %v146_v13  ;;  %539 = vmatmul.f32.vlgmr.msra.gmra.mxu1 %v1501_v47 }
  0x46   :  { %664 = vmatpush.msra.mxu0 %v176_v14  ;;  %683 = vmatpush.msra.mxu1 %v193_v15 }
  0x47   :  { %704 = vmatpush.msra.mxu2 %v208_v16  ;;  %723 = vmatpush.msra.mxu3 %v225_v17 }
  0x48   :  { %665 = vmatpush.msra.mxu0 %v175_v18  ;;  %684 = vmatpush.msra.mxu1 %v192_v19 }
  0x49   :  { %705 = vmatpush.msra.mxu2 %v207_v20  ;;  %724 = vmatpush.msra.mxu3 %v224_v21 }
  0x4a   :  { %639 = vmatmul.f32.vlgmr.msrb.gmra.mxu2 %v1539_v60  ;;  %666 = vmatpush.msra.mxu0 %v174_v22 }
  0x4b   :  { %685 = vmatpush.msra.mxu1 %v191_v23  ;;  %706 = vmatpush.msra.mxu2 %v206_v24 }
  0x4c   :  { %725 = vmatpush.msra.mxu3 %v223_v28  ;;  %599 = vmatmul.f32.vlgmr.msrb.gmra.mxu0 %v1541_v61 }
  0x4d   :  { %659 = vmatmul.f32.vlgmr.msrb.gmra.mxu3 %v1543_v62  ;;  %667 = vmatpush.msra.mxu0 %v173_v31 }
  0x4e   :  { %12 = vsyncpa [#allocation3], 0  ;;  %686 = vmatpush.msra.mxu1 %v190_v32  ;;  %707 = vmatpush.msra.mxu2 %v205_v33  ;;  %v204_v37 = vld [vmem:[%s2548_s1 + $0x550] sm:$0xff]  ;;  %v221_v38 = vld [vmem:[%s2548_s1 + $0x5d8] sm:$0xff]  ;;  %s1132_s21 = smov [#allocation2]   ;;  %s1093_s25 = sshll.u32 %s2554_s7, 4  ;;  %s1094_s25 = int_to_ptr.hbm [resolvable:$true] %s1093_s25 }
  0x4f   :  { %726 = vmatpush.msra.mxu3 %v222_v34  ;;  %619 = vmatmul.f32.vlgmr.msrb.gmra.mxu1 %v1545_v63  ;;  %v171_v39 = vld [vmem:[%s2548_s1 + $0x448] sm:$0xff]  ;;  %v188_v40 = vld [vmem:[%s2548_s1 + $0x4d0] sm:$0xff]  ;;  %v170_v43 = vld [vmem:[%s2548_s1 + $0x440] sm:$0xff]  ;;  %s1091_s22 = sshll.u32 %s1132_s21, 4  ;;  %s1092_s22 = int_to_ptr.vmem [resolvable:$true] %s1091_s22 }
  0x50   :  { %668 = vmatpush.msra.mxu0 %v172_v35  ;;  %687 = vmatpush.msra.mxu1 %v189_v36  ;;  %v203_v41 = vld [vmem:[%s2548_s1 + $0x548] sm:$0xff]  ;;  %v220_v42 = vld [vmem:[%s2548_s1 + $0x5d0] sm:$0xff]  ;;  %v202_v45 = vld [vmem:[%s2548_s1 + $0x540] sm:$0xff] }
  0x51   :  { %708 = vmatpush.msra.mxu2 %v204_v37  ;;  %727 = vmatpush.msra.mxu3 %v221_v38  ;;  %v187_v44 = vld [vmem:[%s2548_s1 + $0x4c8] sm:$0xff]  ;;  %v169_v47 = vld [vmem:[%s2548_s1 + $0x438] sm:$0xff]  ;;  %v186_v48 = vld [vmem:[%s2548_s1 + $0x4c0] sm:$0xff] }
  0x52   :  { %669 = vmatpush.msra.mxu0 %v171_v39  ;;  %688 = vmatpush.msra.mxu1 %v188_v40  ;;  %v219_v46 = vld [vmem:[%s2548_s1 + $0x5c8] sm:$0xff]  ;;  %v201_v49 = vld [vmem:[%s2548_s1 + $0x538] sm:$0xff]  ;;  %v218_v50 = vld [vmem:[%s2548_s1 + $0x5c0] sm:$0xff] }
  0x53   :  { %709 = vmatpush.msra.mxu2 %v203_v41  ;;  %728 = vmatpush.msra.mxu3 %v220_v42  ;;  %v168_v51 = vld [vmem:[%s2548_s1 + $0x430] sm:$0xff]  ;;  %v185_v52 = vld [vmem:[%s2548_s1 + $0x4b8] sm:$0xff]  ;;  %v167_v55 = vld [vmem:[%s2548_s1 + $0x428] sm:$0xff] }
  0x54   :  { %670 = vmatpush.msra.mxu0 %v170_v43  ;;  %689 = vmatpush.msra.mxu1 %v187_v44  ;;  %v200_v53 = vld [vmem:[%s2548_s1 + $0x530] sm:$0xff]  ;;  %v217_v54 = vld [vmem:[%s2548_s1 + $0x5b8] sm:$0xff]  ;;  %v199_v57 = vld [vmem:[%s2548_s1 + $0x528] sm:$0xff] }
  0x55   :  { %710 = vmatpush.msra.mxu2 %v202_v45  ;;  %729 = vmatpush.msra.mxu3 %v219_v46  ;;  %v184_v56 = vld [vmem:[%s2548_s1 + $0x4b0] sm:$0xff]  ;;  %v166_v59 = vld [vmem:[%s2548_s1 + $0x420] sm:$0xff]  ;;  %v183_v60 = vld [vmem:[%s2548_s1 + $0x4a8] sm:$0xff] }
  0x56   :  { %671 = vmatpush.msra.mxu0 %v169_v47  ;;  %690 = vmatpush.msra.mxu1 %v186_v48  ;;  %v216_v58 = vld [vmem:[%s2548_s1 + $0x5b0] sm:$0xff]  ;;  %v198_v61 = vld [vmem:[%s2548_s1 + $0x520] sm:$0xff]  ;;  %v215_v62 = vld [vmem:[%s2548_s1 + $0x5a8] sm:$0xff] }
  0x57   :  { %711 = vmatpush.msra.mxu2 %v201_v49  ;;  %730 = vmatpush.msra.mxu3 %v218_v50  ;;  %v165_v63 = vld [vmem:[%s2548_s1 + $0x418] sm:$0xff]  ;;  %v182_v0 = vld [vmem:[%s2548_s1 + $0x4a0] sm:$0xff]  ;;  %v164_v3 = vld [vmem:[%s2548_s1 + $0x410] sm:$0xff] }
  0x58   :  { %672 = vmatpush.msra.mxu0 %v168_v51  ;;  %691 = vmatpush.msra.mxu1 %v185_v52  ;;  %v197_v1 = vld [vmem:[%s2548_s1 + $0x518] sm:$0xff]  ;;  %v214_v2 = vld [vmem:[%s2548_s1 + $0x5a0] sm:$0xff]  ;;  %v196_v5 = vld [vmem:[%s2548_s1 + $0x510] sm:$0xff] }
  0x59   :  { %712 = vmatpush.msra.mxu2 %v200_v53  ;;  %731 = vmatpush.msra.mxu3 %v217_v54  ;;  %v181_v4 = vld [vmem:[%s2548_s1 + $0x498] sm:$0xff]  ;;  %v163_v7 = vld [vmem:[%s2548_s1 + $0x408] sm:$0xff]  ;;  %v180_v8 = vld [vmem:[%s2548_s1 + $0x490] sm:$0xff] }
  0x5a   :  { %673 = vmatpush.msra.mxu0 %v167_v55  ;;  %692 = vmatpush.msra.mxu1 %v184_v56  ;;  %v213_v6 = vld [vmem:[%s2548_s1 + $0x598] sm:$0xff]  ;;  %v195_v9 = vld [vmem:[%s2548_s1 + $0x508] sm:$0xff]  ;;  %v212_v10 = vld [vmem:[%s2548_s1 + $0x590] sm:$0xff] }
  0x5b   :  { %713 = vmatpush.msra.mxu2 %v199_v57  ;;  %732 = vmatpush.msra.mxu3 %v216_v58  ;;  %v162_v11 = vld [vmem:[%s2548_s1 + $0x400] sm:$0xff]  ;;  %v179_v12 = vld [vmem:[%s2548_s1 + $0x488] sm:$0xff]  ;;  %v241_v15 = vld [vmem:[%s2548_s1 + $0x678] sm:$0xff] }
  0x5c   :  { %674 = vmatpush.msra.mxu0 %v166_v59  ;;  %693 = vmatpush.msra.mxu1 %v183_v60  ;;  %v194_v13 = vld [vmem:[%s2548_s1 + $0x500] sm:$0xff]  ;;  %v211_v14 = vld [vmem:[%s2548_s1 + $0x588] sm:$0xff]  ;;  %v273_v16 = vld [vmem:[%s2548_s1 + $0x778] sm:$0xff] }
  0x5d   :  { %714 = vmatpush.msra.mxu2 %v198_v61  ;;  %733 = vmatpush.msra.mxu3 %v215_v62  ;;  %v178_v17 = vld [vmem:[%s2548_s1 + $0x480] sm:$0xff]  ;;  %v240_v19 = vld [vmem:[%s2548_s1 + $0x670] sm:$0xff]  ;;  %v257_v20 = vld [vmem:[%s2548_s1 + $0x6f8] sm:$0xff] }
  0x5e   :  { %675 = vmatpush.msra.mxu0 %v165_v63  ;;  %694 = vmatpush.msra.mxu1 %v182_v0  ;;  %v210_v18 = vld [vmem:[%s2548_s1 + $0x580] sm:$0xff]  ;;  %v272_v21 = vld [vmem:[%s2548_s1 + $0x770] sm:$0xff]  ;;  %v289_v22 = vld [vmem:[%s2548_s1 + $0x7f8] sm:$0xff] }
  0x5f   :  { %715 = vmatpush.msra.mxu2 %v197_v1  ;;  %734 = vmatpush.msra.mxu3 %v214_v2  ;;  %v239_v23 = vld [vmem:[%s2548_s1 + $0x668] sm:$0xff]  ;;  %v256_v24 = vld [vmem:[%s2548_s1 + $0x6f0] sm:$0xff]  ;;  %v238_v28 = vld [vmem:[%s2548_s1 + $0x660] sm:$0xff] }
  0x60   :  { %676 = vmatpush.msra.mxu0 %v164_v3  ;;  %695 = vmatpush.msra.mxu1 %v181_v4  ;;  %v1830_v29 = vld.sshfl [vmem:[#allocation1 + $0x20] sm:$0xff pattern:$0x73625140]  ;;  %v1832_v31 = vld.sshfl [vmem:[#allocation1 + $0x30] sm:$0xff pattern:$0x73625140] }
  0x61   :  { %716 = vmatpush.msra.mxu2 %v196_v5  ;;  %735 = vmatpush.msra.mxu3 %v213_v6  ;;  %v1834_v32 = vld.sshfl [vmem:[#allocation1 + $0x28] sm:$0xff pattern:$0x73625140]  ;;  %v1842_v33 = vld.sshfl [vmem:[#allocation1 + $0x38] sm:$0xff pattern:$0x73625140] }
  0x62   :  { %677 = vmatpush.msra.mxu0 %v163_v7  ;;  %696 = vmatpush.msra.mxu1 %v180_v8  ;;  %v270_v34 = vld [vmem:[%s2548_s1 + $0x760] sm:$0xff]  ;;  %v287_v35 = vld [vmem:[%s2548_s1 + $0x7e8] sm:$0xff]  ;;  %v237_v36 = vld [vmem:[%s2548_s1 + $0x658] sm:$0xff] }
  0x63   :  { %717 = vmatpush.msra.mxu2 %v195_v9  ;;  %736 = vmatpush.msra.mxu3 %v212_v10  ;;  %v254_v37 = vld [vmem:[%s2548_s1 + $0x6e0] sm:$0xff]  ;;  %v269_v38 = vld [vmem:[%s2548_s1 + $0x758] sm:$0xff]  ;;  %v236_v40 = vld [vmem:[%s2548_s1 + $0x650] sm:$0xff] }
  0x64   :  { %678 = vmatpush.msra.mxu0 %v162_v11  ;;  %697 = vmatpush.msra.mxu1 %v179_v12  ;;  %v286_v39 = vld [vmem:[%s2548_s1 + $0x7e0] sm:$0xff]  ;;  %v253_v41 = vld [vmem:[%s2548_s1 + $0x6d8] sm:$0xff]  ;;  %v268_v42 = vld [vmem:[%s2548_s1 + $0x750] sm:$0xff] }
  0x65   :  { %718 = vmatpush.msra.mxu2 %v194_v13  ;;  %737 = vmatpush.msra.mxu3 %v211_v14  ;;  %v285_v43 = vld [vmem:[%s2548_s1 + $0x7d8] sm:$0xff]  ;;  %v235_v44 = vld [vmem:[%s2548_s1 + $0x648] sm:$0xff]  ;;  %v252_v45 = vld [vmem:[%s2548_s1 + $0x6d0] sm:$0xff] }
  0x66   :  { %679 = vmatmul.f32.vlgmr.msra.gmra.mxu0 %v1625_v25  ;;  %719 = vmatmul.f32.vlgmr.msra.gmra.mxu2 %v1627_v26  ;;  %v271_v25 = vld [vmem:[%s2548_s1 + $0x768] sm:$0xff]  ;;  %v288_v26 = vld [vmem:[%s2548_s1 + $0x7f0] sm:$0xff]  ;;  %v234_v48 = vld [vmem:[%s2548_s1 + $0x640] sm:$0xff] }
  0x67   :  { %743 = vmatpush.msrb.mxu0 %v241_v15  ;;  %783 = vmatpush.msrb.mxu2 %v273_v16  ;;  %v267_v46 = vld [vmem:[%s2548_s1 + $0x748] sm:$0xff]  ;;  %v284_v47 = vld [vmem:[%s2548_s1 + $0x7d0] sm:$0xff]  ;;  %v266_v50 = vld [vmem:[%s2548_s1 + $0x740] sm:$0xff] }
  0x68   :  { %698 = vmatpush.msra.mxu1 %v178_v17  ;;  %738 = vmatpush.msra.mxu3 %v210_v18  ;;  %v251_v49 = vld [vmem:[%s2548_s1 + $0x6c8] sm:$0xff]  ;;  %v233_v52 = vld [vmem:[%s2548_s1 + $0x638] sm:$0xff]  ;;  %v250_v53 = vld [vmem:[%s2548_s1 + $0x6c0] sm:$0xff] }
  0x69   :  { %699 = vmatmul.f32.vlgmr.msra.gmra.mxu1 %v1629_v27  ;;  %739 = vmatmul.f32.vlgmr.msra.gmra.mxu3 %v1637_v30  ;;  %v255_v27 = vld [vmem:[%s2548_s1 + $0x6e8] sm:$0xff]  ;;  %v265_v54 = vld [vmem:[%s2548_s1 + $0x738] sm:$0xff]  ;;  %v282_v55 = vld [vmem:[%s2548_s1 + $0x7c0] sm:$0xff] }
  0x6a   :  { %744 = vmatpush.msrb.mxu0 %v240_v19  ;;  %763 = vmatpush.msrb.mxu1 %v257_v20  ;;  %v32_v30 = vld [vmem:[%s2547_s0 + $0x28] sm:$0xff]  ;;  %v232_v56 = vld [vmem:[%s2548_s1 + $0x630] sm:$0xff]  ;;  %v249_v57 = vld [vmem:[%s2548_s1 + $0x6b8] sm:$0xff] }
  0x6b   :  { %784 = vmatpush.msrb.mxu2 %v272_v21  ;;  %803 = vmatpush.msrb.mxu3 %v289_v22  ;;  %467 = vst [vmem:[#allocation1 + $0x20] ss:$4 sm:$0xff] %v32_v30  ;;  %v283_v51 = vld [vmem:[%s2548_s1 + $0x7c8] sm:$0xff]  ;;  %v264_v58 = vld [vmem:[%s2548_s1 + $0x730] sm:$0xff]  ;;  %v281_v59 = vld [vmem:[%s2548_s1 + $0x7b8] sm:$0xff] }
  0x6c   :  { %745 = vmatpush.msrb.mxu0 %v239_v23  ;;  %764 = vmatpush.msrb.mxu1 %v256_v24  ;;  %v231_v60 = vld [vmem:[%s2548_s1 + $0x628] sm:$0xff]  ;;  %v248_v61 = vld [vmem:[%s2548_s1 + $0x6b0] sm:$0xff]  ;;  %v230_v0 = vld [vmem:[%s2548_s1 + $0x620] sm:$0xff] }
  0x6d   :  { %785 = vmatpush.msrb.mxu2 %v271_v25  ;;  %804 = vmatpush.msrb.mxu3 %v288_v26  ;;  %v263_v62 = vld [vmem:[%s2548_s1 + $0x728] sm:$0xff]  ;;  %v280_v63 = vld [vmem:[%s2548_s1 + $0x7b0] sm:$0xff]  ;;  %v262_v2 = vld [vmem:[%s2548_s1 + $0x720] sm:$0xff] }
  0x6e   :  { %746 = vmatpush.msrb.mxu0 %v238_v28  ;;  %765 = vmatpush.msrb.mxu1 %v255_v27  ;;  %v247_v1 = vld [vmem:[%s2548_s1 + $0x6a8] sm:$0xff]  ;;  %v229_v4 = vld [vmem:[%s2548_s1 + $0x618] sm:$0xff]  ;;  %v246_v5 = vld [vmem:[%s2548_s1 + $0x6a0] sm:$0xff] }
  0x6f   :  { %786 = vmatpush.msrb.mxu2 %v270_v34  ;;  %805 = vmatpush.msrb.mxu3 %v287_v35  ;;  %v279_v3 = vld [vmem:[%s2548_s1 + $0x7a8] sm:$0xff]  ;;  %v261_v6 = vld [vmem:[%s2548_s1 + $0x718] sm:$0xff]  ;;  %v278_v7 = vld [vmem:[%s2548_s1 + $0x7a0] sm:$0xff] }
  0x70   :  { %747 = vmatpush.msrb.mxu0 %v237_v36  ;;  %766 = vmatpush.msrb.mxu1 %v254_v37  ;;  %v228_v8 = vld [vmem:[%s2548_s1 + $0x610] sm:$0xff]  ;;  %v245_v9 = vld [vmem:[%s2548_s1 + $0x698] sm:$0xff]  ;;  %v227_v12 = vld [vmem:[%s2548_s1 + $0x608] sm:$0xff] }
  0x71   :  { %787 = vmatpush.msrb.mxu2 %v269_v38  ;;  %806 = vmatpush.msrb.mxu3 %v286_v39  ;;  %v260_v10 = vld [vmem:[%s2548_s1 + $0x710] sm:$0xff]  ;;  %v277_v11 = vld [vmem:[%s2548_s1 + $0x798] sm:$0xff]  ;;  %v259_v14 = vld [vmem:[%s2548_s1 + $0x708] sm:$0xff] }
  0x72   :  { %748 = vmatpush.msrb.mxu0 %v236_v40  ;;  %767 = vmatpush.msrb.mxu1 %v253_v41  ;;  %v244_v13 = vld [vmem:[%s2548_s1 + $0x690] sm:$0xff]  ;;  %v226_v16 = vld [vmem:[%s2548_s1 + $0x600] sm:$0xff]  ;;  %v243_v17 = vld [vmem:[%s2548_s1 + $0x688] sm:$0xff] }
  0x73   :  { %788 = vmatpush.msrb.mxu2 %v268_v42  ;;  %807 = vmatpush.msrb.mxu3 %v285_v43  ;;  %v276_v15 = vld [vmem:[%s2548_s1 + $0x790] sm:$0xff]  ;;  %v258_v18 = vld [vmem:[%s2548_s1 + $0x700] sm:$0xff]  ;;  %v275_v19 = vld [vmem:[%s2548_s1 + $0x788] sm:$0xff] }
  0x74   :  { %749 = vmatpush.msrb.mxu0 %v235_v44  ;;  %768 = vmatpush.msrb.mxu1 %v252_v45  ;;  %v305_v20 = vld [vmem:[%s2548_s1 + $0x878] sm:$0xff]  ;;  %v242_v22 = vld [vmem:[%s2548_s1 + $0x680] sm:$0xff]  ;;  %v304_v24 = vld [vmem:[%s2548_s1 + $0x870] sm:$0xff] }
  0x75   :  { %789 = vmatpush.msrb.mxu2 %v267_v46  ;;  %808 = vmatpush.msrb.mxu3 %v284_v47  ;;  %v337_v21 = vld [vmem:[%s2548_s1 + $0x978] sm:$0xff]  ;;  %v274_v23 = vld [vmem:[%s2548_s1 + $0x780] sm:$0xff]  ;;  %v336_v26 = vld [vmem:[%s2548_s1 + $0x970] sm:$0xff] }
  0x76   :  { %750 = vmatpush.msrb.mxu0 %v234_v48  ;;  %769 = vmatpush.msrb.mxu1 %v251_v49  ;;  %v321_v25 = vld [vmem:[%s2548_s1 + $0x8f8] sm:$0xff]  ;;  %v335_v27 = vld [vmem:[%s2548_s1 + $0x968] sm:$0xff]  ;;  %v302_v30 = vld [vmem:[%s2548_s1 + $0x860] sm:$0xff] }
  0x77   :  { %790 = vmatpush.msrb.mxu2 %v266_v50  ;;  %809 = vmatpush.msrb.mxu3 %v283_v51  ;;  %v353_v28 = vld [vmem:[%s2548_s1 + $0x9f8] sm:$0xff]  ;;  %v334_v34 = vld [vmem:[%s2548_s1 + $0x960] sm:$0xff]  ;;  %v351_v35 = vld [vmem:[%s2548_s1 + $0x9e8] sm:$0xff] }
  0x78   :  { %751 = vmatpush.msrb.mxu0 %v233_v52  ;;  %770 = vmatpush.msrb.mxu1 %v250_v53  ;;  %v301_v36 = vld [vmem:[%s2548_s1 + $0x858] sm:$0xff]  ;;  %v318_v37 = vld [vmem:[%s2548_s1 + $0x8e0] sm:$0xff]  ;;  %v300_v40 = vld [vmem:[%s2548_s1 + $0x850] sm:$0xff] }
  0x79   :  { %791 = vmatpush.msrb.mxu2 %v265_v54  ;;  %810 = vmatpush.msrb.mxu3 %v282_v55  ;;  %v333_v38 = vld [vmem:[%s2548_s1 + $0x958] sm:$0xff]  ;;  %v350_v39 = vld [vmem:[%s2548_s1 + $0x9e0] sm:$0xff]  ;;  %v332_v42 = vld [vmem:[%s2548_s1 + $0x950] sm:$0xff] }
  0x7a   :  { %752 = vmatpush.msrb.mxu0 %v232_v56  ;;  %771 = vmatpush.msrb.mxu1 %v249_v57  ;;  %v317_v41 = vld [vmem:[%s2548_s1 + $0x8d8] sm:$0xff]  ;;  %v299_v44 = vld [vmem:[%s2548_s1 + $0x848] sm:$0xff]  ;;  %v316_v45 = vld [vmem:[%s2548_s1 + $0x8d0] sm:$0xff] }
  0x7b   :  { %792 = vmatpush.msrb.mxu2 %v264_v58  ;;  %811 = vmatpush.msrb.mxu3 %v281_v59  ;;  %v349_v43 = vld [vmem:[%s2548_s1 + $0x9d8] sm:$0xff]  ;;  %v331_v46 = vld [vmem:[%s2548_s1 + $0x948] sm:$0xff]  ;;  %v348_v47 = vld [vmem:[%s2548_s1 + $0x9d0] sm:$0xff] }
  0x7c   :  { %753 = vmatpush.msrb.mxu0 %v231_v60  ;;  %772 = vmatpush.msrb.mxu1 %v248_v61  ;;  %v298_v48 = vld [vmem:[%s2548_s1 + $0x840] sm:$0xff]  ;;  %v315_v49 = vld [vmem:[%s2548_s1 + $0x8c8] sm:$0xff]  ;;  %v297_v52 = vld [vmem:[%s2548_s1 + $0x838] sm:$0xff] }
  0x7d   :  { %793 = vmatpush.msrb.mxu2 %v263_v62  ;;  %812 = vmatpush.msrb.mxu3 %v280_v63  ;;  %v330_v50 = vld [vmem:[%s2548_s1 + $0x940] sm:$0xff]  ;;  %v347_v51 = vld [vmem:[%s2548_s1 + $0x9c8] sm:$0xff]  ;;  %v329_v54 = vld [vmem:[%s2548_s1 + $0x938] sm:$0xff] }
  0x7e   :  { %754 = vmatpush.msrb.mxu0 %v230_v0  ;;  %773 = vmatpush.msrb.mxu1 %v247_v1  ;;  %v314_v53 = vld [vmem:[%s2548_s1 + $0x8c0] sm:$0xff]  ;;  %v296_v56 = vld [vmem:[%s2548_s1 + $0x830] sm:$0xff]  ;;  %v313_v57 = vld [vmem:[%s2548_s1 + $0x8b8] sm:$0xff] }
  0x7f   :  { %794 = vmatpush.msrb.mxu2 %v262_v2  ;;  %813 = vmatpush.msrb.mxu3 %v279_v3  ;;  %v346_v55 = vld [vmem:[%s2548_s1 + $0x9c0] sm:$0xff]  ;;  %v328_v58 = vld [vmem:[%s2548_s1 + $0x930] sm:$0xff]  ;;  %v345_v59 = vld [vmem:[%s2548_s1 + $0x9b8] sm:$0xff] }
  0x80   :  { %755 = vmatpush.msrb.mxu0 %v229_v4  ;;  %774 = vmatpush.msrb.mxu1 %v246_v5  ;;  %v295_v60 = vld [vmem:[%s2548_s1 + $0x828] sm:$0xff]  ;;  %v312_v61 = vld [vmem:[%s2548_s1 + $0x8b0] sm:$0xff]  ;;  %v294_v0 = vld [vmem:[%s2548_s1 + $0x820] sm:$0xff] }
  0x81   :  { %795 = vmatpush.msrb.mxu2 %v261_v6  ;;  %814 = vmatpush.msrb.mxu3 %v278_v7  ;;  %v327_v62 = vld [vmem:[%s2548_s1 + $0x928] sm:$0xff]  ;;  %v344_v63 = vld [vmem:[%s2548_s1 + $0x9b0] sm:$0xff]  ;;  %v326_v2 = vld [vmem:[%s2548_s1 + $0x920] sm:$0xff] }
  0x82   :  { %756 = vmatpush.msrb.mxu0 %v228_v8  ;;  %775 = vmatpush.msrb.mxu1 %v245_v9  ;;  %v311_v1 = vld [vmem:[%s2548_s1 + $0x8a8] sm:$0xff]  ;;  %v293_v4 = vld [vmem:[%s2548_s1 + $0x818] sm:$0xff]  ;;  %v310_v5 = vld [vmem:[%s2548_s1 + $0x8a0] sm:$0xff] }
  0x83   :  { %796 = vmatpush.msrb.mxu2 %v260_v10  ;;  %815 = vmatpush.msrb.mxu3 %v277_v11  ;;  %v343_v3 = vld [vmem:[%s2548_s1 + $0x9a8] sm:$0xff]  ;;  %v325_v6 = vld [vmem:[%s2548_s1 + $0x918] sm:$0xff]  ;;  %v342_v7 = vld [vmem:[%s2548_s1 + $0x9a0] sm:$0xff] }
  0x84   :  { %757 = vmatpush.msrb.mxu0 %v227_v12  ;;  %776 = vmatpush.msrb.mxu1 %v244_v13  ;;  %v292_v8 = vld [vmem:[%s2548_s1 + $0x810] sm:$0xff]  ;;  %v309_v9 = vld [vmem:[%s2548_s1 + $0x898] sm:$0xff]  ;;  %v291_v12 = vld [vmem:[%s2548_s1 + $0x808] sm:$0xff] }
  0x85   :  { %797 = vmatpush.msrb.mxu2 %v259_v14  ;;  %816 = vmatpush.msrb.mxu3 %v276_v15  ;;  %v324_v10 = vld [vmem:[%s2548_s1 + $0x910] sm:$0xff]  ;;  %v341_v11 = vld [vmem:[%s2548_s1 + $0x998] sm:$0xff]  ;;  %v323_v14 = vld [vmem:[%s2548_s1 + $0x908] sm:$0xff] }
  0x86   :  { %758 = vmatpush.msrb.mxu0 %v226_v16  ;;  %777 = vmatpush.msrb.mxu1 %v243_v17  ;;  %v308_v13 = vld [vmem:[%s2548_s1 + $0x890] sm:$0xff]  ;;  %v290_v16 = vld [vmem:[%s2548_s1 + $0x800] sm:$0xff]  ;;  %v307_v17 = vld [vmem:[%s2548_s1 + $0x888] sm:$0xff] }
  0x87   :  { %798 = vmatpush.msrb.mxu2 %v258_v18  ;;  %817 = vmatpush.msrb.mxu3 %v275_v19  ;;  %v340_v15 = vld [vmem:[%s2548_s1 + $0x990] sm:$0xff]  ;;  %v322_v18 = vld [vmem:[%s2548_s1 + $0x900] sm:$0xff]  ;;  %v339_v19 = vld [vmem:[%s2548_s1 + $0x988] sm:$0xff] }
  0x88   :  { %759 = vmatmul.f32.vlgmr.msrb.gmra.mxu0 %v1830_v29  ;;  %799 = vmatmul.f32.vlgmr.msrb.gmra.mxu2 %v1832_v31  ;;  %v303_v29 = vld [vmem:[%s2548_s1 + $0x868] sm:$0xff]  ;;  %v320_v31 = vld [vmem:[%s2548_s1 + $0x8f0] sm:$0xff] }
  0x89   :  { %823 = vmatpush.msra.mxu0 %v305_v20  ;;  %863 = vmatpush.msra.mxu2 %v337_v21  ;;  %v468_v20 = vld.sshfl [vmem:[#allocation1] sm:$0xff pattern:$0x73625140]  ;;  %v470_v21 = vld.sshfl [vmem:[#allocation1 + $0x10] sm:$0xff pattern:$0x73625140] }
  0x8a   :  { %778 = vmatpush.msrb.mxu1 %v242_v22  ;;  %818 = vmatpush.msrb.mxu3 %v274_v23  ;;  %v369_v22 = vld [vmem:[%s2548_s1 + $0xa78] sm:$0xff] }
  0x8b   :  { %779 = vmatmul.f32.vlgmr.msrb.gmra.mxu1 %v1834_v32  ;;  %819 = vmatmul.f32.vlgmr.msrb.gmra.mxu3 %v1842_v33  ;;  %v352_v32 = vld [vmem:[%s2548_s1 + $0x9f0] sm:$0xff]  ;;  %v319_v33 = vld [vmem:[%s2548_s1 + $0x8e8] sm:$0xff]  ;;  %v401_v23 = vld [vmem:[%s2548_s1 + $0xb78] sm:$0xff] }
  0x8c   :  { %824 = vmatpush.msra.mxu0 %v304_v24  ;;  %843 = vmatpush.msra.mxu1 %v321_v25  ;;  %v306_v24 = vld [vmem:[%s2548_s1 + $0x880] sm:$0xff] }
  0x8d   :  { %864 = vmatpush.msra.mxu2 %v336_v26  ;;  %883 = vmatpush.msra.mxu3 %v353_v28  ;;  %v338_v25 = vld [vmem:[%s2548_s1 + $0x980] sm:$0xff]  ;;  %v469_v26 = vld.sshfl [vmem:[#allocation1 + $0x8] sm:$0xff pattern:$0x73625140] }
  0x8e   :  { %825 = vmatpush.msra.mxu0 %v303_v29  ;;  %844 = vmatpush.msra.mxu1 %v320_v31  ;;  %v471_v28 = vld.sshfl [vmem:[#allocation1 + $0x18] sm:$0xff pattern:$0x73625140]  ;;  %v368_v29 = vld [vmem:[%s2548_s1 + $0xa70] sm:$0xff] }
  0x8f   :  { %865 = vmatpush.msra.mxu2 %v335_v27  ;;  %884 = vmatpush.msra.mxu3 %v352_v32  ;;  %v385_v31 = vld [vmem:[%s2548_s1 + $0xaf8] sm:$0xff]  ;;  %v400_v27 = vld [vmem:[%s2548_s1 + $0xb70] sm:$0xff] }
  0x90   :  { %826 = vmatpush.msra.mxu0 %v302_v30  ;;  %845 = vmatpush.msra.mxu1 %v319_v33  ;;  %v417_v32 = vld [vmem:[%s2548_s1 + $0xbf8] sm:$0xff]  ;;  %v367_v30 = vld [vmem:[%s2548_s1 + $0xa68] sm:$0xff]  ;;  %v384_v33 = vld [vmem:[%s2548_s1 + $0xaf0] sm:$0xff] }
  0x91   :  { %866 = vmatpush.msra.mxu2 %v334_v34  ;;  %885 = vmatpush.msra.mxu3 %v351_v35  ;;  %v399_v34 = vld [vmem:[%s2548_s1 + $0xb68] sm:$0xff]  ;;  %v416_v35 = vld [vmem:[%s2548_s1 + $0xbf0] sm:$0xff] }
  0x92   :  { %827 = vmatpush.msra.mxu0 %v301_v36  ;;  %846 = vmatpush.msra.mxu1 %v318_v37  ;;  %v366_v36 = vld [vmem:[%s2548_s1 + $0xa60] sm:$0xff]  ;;  %v383_v37 = vld [vmem:[%s2548_s1 + $0xae8] sm:$0xff] }
  0x93   :  { %867 = vmatpush.msra.mxu2 %v333_v38  ;;  %886 = vmatpush.msra.mxu3 %v350_v39  ;;  %v398_v38 = vld [vmem:[%s2548_s1 + $0xb60] sm:$0xff]  ;;  %v415_v39 = vld [vmem:[%s2548_s1 + $0xbe8] sm:$0xff] }
  0x94   :  { %828 = vmatpush.msra.mxu0 %v300_v40  ;;  %847 = vmatpush.msra.mxu1 %v317_v41  ;;  %v365_v40 = vld [vmem:[%s2548_s1 + $0xa58] sm:$0xff]  ;;  %v382_v41 = vld [vmem:[%s2548_s1 + $0xae0] sm:$0xff] }
  0x95   :  { %868 = vmatpush.msra.mxu2 %v332_v42  ;;  %887 = vmatpush.msra.mxu3 %v349_v43  ;;  %v397_v42 = vld [vmem:[%s2548_s1 + $0xb58] sm:$0xff]  ;;  %v414_v43 = vld [vmem:[%s2548_s1 + $0xbe0] sm:$0xff] }
  0x96   :  { %829 = vmatpush.msra.mxu0 %v299_v44  ;;  %848 = vmatpush.msra.mxu1 %v316_v45  ;;  %v364_v44 = vld [vmem:[%s2548_s1 + $0xa50] sm:$0xff]  ;;  %v381_v45 = vld [vmem:[%s2548_s1 + $0xad8] sm:$0xff] }
  0x97   :  { %869 = vmatpush.msra.mxu2 %v331_v46  ;;  %888 = vmatpush.msra.mxu3 %v348_v47  ;;  %v396_v46 = vld [vmem:[%s2548_s1 + $0xb50] sm:$0xff]  ;;  %v413_v47 = vld [vmem:[%s2548_s1 + $0xbd8] sm:$0xff] }
  0x98   :  { %830 = vmatpush.msra.mxu0 %v298_v48  ;;  %849 = vmatpush.msra.mxu1 %v315_v49  ;;  %v363_v48 = vld [vmem:[%s2548_s1 + $0xa48] sm:$0xff]  ;;  %v380_v49 = vld [vmem:[%s2548_s1 + $0xad0] sm:$0xff] }
  0x99   :  { %870 = vmatpush.msra.mxu2 %v330_v50  ;;  %889 = vmatpush.msra.mxu3 %v347_v51  ;;  %v395_v50 = vld [vmem:[%s2548_s1 + $0xb48] sm:$0xff]  ;;  %v412_v51 = vld [vmem:[%s2548_s1 + $0xbd0] sm:$0xff] }
  0x9a   :  { %831 = vmatpush.msra.mxu0 %v297_v52  ;;  %850 = vmatpush.msra.mxu1 %v314_v53  ;;  %v362_v52 = vld [vmem:[%s2548_s1 + $0xa40] sm:$0xff]  ;;  %v379_v53 = vld [vmem:[%s2548_s1 + $0xac8] sm:$0xff] }
  0x9b   :  { %871 = vmatpush.msra.mxu2 %v329_v54  ;;  %890 = vmatpush.msra.mxu3 %v346_v55  ;;  %v394_v54 = vld [vmem:[%s2548_s1 + $0xb40] sm:$0xff]  ;;  %v411_v55 = vld [vmem:[%s2548_s1 + $0xbc8] sm:$0xff] }
  0x9c   :  { %832 = vmatpush.msra.mxu0 %v296_v56  ;;  %851 = vmatpush.msra.mxu1 %v313_v57  ;;  %v361_v56 = vld [vmem:[%s2548_s1 + $0xa38] sm:$0xff]  ;;  %v378_v57 = vld [vmem:[%s2548_s1 + $0xac0] sm:$0xff] }
  0x9d   :  { %872 = vmatpush.msra.mxu2 %v328_v58  ;;  %891 = vmatpush.msra.mxu3 %v345_v59  ;;  %v393_v58 = vld [vmem:[%s2548_s1 + $0xb38] sm:$0xff]  ;;  %v410_v59 = vld [vmem:[%s2548_s1 + $0xbc0] sm:$0xff] }
  0x9e   :  { %833 = vmatpush.msra.mxu0 %v295_v60  ;;  %852 = vmatpush.msra.mxu1 %v312_v61  ;;  %v360_v60 = vld [vmem:[%s2548_s1 + $0xa30] sm:$0xff]  ;;  %v377_v61 = vld [vmem:[%s2548_s1 + $0xab8] sm:$0xff] }
  0x9f   :  { %873 = vmatpush.msra.mxu2 %v327_v62  ;;  %892 = vmatpush.msra.mxu3 %v344_v63  ;;  %v392_v62 = vld [vmem:[%s2548_s1 + $0xb30] sm:$0xff]  ;;  %v409_v63 = vld [vmem:[%s2548_s1 + $0xbb8] sm:$0xff] }
  0xa0   :  { %834 = vmatpush.msra.mxu0 %v294_v0  ;;  %853 = vmatpush.msra.mxu1 %v311_v1  ;;  %v359_v0 = vld [vmem:[%s2548_s1 + $0xa28] sm:$0xff]  ;;  %v376_v1 = vld [vmem:[%s2548_s1 + $0xab0] sm:$0xff] }
  0xa1   :  { %874 = vmatpush.msra.mxu2 %v326_v2  ;;  %893 = vmatpush.msra.mxu3 %v343_v3  ;;  %v391_v2 = vld [vmem:[%s2548_s1 + $0xb28] sm:$0xff]  ;;  %v408_v3 = vld [vmem:[%s2548_s1 + $0xbb0] sm:$0xff] }
  0xa2   :  { %835 = vmatpush.msra.mxu0 %v293_v4  ;;  %854 = vmatpush.msra.mxu1 %v310_v5  ;;  %v358_v4 = vld [vmem:[%s2548_s1 + $0xa20] sm:$0xff]  ;;  %v375_v5 = vld [vmem:[%s2548_s1 + $0xaa8] sm:$0xff] }
  0xa3   :  { %875 = vmatpush.msra.mxu2 %v325_v6  ;;  %894 = vmatpush.msra.mxu3 %v342_v7  ;;  %v390_v6 = vld [vmem:[%s2548_s1 + $0xb20] sm:$0xff]  ;;  %v407_v7 = vld [vmem:[%s2548_s1 + $0xba8] sm:$0xff] }
  0xa4   :  { %836 = vmatpush.msra.mxu0 %v292_v8  ;;  %855 = vmatpush.msra.mxu1 %v309_v9  ;;  %v357_v8 = vld [vmem:[%s2548_s1 + $0xa18] sm:$0xff]  ;;  %v374_v9 = vld [vmem:[%s2548_s1 + $0xaa0] sm:$0xff] }
  0xa5   :  { %876 = vmatpush.msra.mxu2 %v324_v10  ;;  %895 = vmatpush.msra.mxu3 %v341_v11  ;;  %v389_v10 = vld [vmem:[%s2548_s1 + $0xb18] sm:$0xff]  ;;  %v406_v11 = vld [vmem:[%s2548_s1 + $0xba0] sm:$0xff] }
  0xa6   :  { %837 = vmatpush.msra.mxu0 %v291_v12  ;;  %856 = vmatpush.msra.mxu1 %v308_v13  ;;  %v356_v12 = vld [vmem:[%s2548_s1 + $0xa10] sm:$0xff]  ;;  %v373_v13 = vld [vmem:[%s2548_s1 + $0xa98] sm:$0xff] }
  0xa7   :  { %877 = vmatpush.msra.mxu2 %v323_v14  ;;  %896 = vmatpush.msra.mxu3 %v340_v15  ;;  %v33_v14 = vld [vmem:[%s2547_s0 + $0x30] sm:$0x3] }
  0xa8   :  { %838 = vmatpush.msra.mxu0 %v290_v16  ;;  %857 = vmatpush.msra.mxu1 %v307_v17  ;;  %v388_v15 = vld [vmem:[%s2548_s1 + $0xb10] sm:$0xff]  ;;  %v405_v16 = vld [vmem:[%s2548_s1 + $0xb98] sm:$0xff]  ;;  %476 = vst [vmem:[#allocation1] ss:$4 sm:$0xff] %v33_v14  ;;  %v355_v17 = vld [vmem:[%s2548_s1 + $0xa08] sm:$0xff] }
  0xa9   :  { %878 = vmatpush.msra.mxu2 %v322_v18  ;;  %897 = vmatpush.msra.mxu3 %v339_v19  ;;  %v372_v18 = vld [vmem:[%s2548_s1 + $0xa90] sm:$0xff]  ;;  %v387_v19 = vld [vmem:[%s2548_s1 + $0xb08] sm:$0xff] }
  0xaa   :  { %839 = vmatmul.f32.vlgmr.msra.gmra.mxu0 %v468_v20  ;;  %879 = vmatmul.f32.vlgmr.msra.gmra.mxu2 %v470_v21  ;;  %v404_v20 = vld [vmem:[%s2548_s1 + $0xb90] sm:$0xff]  ;;  %v354_v21 = vld [vmem:[%s2548_s1 + $0xa00] sm:$0xff] }
  0xab   :  { %903 = vmatpush.msrb.mxu0 %v369_v22  ;;  %943 = vmatpush.msrb.mxu2 %v401_v23  ;;  %v371_v22 = vld [vmem:[%s2548_s1 + $0xa88] sm:$0xff]  ;;  %v386_v23 = vld [vmem:[%s2548_s1 + $0xb00] sm:$0xff] }
  0xac   :  { %858 = vmatpush.msra.mxu1 %v306_v24  ;;  %898 = vmatpush.msra.mxu3 %v338_v25  ;;  %v403_v24 = vld [vmem:[%s2548_s1 + $0xb88] sm:$0xff]  ;;  %v472_v25 = vld.sshfl [vmem:[#allocation1 + $0x20] sm:$0xff pattern:$0x73625140] }
  0xad   :  { %859 = vmatmul.f32.vlgmr.msra.gmra.mxu1 %v469_v26  ;;  %899 = vmatmul.f32.vlgmr.msra.gmra.mxu3 %v471_v28  ;;  %v474_v26 = vld.sshfl [vmem:[#allocation1 + $0x30] sm:$0xff pattern:$0x73625140]  ;;  %v433_v28 = vld [vmem:[%s2548_s1 + $0xc78] sm:$0xff] }
  0xae   :  { %904 = vmatpush.msrb.mxu0 %v368_v29  ;;  %923 = vmatpush.msrb.mxu1 %v385_v31  ;;  %v370_v29 = vld [vmem:[%s2548_s1 + $0xa80] sm:$0xff] }
  0xaf   :  { %944 = vmatpush.msrb.mxu2 %v400_v27  ;;  %963 = vmatpush.msrb.mxu3 %v417_v32  ;;  %v402_v31 = vld [vmem:[%s2548_s1 + $0xb80] sm:$0xff]  ;;  %v473_v27 = vld.sshfl [vmem:[#allocation1 + $0x28] sm:$0xff pattern:$0x73625140] }
  0xb0   :  { %905 = vmatpush.msrb.mxu0 %v367_v30  ;;  %924 = vmatpush.msrb.mxu1 %v384_v33  ;;  %v475_v32 = vld.sshfl [vmem:[#allocation1 + $0x38] sm:$0xff pattern:$0x73625140]  ;;  %v432_v30 = vld [vmem:[%s2548_s1 + $0xc70] sm:$0xff]  ;;  %v431_v33 = vld [vmem:[%s2548_s1 + $0xc68] sm:$0xff] }
  0xb1   :  { %945 = vmatpush.msrb.mxu2 %v399_v34  ;;  %964 = vmatpush.msrb.mxu3 %v416_v35  ;;  %v430_v34 = vld [vmem:[%s2548_s1 + $0xc60] sm:$0xff]  ;;  %v429_v35 = vld [vmem:[%s2548_s1 + $0xc58] sm:$0xff] }
  0xb2   :  { %906 = vmatpush.msrb.mxu0 %v366_v36  ;;  %925 = vmatpush.msrb.mxu1 %v383_v37  ;;  %v428_v36 = vld [vmem:[%s2548_s1 + $0xc50] sm:$0xff]  ;;  %v427_v37 = vld [vmem:[%s2548_s1 + $0xc48] sm:$0xff] }
  0xb3   :  { %946 = vmatpush.msrb.mxu2 %v398_v38  ;;  %965 = vmatpush.msrb.mxu3 %v415_v39  ;;  %v426_v38 = vld [vmem:[%s2548_s1 + $0xc40] sm:$0xff]  ;;  %v425_v39 = vld [vmem:[%s2548_s1 + $0xc38] sm:$0xff] }
  0xb4   :  { %907 = vmatpush.msrb.mxu0 %v365_v40  ;;  %926 = vmatpush.msrb.mxu1 %v382_v41  ;;  %v424_v40 = vld [vmem:[%s2548_s1 + $0xc30] sm:$0xff]  ;;  %v423_v41 = vld [vmem:[%s2548_s1 + $0xc28] sm:$0xff] }
  0xb5   :  { %947 = vmatpush.msrb.mxu2 %v397_v42  ;;  %966 = vmatpush.msrb.mxu3 %v414_v43  ;;  %v422_v42 = vld [vmem:[%s2548_s1 + $0xc20] sm:$0xff]  ;;  %v421_v43 = vld [vmem:[%s2548_s1 + $0xc18] sm:$0xff] }
  0xb6   :  { %908 = vmatpush.msrb.mxu0 %v364_v44  ;;  %927 = vmatpush.msrb.mxu1 %v381_v45  ;;  %v420_v44 = vld [vmem:[%s2548_s1 + $0xc10] sm:$0xff]  ;;  %v419_v45 = vld [vmem:[%s2548_s1 + $0xc08] sm:$0xff] }
  0xb7   :  { %948 = vmatpush.msrb.mxu2 %v396_v46  ;;  %967 = vmatpush.msrb.mxu3 %v413_v47  ;;  %v418_v46 = vld [vmem:[%s2548_s1 + $0xc00] sm:$0xff] }
  0xb8   :  { %909 = vmatpush.msrb.mxu0 %v363_v48  ;;  %928 = vmatpush.msrb.mxu1 %v380_v49  ;;  %v477_v47 = vld.sshfl [vmem:[#allocation1] sm:$0xff pattern:$0x73625140] }
  0xb9   :  { %949 = vmatpush.msrb.mxu2 %v395_v50  ;;  %968 = vmatpush.msrb.mxu3 %v412_v51  ;;  %v1103_v48 = vld [vmem:[%s2549_s2] ss:$0 sm:$0xff] }
  0xba   :  { %910 = vmatpush.msrb.mxu0 %v362_v52  ;;  %929 = vmatpush.msrb.mxu1 %v379_v53 }
  0xbb   :  { %950 = vmatpush.msrb.mxu2 %v394_v54  ;;  %969 = vmatpush.msrb.mxu3 %v411_v55 }
  0xbc   :  { %911 = vmatpush.msrb.mxu0 %v361_v56  ;;  %930 = vmatpush.msrb.mxu1 %v378_v57 }
  0xbd   :  { %951 = vmatpush.msrb.mxu2 %v393_v58  ;;  %970 = vmatpush.msrb.mxu3 %v410_v59  ;;  %v1019_v59 = vld [vmem:[%s2550_s3 + $0x78] sm:$0xff] }
  0xbe   :  { %912 = vmatpush.msrb.mxu0 %v360_v60  ;;  %931 = vmatpush.msrb.mxu1 %v377_v61 }
  0xbf   :  { %952 = vmatpush.msrb.mxu2 %v392_v62  ;;  %971 = vmatpush.msrb.mxu3 %v409_v63  ;;  %v520_v49 = vpop.f32.mrf.mxu0  ;;  %v1018_v62 = vld [vmem:[%s2550_s3 + $0x70] sm:$0xff] }
  0xc0   :  { %913 = vmatpush.msrb.mxu0 %v359_v0  ;;  %932 = vmatpush.msrb.mxu1 %v376_v1  ;;  %v521_v50 = vadd.f32 %v1103_v48, %v520_v49  ;;  %v1017_v0 = vld [vmem:[%s2550_s3 + $0x68] sm:$0xff]  ;;  %v1016_v1 = vld [vmem:[%s2550_s3 + $0x60] sm:$0xff] }
  0xc1   :  { %953 = vmatpush.msrb.mxu2 %v391_v2  ;;  %972 = vmatpush.msrb.mxu3 %v408_v3  ;;  %v1015_v3 = vld [vmem:[%s2550_s3 + $0x58] sm:$0xff] }
  0xc2   :  { %914 = vmatpush.msrb.mxu0 %v358_v4  ;;  %933 = vmatpush.msrb.mxu1 %v375_v5  ;;  %v540_v51 = vpop.f32.mrf.mxu1  ;;  %v1014_v5 = vld [vmem:[%s2550_s3 + $0x50] sm:$0xff] }
  0xc3   :  { %954 = vmatpush.msrb.mxu2 %v390_v6  ;;  %973 = vmatpush.msrb.mxu3 %v407_v7  ;;  %v541_v52 = vadd.f32 %v540_v51, %v521_v50  ;;  %v560_v53 = vpop.f32.mrf.mxu2  ;;  %v1052_v50 = vld [vmem:[%s2552_s5 + $0x38] sm:$0xff] }
  0xc4   :  { %915 = vmatpush.msrb.mxu0 %v357_v8  ;;  %934 = vmatpush.msrb.mxu1 %v374_v9  ;;  %v1013_v8 = vld [vmem:[%s2550_s3 + $0x48] sm:$0xff] }
  0xc5   :  { %955 = vmatpush.msrb.mxu2 %v389_v10  ;;  %974 = vmatpush.msrb.mxu3 %v406_v11  ;;  %v561_v54 = vadd.f32 %v560_v53, %v541_v52  ;;  %v1012_v10 = vld [vmem:[%s2550_s3 + $0x40] sm:$0xff]  ;;  %v1051_v52 = vld [vmem:[%s2552_s5 + $0x30] sm:$0xff] }
  0xc6   :  { %916 = vmatpush.msrb.mxu0 %v356_v12  ;;  %935 = vmatpush.msrb.mxu1 %v373_v13  ;;  %v580_v55 = vpop.f32.mrf.mxu3  ;;  %v1011_v12 = vld [vmem:[%s2550_s3 + $0x38] sm:$0xff] }
  0xc7   :  { %956 = vmatpush.msrb.mxu2 %v388_v15  ;;  %975 = vmatpush.msrb.mxu3 %v405_v16  ;;  %v581_v56 = vadd.f32 %v580_v55, %v561_v54  ;;  %v1010_v15 = vld [vmem:[%s2550_s3 + $0x30] sm:$0xff]  ;;  %v1050_v54 = vld [vmem:[%s2552_s5 + $0x28] sm:$0xff] }
  0xc8   :  { %917 = vmatpush.msrb.mxu0 %v355_v17  ;;  %936 = vmatpush.msrb.mxu1 %v372_v18  ;;  %v1009_v17 = vld [vmem:[%s2550_s3 + $0x28] sm:$0xff] }
  0xc9   :  { %957 = vmatpush.msrb.mxu2 %v387_v19  ;;  %976 = vmatpush.msrb.mxu3 %v404_v20  ;;  %v600_v57 = vpop.f32.mrf.mxu0  ;;  %v1008_v19 = vld [vmem:[%s2550_s3 + $0x20] sm:$0xff] }
  0xca   :  { %918 = vmatpush.msrb.mxu0 %v354_v21  ;;  %937 = vmatpush.msrb.mxu1 %v371_v22  ;;  %v601_v58 = vadd.f32 %v600_v57, %v581_v56  ;;  %v1007_v22 = vld [vmem:[%s2550_s3 + $0x18] sm:$0xff]  ;;  %v1049_v57 = vld [vmem:[%s2552_s5 + $0x20] sm:$0xff] }
  0xcb   :  { %958 = vmatpush.msrb.mxu2 %v386_v23  ;;  %977 = vmatpush.msrb.mxu3 %v403_v24 }
  0xcc   :  { %919 = vmatmul.f32.vlgmr.msrb.gmra.mxu0 %v472_v25  ;;  %959 = vmatmul.f32.vlgmr.msrb.gmra.mxu2 %v474_v26  ;;  %v620_v60 = vpop.f32.mrf.mxu1  ;;  %v1006_v25 = vld [vmem:[%s2550_s3 + $0x10] sm:$0xff] }
  0xcd   :  { %983 = vmatpush.msra.mxu0 %v433_v28  ;;  %938 = vmatpush.msrb.mxu1 %v370_v29  ;;  %v621_v61 = vadd.f32 %v620_v60, %v601_v58  ;;  %v640_v63 = vpop.f32.mrf.mxu2  ;;  %v1005_v29 = vld [vmem:[%s2550_s3 + $0x8] sm:$0xff] }
  0xce   :  { %978 = vmatpush.msrb.mxu3 %v402_v31  ;;  %939 = vmatmul.f32.vlgmr.msrb.gmra.mxu1 %v473_v27  ;;  %v1004_v27 = vld [vmem:[%s2550_s3] sm:$0xff] }
  0xcf   :  { %979 = vmatmul.f32.vlgmr.msrb.gmra.mxu3 %v475_v32  ;;  %984 = vmatpush.msra.mxu0 %v432_v30  ;;  %v641_v2 = vadd.f32 %v640_v63, %v621_v61  ;;  %v1060_v30 = vld [vmem:[%s2552_s5 + $0x78] sm:$0xff] }
  0xd0   :  { %1024 = vmatpush.msra.mxu1 %v1019_v59  ;;  %v660_v4 = vpop.f32.mrf.mxu3  ;;  %1065 = vmatpush.msra.mxu2 %v1060_v30  ;;  %v1048_v59 = vld [vmem:[%s2552_s5 + $0x18] sm:$0xff] }
  0xd1   :  { %985 = vmatpush.msra.mxu0 %v431_v33  ;;  %v661_v7 = vadd.f32 %v660_v4, %v641_v2  ;;  %v1059_v33 = vld [vmem:[%s2552_s5 + $0x70] sm:$0xff]  ;;  %v1046_v2 = vld [vmem:[%s2552_s5 + $0x8] sm:$0xff]  ;;  %v1104_v4 = vld [vmem:[%s2551_s4] ss:$0 sm:$0xff] }
  0xd2   :  { %1025 = vmatpush.msra.mxu1 %v1018_v62  ;;  %1066 = vmatpush.msra.mxu2 %v1059_v33 }
  0xd3   :  { %986 = vmatpush.msra.mxu0 %v430_v34 }
  0xd4   :  { %1026 = vmatpush.msra.mxu1 %v1017_v0 }
  0xd5   :  { %987 = vmatpush.msra.mxu0 %v429_v35 }
  0xd6   :  { %1027 = vmatpush.msra.mxu1 %v1016_v1  ;;  %v1047_v1 = vld [vmem:[%s2552_s5 + $0x10] sm:$0xff] }
  0xd7   :  { %988 = vmatpush.msra.mxu0 %v428_v36  ;;  %v1058_v36 = vld [vmem:[%s2552_s5 + $0x68] sm:$0xff] }
  0xd8   :  { %1028 = vmatpush.msra.mxu1 %v1015_v3  ;;  %1067 = vmatpush.msra.mxu2 %v1058_v36  ;;  %v1045_v3 = vld [vmem:[%s2552_s5] sm:$0xff] }
  0xd9   :  { %989 = vmatpush.msra.mxu0 %v427_v37 }
  0xda   :  { %1029 = vmatpush.msra.mxu1 %v1014_v5 }
  0xdb   :  { %990 = vmatpush.msra.mxu0 %v426_v38  ;;  %v1057_v38 = vld [vmem:[%s2552_s5 + $0x60] sm:$0xff] }
  0xdc   :  { %1030 = vmatpush.msra.mxu1 %v1013_v8  ;;  %1068 = vmatpush.msra.mxu2 %v1057_v38  ;;  %v1105_v8 = vld [vmem:[%s2553_s6] ss:$0 sm:$0xff] }
  0xdd   :  { %991 = vmatpush.msra.mxu0 %v425_v39 }
  0xde   :  { %1031 = vmatpush.msra.mxu1 %v1012_v10 }
  0xdf   :  { %992 = vmatpush.msra.mxu0 %v424_v40  ;;  %v1056_v40 = vld [vmem:[%s2552_s5 + $0x58] sm:$0xff] }
  0xe0   :  { %1032 = vmatpush.msra.mxu1 %v1011_v12  ;;  %1069 = vmatpush.msra.mxu2 %v1056_v40 }
  0xe1   :  { %993 = vmatpush.msra.mxu0 %v423_v41 }
  0xe2   :  { %1033 = vmatpush.msra.mxu1 %v1010_v15 }
  0xe3   :  { %994 = vmatpush.msra.mxu0 %v422_v42  ;;  %v680_v6 = vpop.f32.mrf.mxu0 }
  0xe4   :  { %v681_v9 = vadd.f32 %v680_v6, %v661_v7  ;;  %1034 = vmatpush.msra.mxu1 %v1009_v17 }
  0xe5   :  { %995 = vmatpush.msra.mxu0 %v421_v43  ;;  %v1055_v43 = vld [vmem:[%s2552_s5 + $0x50] sm:$0xff] }
  0xe6   :  { %v700_v11 = vpop.f32.mrf.mxu1  ;;  %1035 = vmatpush.msra.mxu1 %v1008_v19  ;;  %1070 = vmatpush.msra.mxu2 %v1055_v43 }
  0xe7   :  { %996 = vmatpush.msra.mxu0 %v420_v44  ;;  %v701_v14 = vadd.f32 %v700_v11, %v681_v9 }
  0xe8   :  { %1036 = vmatpush.msra.mxu1 %v1007_v22 }
  0xe9   :  { %997 = vmatpush.msra.mxu0 %v419_v45  ;;  %v720_v13 = vpop.f32.mrf.mxu2  ;;  %v1054_v45 = vld [vmem:[%s2552_s5 + $0x48] sm:$0xff] }
  0xea   :  { %v721_v16 = vadd.f32 %v720_v13, %v701_v14  ;;  %1037 = vmatpush.msra.mxu1 %v1006_v25  ;;  %1071 = vmatpush.msra.mxu2 %v1054_v45 }
  0xeb   :  { %998 = vmatpush.msra.mxu0 %v418_v46 }
  0xec   :  { %999 = vmatmul.f32.vlgmr.msra.gmra.mxu0 %v477_v47  ;;  %v740_v18 = vpop.f32.mrf.mxu3  ;;  %1038 = vmatpush.msra.mxu1 %v1005_v29  ;;  %v1053_v47 = vld [vmem:[%s2552_s5 + $0x40] sm:$0xff] }
  0xed   :  { %v741_v21 = vadd.f32 %v740_v18, %v721_v16  ;;  %1072 = vmatpush.msra.mxu2 %v1053_v47 }
  0xee   :  { %1039 = vmatpush.msra.mxu1 %v1004_v27 }
  0xef   :  { %1073 = vmatpush.msra.mxu2 %v1052_v50 }
  0xf1   :  { %1074 = vmatpush.msra.mxu2 %v1051_v52 }
  0xf3   :  { %1075 = vmatpush.msra.mxu2 %v1050_v54 }
  0xf5   :  { %1076 = vmatpush.msra.mxu2 %v1049_v57 }
  0xf7   :  { %1077 = vmatpush.msra.mxu2 %v1048_v59 }
  0xf9   :  { %1078 = vmatpush.msra.mxu2 %v1047_v1 }
  0xfb   :  { %1079 = vmatpush.msra.mxu2 %v1046_v2 }
  0xfd   :  { %1080 = vmatpush.msra.mxu2 %v1045_v3 }
 0x105   :  { %v760_v20 = vpop.f32.mrf.mxu0 }
 0x106   :  { %v761_v23 = vadd.f32 %v760_v20, %v741_v21 }
 0x108   :  { %v780_v24 = vpop.f32.mrf.mxu1 }
 0x109   :  { %v781_v28 = vadd.f32 %v780_v24, %v761_v23 }
 0x10b   :  { %v800_v26 = vpop.f32.mrf.mxu2 }
 0x10c   :  { %v801_v31 = vadd.f32 %v800_v26, %v781_v28 }
 0x10e   :  { %v820_v32 = vpop.f32.mrf.mxu3 }
 0x10f   :  { %v821_v35 = vadd.f32 %v820_v32, %v801_v31 }
 0x127   :  { %v840_v34 = vpop.f32.mrf.mxu0 }
 0x128   :  { %v841_v37 = vadd.f32 %v840_v34, %v821_v35 }
 0x12a   :  { %v860_v39 = vpop.f32.mrf.mxu1 }
 0x12b   :  { %v861_v42 = vadd.f32 %v860_v39, %v841_v37 }
 0x12d   :  { %v880_v41 = vpop.f32.mrf.mxu2 }
 0x12e   :  { %v881_v44 = vadd.f32 %v880_v41, %v861_v42 }
 0x130   :  { %v900_v46 = vpop.f32.mrf.mxu3 }
 0x131   :  { %v901_v49 = vadd.f32 %v900_v46, %v881_v44 }
 0x149   :  { %v920_v48 = vpop.f32.mrf.mxu0 }
 0x14a   :  { %v921_v51 = vadd.f32 %v920_v48, %v901_v49 }
 0x14b   :  { %v940_v53 = vpop.f32.mrf.mxu1 }
 0x14c   :  { %v941_v56 = vadd.f32 %v940_v53, %v921_v51 }
 0x14f   :  { %v960_v55 = vpop.f32.mrf.mxu2 }
 0x150   :  { %v961_v58 = vadd.f32 %v960_v55, %v941_v56 }
 0x152   :  { %v980_v60 = vpop.f32.mrf.mxu3 }
 0x153   :  { %v981_v61 = vadd.f32 %v980_v60, %v961_v58 }
 0x169   :  { %v1000_v62 = vpop.f32.mrf.mxu0 }
 0x16a   :  { %v1001_v63 = vadd.f32 %v1000_v62, %v981_v61 }
 0x16c   :  { %v1003_v0 = vmax.f32 %v1001_v63, 0.0 }
 0x16e   :  { %1040 = vmatmul.f32.vlgmr.msra.gmra.mxu1 %v1003_v0 }
 0x1eb   :  { %v1041_v5 = vpop.f32.mrf.mxu1 }
 0x1ec   :  { %v1042_v6 = vadd.f32 %v1104_v4, %v1041_v5 }
 0x1ee   :  { %v1044_v7 = vmax.f32 %v1042_v6, 0.0 }
 0x1f0   :  { %1081 = vmatmul.f32.vlgmr.msra.gmra.mxu2 %v1044_v7 }
 0x273   :  { %v1082_v9 = vpop.f32.mrf.mxu2 }
 0x274   :  { %v1083_v10 = vadd.f32 %v1105_v8, %v1082_v9 }
 0x276   :  { %1085 = vst [vmem:[#allocation2] sm:$0x3] %v1083_v10 }
 0x277   :  { %1096 = dma.vmem_to_hbm [thread:$0]  %s1092_s22, 32, %s1094_s25, [#allocation3]  }
 0x278   :  { %1130 = dma.done.wait [#allocation3], 32  }
 0x279   :  { %1131 = vsyncadd [#allocation3], 4294967264 }
 0x27a   :  { %1101 = vsyncpa [#allocation3], 1 }

</bundles_post_ra>
